<compile_context>
chip_gen: v5e
topology: v5e:2x2
jax: 0.10.0
libtpu: 0.0.40
codegen_flags: <defaults>
</compile_context>

<pallas_src>
import functools

import jax
import jax.numpy as jnp
from jax.experimental import pallas as pl
from jax.experimental.pallas import tpu as pltpu

_LANE = 128


def _round_up(v, m):
    return (v + m - 1) // m * m


def _vmem_limit_bytes():
    """Generation-aware VMEM limit (64 MiB on v7x, ~112 MiB on v5e/v6e)."""
    cap = None
    try:
        info = pltpu.get_tpu_info()
        for name in ("vmem_capacity_bytes", "vmem_bytes", "vmem_size_bytes"):
            cap = getattr(info, name, None)
            if cap:
                break
    except Exception:
        cap = None
    if not cap:
        cap = 64 << 20          # safe default for every generation
    return int(min(int(cap * 0.85), 112 << 20))


_VMEM_LIMIT = _vmem_limit_bytes()
_CONV_BUDGET = max(16 << 20, _VMEM_LIMIT // 3)   # per-conv working-set budget


# ----------------------------- Pallas kernels ------------------------------

def _conv3d_tap_kernel(x_ref, w_ref, o_ref, *, taps, tr):
    # x_ref: (1, 1, TR + 2*delta, Cin)  halo slab of flattened padded-volume rows
    # w_ref: (27, Cin, Coutp)           one (Cin, Coutp) matrix per 3x3x3 tap
    # o_ref: (1, 1, TR, Coutp)
    coutp = o_ref.shape[-1]
    acc = jnp.zeros((tr, coutp), jnp.float32)
    for t, off in enumerate(taps):                      # static 27-tap unroll
        lhs = x_ref[0, 0, off:off + tr, :]              # (TR, Cin), bf16
        acc = acc + jnp.dot(lhs, w_ref[t], preferred_element_type=jnp.float32)
    o_ref[0, 0] = acc.astype(o_ref.dtype)


def _in_stats_kernel(x_ref, sum_ref, sq_ref):
    # pass 1: per-(sample, channel) sum and sum-of-squares over row tiles.
    @pl.when(pl.program_id(1) == 0)
    def _():
        sum_ref[...] = jnp.zeros_like(sum_ref)
        sq_ref[...] = jnp.zeros_like(sq_ref)

    x = x_ref[0].astype(jnp.float32)                    # (TS, C)
    sum_ref[0] += jnp.sum(x, axis=0, keepdims=True)
    sq_ref[0] += jnp.sum(x * x, axis=0, keepdims=True)


def _in_apply_kernel(*refs, relu, has_res):
    # pass 2: normalize, optionally fuse ReLU and/or the residual add.
    if has_res:
        x_ref, mu_ref, rs_ref, res_ref, o_ref = refs
    else:
        x_ref, mu_ref, rs_ref, o_ref = refs
        res_ref = None
    y = (x_ref[0].astype(jnp.float32) - mu_ref[0]) * rs_ref[0]
    if has_res:
        y = y + res_ref[0].astype(jnp.float32)
    if relu:
        y = jnp.maximum(y, 0.0)
    o_ref[0] = y.astype(o_ref.dtype)


# ------------------------------ op wrappers --------------------------------

def _pick_rows(R, delta, cin, coutp, in_bytes, budget):
    """Largest row tile whose double-buffered working set fits the budget."""
    tr = 512
    for cand in (1024, 2048, 4096, 8192, 16384, 32768):
        need = (2 * (cand + 2 * delta) * cin * in_bytes     # input slab (x2 buf)
                + 2 * 27 * cin * coutp * in_bytes           # weights   (x2 buf)
                + 4 * cand * coutp * 4)                     # out (x2) + f32 acc
        if need <= budget:
            tr = cand
    return min(tr, _round_up(R, 8))


def conv3d_same(x, w, compute_dtype=jnp.bfloat16):
    """3-D conv, stride 1, 'same' padding.  x: (N,D,H,W,Cin)  w: (3,3,3,Cin,Cout).

    Halo-tiled: outputs are computed on the zero-padded grid (border rows are
    garbage and sliced away), so every tap is a constant flat-row shift and
    the kernel is pure 2-D slices + 2-D MXU dots (no in-kernel reshapes).
    """
    N, D, H, W, Cin = x.shape
    Cout = w.shape[-1]
    assert w.shape == (3, 3, 3, Cin, Cout)
    Coutp = _round_up(Cout, _LANE)                 # lane-dense output stores
    Dp, Hp, Wp = D + 2, H + 2, W + 2
    R = Dp * Hp * Wp                               # rows of the padded volume
    delta = Hp * Wp + Wp + 1                       # max |flat shift| of any tap

    in_bytes = jnp.dtype(compute_dtype).itemsize
    TR = _pick_rows(R, delta, Cin, Coutp, in_bytes, _CONV_BUDGET)
    Rp = _round_up(R, TR)
    nT = Rp // TR

    wf = w.astype(compute_dtype)
    if Coutp != Cout:
        wf = jnp.pad(wf, ((0, 0),) * 4 + ((0, Coutp - Cout),))
    wf = wf.reshape(27, Cin, Coutp)

    xp = jnp.pad(x.astype(compute_dtype),
                 ((0, 0), (1, 1), (1, 1), (1, 1), (0, 0)))
    xf = xp.reshape(N, R, Cin)
    xf = jnp.pad(xf, ((0, 0), (delta, Rp - R + delta), (0, 0)))
    # overlapping halo slabs: slab i serves output rows [i*TR, (i+1)*TR)
    slabs = jnp.stack(
        [xf[:, i * TR:i * TR + TR + 2 * delta] for i in range(nT)], axis=1)
    # slabs: (N, nT, TR + 2*delta, Cin)

    # flat offset (within a slab) of tap (kd,kh,kw) for local output row 0
    taps = tuple(kd * Hp * Wp + kh * Wp + kw
                 for kd in range(3) for kh in range(3) for kw in range(3))

    out = pl.pallas_call(
        functools.partial(_conv3d_tap_kernel, taps=taps, tr=TR),
        out_shape=jax.ShapeDtypeStruct((N, nT, TR, Coutp), jnp.float32),
        grid=(N, nT),
        in_specs=[
            pl.BlockSpec((1, 1, TR + 2 * delta, Cin), lambda n, t: (n, t, 0, 0)),
            # constant index map -> fetched once by the pipeline.
            # TODO(synk): single-buffer the weights (pl.Buffered(1)) to free VMEM.
            pl.BlockSpec((27, Cin, Coutp), lambda n, t: (0, 0, 0)),
        ],
        out_specs=pl.BlockSpec((1, 1, TR, Coutp), lambda n, t: (n, t, 0, 0)),
        compiler_params=pltpu.CompilerParams(
            dimension_semantics=("parallel", "parallel"),
            vmem_limit_bytes=_VMEM_LIMIT),
    )(slabs, wf)

    out = out.reshape(N, Rp, Coutp)[:, :R, :Cout]
    out = out.reshape(N, Dp, Hp, Wp, Cout)[:, 1:1 + D, 1:1 + H, 1:1 + W, :]
    return out


def instance_norm(x, relu, residual=None, eps=1e-5):
    """InstanceNorm3d (affine=False, eps=1e-5), optional fused ReLU / residual add."""
    N, D, H, W, C = x.shape
    R = D * H * W
    TS = min(4096, _round_up(R, 8))
    Rp = _round_up(R, TS)
    nT = Rp // TS

    def flat(a):
        a = a.reshape(N, R, C)
        if Rp != R:
            a = jnp.pad(a, ((0, 0), (0, Rp - R), (0, 0)))
        return a

    xf = flat(x)

    sums, sqs = pl.pallas_call(
        _in_stats_kernel,
        out_shape=(jax.ShapeDtypeStruct((N, 1, C), jnp.float32),
                   jax.ShapeDtypeStruct((N, 1, C), jnp.float32)),
        grid=(N, nT),
        in_specs=[pl.BlockSpec((1, TS, C), lambda n, t: (n, t, 0))],
        out_specs=(pl.BlockSpec((1, 1, C), lambda n, t: (n, 0, 0)),
                   pl.BlockSpec((1, 1, C), lambda n, t: (n, 0, 0))),
        compiler_params=pltpu.CompilerParams(
            dimension_semantics=("parallel", "arbitrary"),
            vmem_limit_bytes=_VMEM_LIMIT),
    )(xf)

    mean = sums / R                                   # (N,1,C) f32
    var = jnp.maximum(sqs / R - mean * mean, 0.0)     # E[x^2] - mean^2
    rstd = jax.lax.rsqrt(var + eps)

    ins = [xf, mean, rstd]
    in_specs = [pl.BlockSpec((1, TS, C), lambda n, t: (n, t, 0)),
                pl.BlockSpec((1, 1, C), lambda n, t: (n, 0, 0)),
                pl.BlockSpec((1, 1, C), lambda n, t: (n, 0, 0))]
    if residual is not None:
        ins.append(flat(residual))
        in_specs.append(pl.BlockSpec((1, TS, C), lambda n, t: (n, t, 0)))

    out = pl.pallas_call(
        functools.partial(_in_apply_kernel, relu=relu,
                          has_res=residual is not None),
        out_shape=jax.ShapeDtypeStruct((N, Rp, C), x.dtype),
        grid=(N, nT),
        in_specs=in_specs,
        out_specs=pl.BlockSpec((1, TS, C), lambda n, t: (n, t, 0)),
        compiler_params=pltpu.CompilerParams(
            dimension_semantics=("parallel", "parallel"),
            vmem_limit_bytes=_VMEM_LIMIT),
    )(*ins)
    return out[:, :R].reshape(N, D, H, W, C)


def upsample_trilinear_x2(x):
    """nn.Upsample(scale_factor=2, mode='trilinear', align_corners=True), NDHWC."""
    # TODO(synk): fuse the three axis interpolations and the following channel
    # concat into a single Pallas kernel to avoid multiple HBM round trips of
    # the largest activations.
    def interp(x, axis):
        n_in = x.shape[axis]
        n_out = 2 * n_in
        if n_in == 1:
            return jnp.take(x, jnp.zeros((n_out,), jnp.int32), axis=axis)
        pos = jnp.arange(n_out, dtype=jnp.float32) * (n_in - 1) / (n_out - 1)
        lo = jnp.floor(pos).astype(jnp.int32)
        hi = jnp.minimum(lo + 1, n_in - 1)
        frac = pos - lo.astype(jnp.float32)
        shp = [1] * x.ndim
        shp[axis] = n_out
        frac = frac.reshape(shp)
        return (jnp.take(x, lo, axis=axis) * (1.0 - frac)
                + jnp.take(x, hi, axis=axis) * frac)

    for ax in (1, 2, 3):  # D, H, W
        x = interp(x, ax)
    return x


# ------------------------- parameters / sub-blocks --------------------------

def _conv_w(key, K, cin, cout):
    fan_in = K * K * K * cin
    return jax.random.normal(key, (K, K, K, cin, cout), jnp.float32) * (2.0 / fan_in) ** 0.5


def init_decoder_params(key, n_classes, num_channels):
    nc = num_channels

    def res_params(k, cin, cout):
        k1, k2, k3 = jax.random.split(k, 3)
        return {"w1": _conv_w(k1, 3, cin, cout),
                "w2": _conv_w(k2, 3, cout, cout),
                "wskip": _conv_w(k3, 3, cin, cout)}

    keys = jax.random.split(key, 9)
    return {
        "conv4": res_params(keys[0], nc[3] * 2 + nc[4] * 2, nc[3] * 2),
        "conv3": res_params(keys[1], nc[2] * 2 + nc[3] * 2, nc[2] * 2),
        "conv2": res_params(keys[2], nc[1] * 2 + nc[2] * 2, nc[1] * 2),
        "conv1": res_params(keys[3], nc[0] * 2 + nc[1] * 2, nc[0] * 2),
        "out5": _conv_w(keys[4], 3, nc[4] * 2, n_classes),
        "out4": _conv_w(keys[5], 3, nc[3] * 2, n_classes),
        "out3": _conv_w(keys[6], 3, nc[2] * 2, n_classes),
        "out2": _conv_w(keys[7], 3, nc[1] * 2, n_classes),
        "out1": _conv_w(keys[8], 3, nc[0] * 2, n_classes),
    }


# TODO(synk): ResidualConv / IRC3 definitions are not included in the given
# excerpt of model/ResUNet.py.  Standard ResUNet blocks are assumed:
#   ResidualConv(x) = [IN -> ReLU -> Conv3 -> Dropout3d -> IN -> ReLU -> Conv3](x)
#                     + [Conv3 -> IN](x)
#   IRC3(x)         = Conv3(ReLU(IN(x))) -> n_classes channels
# Dropout3d is identity at inference time and is therefore omitted.
def residual_conv(x, p):
    h = instance_norm(x, relu=True)
    h = conv3d_same(h, p["w1"])
    h = instance_norm(h, relu=True)
    h = conv3d_same(h, p["w2"])
    s = conv3d_same(x, p["wskip"])
    # skip-branch InstanceNorm with the residual add fused into its store.
    return instance_norm(s, relu=False, residual=h)


def irc3(x, w):
    return conv3d_same(instance_norm(x, relu=True), w)


# ------------------------------ decoder forward ------------------------------

def resunet_decoder_forward(params, enc1, enc2, enc3, enc4, enc5):
    to_ndhwc = lambda t: jnp.transpose(t, (0, 2, 3, 4, 1))
    to_ncdhw = lambda t: jnp.transpose(t, (0, 4, 1, 2, 3))
    e1, e2, e3, e4, e5 = map(to_ndhwc, (enc1, enc2, enc3, enc4, enc5))

    pred5 = irc3(e5, params["out5"])
    out = upsample_trilinear_x2(e5)
    out = jnp.concatenate([out, e4], axis=-1)
    out = residual_conv(out, params["conv4"])
    pred4 = irc3(out, params["out4"])

    out = upsample_trilinear_x2(out)
    out = jnp.concatenate([out, e3], axis=-1)
    out = residual_conv(out, params["conv3"])
    pred3 = irc3(out, params["out3"])

    out = upsample_trilinear_x2(out)
    out = jnp.concatenate([out, e2], axis=-1)
    out = residual_conv(out, params["conv2"])
    pred2 = irc3(out, params["out2"])

    out = upsample_trilinear_x2(out)
    out = jnp.concatenate([out, e1], axis=-1)
    out = residual_conv(out, params["conv1"])
    pred1 = irc3(out, params["out1"])

    return tuple(map(to_ncdhw, (pred1, pred2, pred3, pred4, pred5)))


# ----------------------------------- main ------------------------------------

if __name__ == "__main__":
    n_classes = 3
    num_channels = [2, 4, 8, 16, 32]   # scaled-down version of default [8,16,32,64,128]
    N = 2
    base = 2                           # spatial size of the deepest feature map (enc5)

    key = jax.random.PRNGKey(0)
    kp, k1, k2, k3, k4, k5 = jax.random.split(key, 6)
    params = init_decoder_params(kp, n_classes, num_channels)

    # Encoder features, PyTorch NCDHW convention: encL has C = num_channels[L-1]*2.
    def enc_shape(level):                 # level 1..5
        c = num_channels[level - 1] * 2
        s = base * (2 ** (5 - level))
        return (N, c, s, s, s)

    enc1 = jax.random.normal(k1, enc_shape(1), jnp.float32)
    enc2 = jax.random.normal(k2, enc_shape(2), jnp.float32)
    enc3 = jax.random.normal(k3, enc_shape(3), jnp.float32)
    enc4 = jax.random.normal(k4, enc_shape(4), jnp.float32)
    enc5 = jax.random.normal(k5, enc_shape(5), jnp.float32)

    # --- sanity check 1: Pallas halo-tiled conv vs XLA conv on identical bf16
    # operands (f32 accumulation both sides) -> tight tolerance catches any
    # indexing / tap-ordering bug.
    xchk = jnp.transpose(enc4, (0, 2, 3, 4, 1))
    wchk = params["out4"]
    ref = jax.lax.conv_general_dilated(
        xchk.astype(jnp.bfloat16), wchk.astype(jnp.bfloat16),
        window_strides=(1, 1, 1), padding="SAME",
        dimension_numbers=("NDHWC", "DHWIO", "NDHWC"),
        preferred_element_type=jnp.float32)
    got = conv3d_same(xchk, wchk)
    assert jnp.allclose(ref, got, atol=5e-3, rtol=5e-3), "conv kernel mismatch"

    # --- sanity check 2: two-pass tiled instance norm vs pure-JAX reference.
    xin = jnp.transpose(enc3, (0, 2, 3, 4, 1))
    m = xin.mean(axis=(1, 2, 3), keepdims=True)
    v = ((xin - m) ** 2).mean(axis=(1, 2, 3), keepdims=True)
    refn = jnp.maximum((xin - m) * jax.lax.rsqrt(v + 1e-5), 0.0)
    gotn = instance_norm(xin, relu=True)
    assert jnp.allclose(refn, gotn, atol=2e-3, rtol=2e-3), "instance norm mismatch"

    preds = jax.jit(resunet_decoder_forward)(params, enc1, enc2, enc3, enc4, enc5)
    preds = jax.block_until_ready(preds)

    for i, p in enumerate(preds):  # pred1 .. pred5
        s = base * (2 ** (4 - i))
        assert p.shape == (N, n_classes, s, s, s), p.shape
        assert p.dtype == jnp.float32
        assert bool(jnp.all(jnp.isfinite(p)))

    print("KERNEL_OK")
</pallas_src>

<mosaic_0001>
module attributes {stable_mosaic.version = 11 : i64} {
  func.func @_conv3d_tap_kernel(%arg0: i32, %arg1: i32, %arg2: memref<1x1x302x32xbf16, #tpu.memory_space<vmem>>, %arg3: memref<27x32x128xbf16, #tpu.memory_space<vmem>>, %arg4: memref<1x1x216x128xf32, #tpu.memory_space<vmem>>) attributes {dimension_semantics = [#tpu.dimension_semantics<parallel>, #tpu.dimension_semantics<parallel>], iteration_bounds = array<i64: 2, 1>, scalar_prefetch = 0 : i64, scratch_operands = 0 : i64, tpu.core_type = #tpu.core_type<tc>, window_params = [{transform_indices = @transform_0, window_bounds = array<i64: 1, 1, 302, 32>}, {pipeline_mode = #tpu.pipeline_mode<synchronous>, transform_indices = @transform_1, window_bounds = array<i64: 27, 32, 128>}, {transform_indices = @transform_2, window_bounds = array<i64: 1, 1, 216, 128>}]} {
    %cst = arith.constant 0.000000e+00 : f32
    %0 = vector.broadcast %cst : f32 to vector<216x128xf32>
    %c0 = arith.constant 0 : index
    %c0_0 = arith.constant 0 : index
    %c0_1 = arith.constant 0 : index
    %c0_2 = arith.constant 0 : index
    %1 = vector.load %arg2[%c0, %c0_0, %c0_1, %c0_2] : memref<1x1x302x32xbf16, #tpu.memory_space<vmem>>, vector<1x1x216x32xbf16>
    %2 = vector.shape_cast %1 : vector<1x1x216x32xbf16> to vector<216x32xbf16>
    %c0_3 = arith.constant 0 : index
    %c0_4 = arith.constant 0 : index
    %c0_5 = arith.constant 0 : index
    %3 = vector.load %arg3[%c0_3, %c0_4, %c0_5] : memref<27x32x128xbf16, #tpu.memory_space<vmem>>, vector<1x32x128xbf16>
    %4 = vector.shape_cast %3 : vector<1x32x128xbf16> to vector<32x128xbf16>
    %cst_6 = arith.constant dense<0.000000e+00> : vector<216x128xf32>
    %5 = tpu.matmul %2, %4, %cst_6 {dimension_numbers = #tpu.dot_dimension_numbers<[1], [0], [0], [1], [0, 0, 1, 1], [], []>} : vector<216x32xbf16>, vector<32x128xbf16>, vector<216x128xf32> -> vector<216x128xf32>
    %6 = arith.addf %0, %5 : vector<216x128xf32>
    %c0_7 = arith.constant 0 : index
    %c0_8 = arith.constant 0 : index
    %c1 = arith.constant 1 : index
    %c0_9 = arith.constant 0 : index
    %7 = vector.load %arg2[%c0_7, %c0_8, %c1, %c0_9] : memref<1x1x302x32xbf16, #tpu.memory_space<vmem>>, vector<1x1x216x32xbf16>
    %8 = vector.shape_cast %7 : vector<1x1x216x32xbf16> to vector<216x32xbf16>
    %c1_10 = arith.constant 1 : index
    %c0_11 = arith.constant 0 : index
    %c0_12 = arith.constant 0 : index
    %9 = vector.load %arg3[%c1_10, %c0_11, %c0_12] : memref<27x32x128xbf16, #tpu.memory_space<vmem>>, vector<1x32x128xbf16>
    %10 = vector.shape_cast %9 : vector<1x32x128xbf16> to vector<32x128xbf16>
    %cst_13 = arith.constant dense<0.000000e+00> : vector<216x128xf32>
    %11 = tpu.matmul %8, %10, %cst_13 {dimension_numbers = #tpu.dot_dimension_numbers<[1], [0], [0], [1], [0, 0, 1, 1], [], []>} : vector<216x32xbf16>, vector<32x128xbf16>, vector<216x128xf32> -> vector<216x128xf32>
    %12 = arith.addf %6, %11 : vector<216x128xf32>
    %c0_14 = arith.constant 0 : index
    %c0_15 = arith.constant 0 : index
    %c2 = arith.constant 2 : index
    %c0_16 = arith.constant 0 : index
    %13 = vector.load %arg2[%c0_14, %c0_15, %c2, %c0_16] : memref<1x1x302x32xbf16, #tpu.memory_space<vmem>>, vector<1x1x216x32xbf16>
    %14 = vector.shape_cast %13 : vector<1x1x216x32xbf16> to vector<216x32xbf16>
    %c2_17 = arith.constant 2 : index
    %c0_18 = arith.constant 0 : index
    %c0_19 = arith.constant 0 : index
    %15 = vector.load %arg3[%c2_17, %c0_18, %c0_19] : memref<27x32x128xbf16, #tpu.memory_space<vmem>>, vector<1x32x128xbf16>
    %16 = vector.shape_cast %15 : vector<1x32x128xbf16> to vector<32x128xbf16>
    %cst_20 = arith.constant dense<0.000000e+00> : vector<216x128xf32>
    %17 = tpu.matmul %14, %16, %cst_20 {dimension_numbers = #tpu.dot_dimension_numbers<[1], [0], [0], [1], [0, 0, 1, 1], [], []>} : vector<216x32xbf16>, vector<32x128xbf16>, vector<216x128xf32> -> vector<216x128xf32>
    %18 = arith.addf %12, %17 : vector<216x128xf32>
    %c0_21 = arith.constant 0 : index
    %c0_22 = arith.constant 0 : index
    %c6 = arith.constant 6 : index
    %c0_23 = arith.constant 0 : index
    %19 = vector.load %arg2[%c0_21, %c0_22, %c6, %c0_23] : memref<1x1x302x32xbf16, #tpu.memory_space<vmem>>, vector<1x1x216x32xbf16>
    %20 = vector.shape_cast %19 : vector<1x1x216x32xbf16> to vector<216x32xbf16>
    %c3 = arith.constant 3 : index
    %c0_24 = arith.constant 0 : index
    %c0_25 = arith.constant 0 : index
    %21 = vector.load %arg3[%c3, %c0_24, %c0_25] : memref<27x32x128xbf16, #tpu.memory_space<vmem>>, vector<1x32x128xbf16>
    %22 = vector.shape_cast %21 : vector<1x32x128xbf16> to vector<32x128xbf16>
    %cst_26 = arith.constant dense<0.000000e+00> : vector<216x128xf32>
    %23 = tpu.matmul %20, %22, %cst_26 {dimension_numbers = #tpu.dot_dimension_numbers<[1], [0], [0], [1], [0, 0, 1, 1], [], []>} : vector<216x32xbf16>, vector<32x128xbf16>, vector<216x128xf32> -> vector<216x128xf32>
    %24 = arith.addf %18, %23 : vector<216x128xf32>
    %c0_27 = arith.constant 0 : index
    %c0_28 = arith.constant 0 : index
    %c7 = arith.constant 7 : index
    %c0_29 = arith.constant 0 : index
    %25 = vector.load %arg2[%c0_27, %c0_28, %c7, %c0_29] : memref<1x1x302x32xbf16, #tpu.memory_space<vmem>>, vector<1x1x216x32xbf16>
    %26 = vector.shape_cast %25 : vector<1x1x216x32xbf16> to vector<216x32xbf16>
    %c4 = arith.constant 4 : index
    %c0_30 = arith.constant 0 : index
    %c0_31 = arith.constant 0 : index
    %27 = vector.load %arg3[%c4, %c0_30, %c0_31] : memref<27x32x128xbf16, #tpu.memory_space<vmem>>, vector<1x32x128xbf16>
    %28 = vector.shape_cast %27 : vector<1x32x128xbf16> to vector<32x128xbf16>
    %cst_32 = arith.constant dense<0.000000e+00> : vector<216x128xf32>
    %29 = tpu.matmul %26, %28, %cst_32 {dimension_numbers = #tpu.dot_dimension_numbers<[1], [0], [0], [1], [0, 0, 1, 1], [], []>} : vector<216x32xbf16>, vector<32x128xbf16>, vector<216x128xf32> -> vector<216x128xf32>
    %30 = arith.addf %24, %29 : vector<216x128xf32>
    %c0_33 = arith.constant 0 : index
    %c0_34 = arith.constant 0 : index
    %c8 = arith.constant 8 : index
    %c0_35 = arith.constant 0 : index
    %31 = vector.load %arg2[%c0_33, %c0_34, %c8, %c0_35] : memref<1x1x302x32xbf16, #tpu.memory_space<vmem>>, vector<1x1x216x32xbf16>
    %32 = vector.shape_cast %31 : vector<1x1x216x32xbf16> to vector<216x32xbf16>
    %c5 = arith.constant 5 : index
    %c0_36 = arith.constant 0 : index
    %c0_37 = arith.constant 0 : index
    %33 = vector.load %arg3[%c5, %c0_36, %c0_37] : memref<27x32x128xbf16, #tpu.memory_space<vmem>>, vector<1x32x128xbf16>
    %34 = vector.shape_cast %33 : vector<1x32x128xbf16> to vector<32x128xbf16>
    %cst_38 = arith.constant dense<0.000000e+00> : vector<216x128xf32>
    %35 = tpu.matmul %32, %34, %cst_38 {dimension_numbers = #tpu.dot_dimension_numbers<[1], [0], [0], [1], [0, 0, 1, 1], [], []>} : vector<216x32xbf16>, vector<32x128xbf16>, vector<216x128xf32> -> vector<216x128xf32>
    %36 = arith.addf %30, %35 : vector<216x128xf32>
    %c0_39 = arith.constant 0 : index
    %c0_40 = arith.constant 0 : index
    %c12 = arith.constant 12 : index
    %c0_41 = arith.constant 0 : index
    %37 = vector.load %arg2[%c0_39, %c0_40, %c12, %c0_41] : memref<1x1x302x32xbf16, #tpu.memory_space<vmem>>, vector<1x1x216x32xbf16>
    %38 = vector.shape_cast %37 : vector<1x1x216x32xbf16> to vector<216x32xbf16>
    %c6_42 = arith.constant 6 : index
    %c0_43 = arith.constant 0 : index
    %c0_44 = arith.constant 0 : index
    %39 = vector.load %arg3[%c6_42, %c0_43, %c0_44] : memref<27x32x128xbf16, #tpu.memory_space<vmem>>, vector<1x32x128xbf16>
    %40 = vector.shape_cast %39 : vector<1x32x128xbf16> to vector<32x128xbf16>
    %cst_45 = arith.constant dense<0.000000e+00> : vector<216x128xf32>
    %41 = tpu.matmul %38, %40, %cst_45 {dimension_numbers = #tpu.dot_dimension_numbers<[1], [0], [0], [1], [0, 0, 1, 1], [], []>} : vector<216x32xbf16>, vector<32x128xbf16>, vector<216x128xf32> -> vector<216x128xf32>
    %42 = arith.addf %36, %41 : vector<216x128xf32>
    %c0_46 = arith.constant 0 : index
    %c0_47 = arith.constant 0 : index
    %c13 = arith.constant 13 : index
    %c0_48 = arith.constant 0 : index
    %43 = vector.load %arg2[%c0_46, %c0_47, %c13, %c0_48] : memref<1x1x302x32xbf16, #tpu.memory_space<vmem>>, vector<1x1x216x32xbf16>
    %44 = vector.shape_cast %43 : vector<1x1x216x32xbf16> to vector<216x32xbf16>
    %c7_49 = arith.constant 7 : index
    %c0_50 = arith.constant 0 : index
    %c0_51 = arith.constant 0 : index
    %45 = vector.load %arg3[%c7_49, %c0_50, %c0_51] : memref<27x32x128xbf16, #tpu.memory_space<vmem>>, vector<1x32x128xbf16>
    %46 = vector.shape_cast %45 : vector<1x32x128xbf16> to vector<32x128xbf16>
    %cst_52 = arith.constant dense<0.000000e+00> : vector<216x128xf32>
    %47 = tpu.matmul %44, %46, %cst_52 {dimension_numbers = #tpu.dot_dimension_numbers<[1], [0], [0], [1], [0, 0, 1, 1], [], []>} : vector<216x32xbf16>, vector<32x128xbf16>, vector<216x128xf32> -> vector<216x128xf32>
    %48 = arith.addf %42, %47 : vector<216x128xf32>
    %c0_53 = arith.constant 0 : index
    %c0_54 = arith.constant 0 : index
    %c14 = arith.constant 14 : index
    %c0_55 = arith.constant 0 : index
    %49 = vector.load %arg2[%c0_53, %c0_54, %c14, %c0_55] : memref<1x1x302x32xbf16, #tpu.memory_space<vmem>>, vector<1x1x216x32xbf16>
    %50 = vector.shape_cast %49 : vector<1x1x216x32xbf16> to vector<216x32xbf16>
    %c8_56 = arith.constant 8 : index
    %c0_57 = arith.constant 0 : index
    %c0_58 = arith.constant 0 : index
    %51 = vector.load %arg3[%c8_56, %c0_57, %c0_58] : memref<27x32x128xbf16, #tpu.memory_space<vmem>>, vector<1x32x128xbf16>
    %52 = vector.shape_cast %51 : vector<1x32x128xbf16> to vector<32x128xbf16>
    %cst_59 = arith.constant dense<0.000000e+00> : vector<216x128xf32>
    %53 = tpu.matmul %50, %52, %cst_59 {dimension_numbers = #tpu.dot_dimension_numbers<[1], [0], [0], [1], [0, 0, 1, 1], [], []>} : vector<216x32xbf16>, vector<32x128xbf16>, vector<216x128xf32> -> vector<216x128xf32>
    %54 = arith.addf %48, %53 : vector<216x128xf32>
    %c0_60 = arith.constant 0 : index
    %c0_61 = arith.constant 0 : index
    %c36 = arith.constant 36 : index
    %c0_62 = arith.constant 0 : index
    %55 = vector.load %arg2[%c0_60, %c0_61, %c36, %c0_62] : memref<1x1x302x32xbf16, #tpu.memory_space<vmem>>, vector<1x1x216x32xbf16>
    %56 = vector.shape_cast %55 : vector<1x1x216x32xbf16> to vector<216x32xbf16>
    %c9 = arith.constant 9 : index
    %c0_63 = arith.constant 0 : index
    %c0_64 = arith.constant 0 : index
    %57 = vector.load %arg3[%c9, %c0_63, %c0_64] : memref<27x32x128xbf16, #tpu.memory_space<vmem>>, vector<1x32x128xbf16>
    %58 = vector.shape_cast %57 : vector<1x32x128xbf16> to vector<32x128xbf16>
    %cst_65 = arith.constant dense<0.000000e+00> : vector<216x128xf32>
    %59 = tpu.matmul %56, %58, %cst_65 {dimension_numbers = #tpu.dot_dimension_numbers<[1], [0], [0], [1], [0, 0, 1, 1], [], []>} : vector<216x32xbf16>, vector<32x128xbf16>, vector<216x128xf32> -> vector<216x128xf32>
    %60 = arith.addf %54, %59 : vector<216x128xf32>
    %c0_66 = arith.constant 0 : index
    %c0_67 = arith.constant 0 : index
    %c37 = arith.constant 37 : index
    %c0_68 = arith.constant 0 : index
    %61 = vector.load %arg2[%c0_66, %c0_67, %c37, %c0_68] : memref<1x1x302x32xbf16, #tpu.memory_space<vmem>>, vector<1x1x216x32xbf16>
    %62 = vector.shape_cast %61 : vector<1x1x216x32xbf16> to vector<216x32xbf16>
    %c10 = arith.constant 10 : index
    %c0_69 = arith.constant 0 : index
    %c0_70 = arith.constant 0 : index
    %63 = vector.load %arg3[%c10, %c0_69, %c0_70] : memref<27x32x128xbf16, #tpu.memory_space<vmem>>, vector<1x32x128xbf16>
    %64 = vector.shape_cast %63 : vector<1x32x128xbf16> to vector<32x128xbf16>
    %cst_71 = arith.constant dense<0.000000e+00> : vector<216x128xf32>
    %65 = tpu.matmul %62, %64, %cst_71 {dimension_numbers = #tpu.dot_dimension_numbers<[1], [0], [0], [1], [0, 0, 1, 1], [], []>} : vector<216x32xbf16>, vector<32x128xbf16>, vector<216x128xf32> -> vector<216x128xf32>
    %66 = arith.addf %60, %65 : vector<216x128xf32>
    %c0_72 = arith.constant 0 : index
    %c0_73 = arith.constant 0 : index
    %c38 = arith.constant 38 : index
    %c0_74 = arith.constant 0 : index
    %67 = vector.load %arg2[%c0_72, %c0_73, %c38, %c0_74] : memref<1x1x302x32xbf16, #tpu.memory_space<vmem>>, vector<1x1x216x32xbf16>
    %68 = vector.shape_cast %67 : vector<1x1x216x32xbf16> to vector<216x32xbf16>
    %c11 = arith.constant 11 : index
    %c0_75 = arith.constant 0 : index
    %c0_76 = arith.constant 0 : index
    %69 = vector.load %arg3[%c11, %c0_75, %c0_76] : memref<27x32x128xbf16, #tpu.memory_space<vmem>>, vector<1x32x128xbf16>
    %70 = vector.shape_cast %69 : vector<1x32x128xbf16> to vector<32x128xbf16>
    %cst_77 = arith.constant dense<0.000000e+00> : vector<216x128xf32>
    %71 = tpu.matmul %68, %70, %cst_77 {dimension_numbers = #tpu.dot_dimension_numbers<[1], [0], [0], [1], [0, 0, 1, 1], [], []>} : vector<216x32xbf16>, vector<32x128xbf16>, vector<216x128xf32> -> vector<216x128xf32>
    %72 = arith.addf %66, %71 : vector<216x128xf32>
    %c0_78 = arith.constant 0 : index
    %c0_79 = arith.constant 0 : index
    %c42 = arith.constant 42 : index
    %c0_80 = arith.constant 0 : index
    %73 = vector.load %arg2[%c0_78, %c0_79, %c42, %c0_80] : memref<1x1x302x32xbf16, #tpu.memory_space<vmem>>, vector<1x1x216x32xbf16>
    %74 = vector.shape_cast %73 : vector<1x1x216x32xbf16> to vector<216x32xbf16>
    %c12_81 = arith.constant 12 : index
    %c0_82 = arith.constant 0 : index
    %c0_83 = arith.constant 0 : index
    %75 = vector.load %arg3[%c12_81, %c0_82, %c0_83] : memref<27x32x128xbf16, #tpu.memory_space<vmem>>, vector<1x32x128xbf16>
    %76 = vector.shape_cast %75 : vector<1x32x128xbf16> to vector<32x128xbf16>
    %cst_84 = arith.constant dense<0.000000e+00> : vector<216x128xf32>
    %77 = tpu.matmul %74, %76, %cst_84 {dimension_numbers = #tpu.dot_dimension_numbers<[1], [0], [0], [1], [0, 0, 1, 1], [], []>} : vector<216x32xbf16>, vector<32x128xbf16>, vector<216x128xf32> -> vector<216x128xf32>
    %78 = arith.addf %72, %77 : vector<216x128xf32>
    %c0_85 = arith.constant 0 : index
    %c0_86 = arith.constant 0 : index
    %c43 = arith.constant 43 : index
    %c0_87 = arith.constant 0 : index
    %79 = vector.load %arg2[%c0_85, %c0_86, %c43, %c0_87] : memref<1x1x302x32xbf16, #tpu.memory_space<vmem>>, vector<1x1x216x32xbf16>
    %80 = vector.shape_cast %79 : vector<1x1x216x32xbf16> to vector<216x32xbf16>
    %c13_88 = arith.constant 13 : index
    %c0_89 = arith.constant 0 : index
    %c0_90 = arith.constant 0 : index
    %81 = vector.load %arg3[%c13_88, %c0_89, %c0_90] : memref<27x32x128xbf16, #tpu.memory_space<vmem>>, vector<1x32x128xbf16>
    %82 = vector.shape_cast %81 : vector<1x32x128xbf16> to vector<32x128xbf16>
    %cst_91 = arith.constant dense<0.000000e+00> : vector<216x128xf32>
    %83 = tpu.matmul %80, %82, %cst_91 {dimension_numbers = #tpu.dot_dimension_numbers<[1], [0], [0], [1], [0, 0, 1, 1], [], []>} : vector<216x32xbf16>, vector<32x128xbf16>, vector<216x128xf32> -> vector<216x128xf32>
    %84 = arith.addf %78, %83 : vector<216x128xf32>
    %c0_92 = arith.constant 0 : index
    %c0_93 = arith.constant 0 : index
    %c44 = arith.constant 44 : index
    %c0_94 = arith.constant 0 : index
    %85 = vector.load %arg2[%c0_92, %c0_93, %c44, %c0_94] : memref<1x1x302x32xbf16, #tpu.memory_space<vmem>>, vector<1x1x216x32xbf16>
    %86 = vector.shape_cast %85 : vector<1x1x216x32xbf16> to vector<216x32xbf16>
    %c14_95 = arith.constant 14 : index
    %c0_96 = arith.constant 0 : index
    %c0_97 = arith.constant 0 : index
    %87 = vector.load %arg3[%c14_95, %c0_96, %c0_97] : memref<27x32x128xbf16, #tpu.memory_space<vmem>>, vector<1x32x128xbf16>
    %88 = vector.shape_cast %87 : vector<1x32x128xbf16> to vector<32x128xbf16>
    %cst_98 = arith.constant dense<0.000000e+00> : vector<216x128xf32>
    %89 = tpu.matmul %86, %88, %cst_98 {dimension_numbers = #tpu.dot_dimension_numbers<[1], [0], [0], [1], [0, 0, 1, 1], [], []>} : vector<216x32xbf16>, vector<32x128xbf16>, vector<216x128xf32> -> vector<216x128xf32>
    %90 = arith.addf %84, %89 : vector<216x128xf32>
    %c0_99 = arith.constant 0 : index
    %c0_100 = arith.constant 0 : index
    %c48 = arith.constant 48 : index
    %c0_101 = arith.constant 0 : index
    %91 = vector.load %arg2[%c0_99, %c0_100, %c48, %c0_101] : memref<1x1x302x32xbf16, #tpu.memory_space<vmem>>, vector<1x1x216x32xbf16>
    %92 = vector.shape_cast %91 : vector<1x1x216x32xbf16> to vector<216x32xbf16>
    %c15 = arith.constant 15 : index
    %c0_102 = arith.constant 0 : index
    %c0_103 = arith.constant 0 : index
    %93 = vector.load %arg3[%c15, %c0_102, %c0_103] : memref<27x32x128xbf16, #tpu.memory_space<vmem>>, vector<1x32x128xbf16>
    %94 = vector.shape_cast %93 : vector<1x32x128xbf16> to vector<32x128xbf16>
    %cst_104 = arith.constant dense<0.000000e+00> : vector<216x128xf32>
    %95 = tpu.matmul %92, %94, %cst_104 {dimension_numbers = #tpu.dot_dimension_numbers<[1], [0], [0], [1], [0, 0, 1, 1], [], []>} : vector<216x32xbf16>, vector<32x128xbf16>, vector<216x128xf32> -> vector<216x128xf32>
    %96 = arith.addf %90, %95 : vector<216x128xf32>
    %c0_105 = arith.constant 0 : index
    %c0_106 = arith.constant 0 : index
    %c49 = arith.constant 49 : index
    %c0_107 = arith.constant 0 : index
    %97 = vector.load %arg2[%c0_105, %c0_106, %c49, %c0_107] : memref<1x1x302x32xbf16, #tpu.memory_space<vmem>>, vector<1x1x216x32xbf16>
    %98 = vector.shape_cast %97 : vector<1x1x216x32xbf16> to vector<216x32xbf16>
    %c16 = arith.constant 16 : index
    %c0_108 = arith.constant 0 : index
    %c0_109 = arith.constant 0 : index
    %99 = vector.load %arg3[%c16, %c0_108, %c0_109] : memref<27x32x128xbf16, #tpu.memory_space<vmem>>, vector<1x32x128xbf16>
    %100 = vector.shape_cast %99 : vector<1x32x128xbf16> to vector<32x128xbf16>
    %cst_110 = arith.constant dense<0.000000e+00> : vector<216x128xf32>
    %101 = tpu.matmul %98, %100, %cst_110 {dimension_numbers = #tpu.dot_dimension_numbers<[1], [0], [0], [1], [0, 0, 1, 1], [], []>} : vector<216x32xbf16>, vector<32x128xbf16>, vector<216x128xf32> -> vector<216x128xf32>
    %102 = arith.addf %96, %101 : vector<216x128xf32>
    %c0_111 = arith.constant 0 : index
    %c0_112 = arith.constant 0 : index
    %c50 = arith.constant 50 : index
    %c0_113 = arith.constant 0 : index
    %103 = vector.load %arg2[%c0_111, %c0_112, %c50, %c0_113] : memref<1x1x302x32xbf16, #tpu.memory_space<vmem>>, vector<1x1x216x32xbf16>
    %104 = vector.shape_cast %103 : vector<1x1x216x32xbf16> to vector<216x32xbf16>
    %c17 = arith.constant 17 : index
    %c0_114 = arith.constant 0 : index
    %c0_115 = arith.constant 0 : index
    %105 = vector.load %arg3[%c17, %c0_114, %c0_115] : memref<27x32x128xbf16, #tpu.memory_space<vmem>>, vector<1x32x128xbf16>
    %106 = vector.shape_cast %105 : vector<1x32x128xbf16> to vector<32x128xbf16>
    %cst_116 = arith.constant dense<0.000000e+00> : vector<216x128xf32>
    %107 = tpu.matmul %104, %106, %cst_116 {dimension_numbers = #tpu.dot_dimension_numbers<[1], [0], [0], [1], [0, 0, 1, 1], [], []>} : vector<216x32xbf16>, vector<32x128xbf16>, vector<216x128xf32> -> vector<216x128xf32>
    %108 = arith.addf %102, %107 : vector<216x128xf32>
    %c0_117 = arith.constant 0 : index
    %c0_118 = arith.constant 0 : index
    %c72 = arith.constant 72 : index
    %c0_119 = arith.constant 0 : index
    %109 = vector.load %arg2[%c0_117, %c0_118, %c72, %c0_119] : memref<1x1x302x32xbf16, #tpu.memory_space<vmem>>, vector<1x1x216x32xbf16>
    %110 = vector.shape_cast %109 : vector<1x1x216x32xbf16> to vector<216x32xbf16>
    %c18 = arith.constant 18 : index
    %c0_120 = arith.constant 0 : index
    %c0_121 = arith.constant 0 : index
    %111 = vector.load %arg3[%c18, %c0_120, %c0_121] : memref<27x32x128xbf16, #tpu.memory_space<vmem>>, vector<1x32x128xbf16>
    %112 = vector.shape_cast %111 : vector<1x32x128xbf16> to vector<32x128xbf16>
    %cst_122 = arith.constant dense<0.000000e+00> : vector<216x128xf32>
    %113 = tpu.matmul %110, %112, %cst_122 {dimension_numbers = #tpu.dot_dimension_numbers<[1], [0], [0], [1], [0, 0, 1, 1], [], []>} : vector<216x32xbf16>, vector<32x128xbf16>, vector<216x128xf32> -> vector<216x128xf32>
    %114 = arith.addf %108, %113 : vector<216x128xf32>
    %c0_123 = arith.constant 0 : index
    %c0_124 = arith.constant 0 : index
    %c73 = arith.constant 73 : index
    %c0_125 = arith.constant 0 : index
    %115 = vector.load %arg2[%c0_123, %c0_124, %c73, %c0_125] : memref<1x1x302x32xbf16, #tpu.memory_space<vmem>>, vector<1x1x216x32xbf16>
    %116 = vector.shape_cast %115 : vector<1x1x216x32xbf16> to vector<216x32xbf16>
    %c19 = arith.constant 19 : index
    %c0_126 = arith.constant 0 : index
    %c0_127 = arith.constant 0 : index
    %117 = vector.load %arg3[%c19, %c0_126, %c0_127] : memref<27x32x128xbf16, #tpu.memory_space<vmem>>, vector<1x32x128xbf16>
    %118 = vector.shape_cast %117 : vector<1x32x128xbf16> to vector<32x128xbf16>
    %cst_128 = arith.constant dense<0.000000e+00> : vector<216x128xf32>
    %119 = tpu.matmul %116, %118, %cst_128 {dimension_numbers = #tpu.dot_dimension_numbers<[1], [0], [0], [1], [0, 0, 1, 1], [], []>} : vector<216x32xbf16>, vector<32x128xbf16>, vector<216x128xf32> -> vector<216x128xf32>
    %120 = arith.addf %114, %119 : vector<216x128xf32>
    %c0_129 = arith.constant 0 : index
    %c0_130 = arith.constant 0 : index
    %c74 = arith.constant 74 : index
    %c0_131 = arith.constant 0 : index
    %121 = vector.load %arg2[%c0_129, %c0_130, %c74, %c0_131] : memref<1x1x302x32xbf16, #tpu.memory_space<vmem>>, vector<1x1x216x32xbf16>
    %122 = vector.shape_cast %121 : vector<1x1x216x32xbf16> to vector<216x32xbf16>
    %c20 = arith.constant 20 : index
    %c0_132 = arith.constant 0 : index
    %c0_133 = arith.constant 0 : index
    %123 = vector.load %arg3[%c20, %c0_132, %c0_133] : memref<27x32x128xbf16, #tpu.memory_space<vmem>>, vector<1x32x128xbf16>
    %124 = vector.shape_cast %123 : vector<1x32x128xbf16> to vector<32x128xbf16>
    %cst_134 = arith.constant dense<0.000000e+00> : vector<216x128xf32>
    %125 = tpu.matmul %122, %124, %cst_134 {dimension_numbers = #tpu.dot_dimension_numbers<[1], [0], [0], [1], [0, 0, 1, 1], [], []>} : vector<216x32xbf16>, vector<32x128xbf16>, vector<216x128xf32> -> vector<216x128xf32>
    %126 = arith.addf %120, %125 : vector<216x128xf32>
    %c0_135 = arith.constant 0 : index
    %c0_136 = arith.constant 0 : index
    %c78 = arith.constant 78 : index
    %c0_137 = arith.constant 0 : index
    %127 = vector.load %arg2[%c0_135, %c0_136, %c78, %c0_137] : memref<1x1x302x32xbf16, #tpu.memory_space<vmem>>, vector<1x1x216x32xbf16>
    %128 = vector.shape_cast %127 : vector<1x1x216x32xbf16> to vector<216x32xbf16>
    %c21 = arith.constant 21 : index
    %c0_138 = arith.constant 0 : index
    %c0_139 = arith.constant 0 : index
    %129 = vector.load %arg3[%c21, %c0_138, %c0_139] : memref<27x32x128xbf16, #tpu.memory_space<vmem>>, vector<1x32x128xbf16>
    %130 = vector.shape_cast %129 : vector<1x32x128xbf16> to vector<32x128xbf16>
    %cst_140 = arith.constant dense<0.000000e+00> : vector<216x128xf32>
    %131 = tpu.matmul %128, %130, %cst_140 {dimension_numbers = #tpu.dot_dimension_numbers<[1], [0], [0], [1], [0, 0, 1, 1], [], []>} : vector<216x32xbf16>, vector<32x128xbf16>, vector<216x128xf32> -> vector<216x128xf32>
    %132 = arith.addf %126, %131 : vector<216x128xf32>
    %c0_141 = arith.constant 0 : index
    %c0_142 = arith.constant 0 : index
    %c79 = arith.constant 79 : index
    %c0_143 = arith.constant 0 : index
    %133 = vector.load %arg2[%c0_141, %c0_142, %c79, %c0_143] : memref<1x1x302x32xbf16, #tpu.memory_space<vmem>>, vector<1x1x216x32xbf16>
    %134 = vector.shape_cast %133 : vector<1x1x216x32xbf16> to vector<216x32xbf16>
    %c22 = arith.constant 22 : index
    %c0_144 = arith.constant 0 : index
    %c0_145 = arith.constant 0 : index
    %135 = vector.load %arg3[%c22, %c0_144, %c0_145] : memref<27x32x128xbf16, #tpu.memory_space<vmem>>, vector<1x32x128xbf16>
    %136 = vector.shape_cast %135 : vector<1x32x128xbf16> to vector<32x128xbf16>
    %cst_146 = arith.constant dense<0.000000e+00> : vector<216x128xf32>
    %137 = tpu.matmul %134, %136, %cst_146 {dimension_numbers = #tpu.dot_dimension_numbers<[1], [0], [0], [1], [0, 0, 1, 1], [], []>} : vector<216x32xbf16>, vector<32x128xbf16>, vector<216x128xf32> -> vector<216x128xf32>
    %138 = arith.addf %132, %137 : vector<216x128xf32>
    %c0_147 = arith.constant 0 : index
    %c0_148 = arith.constant 0 : index
    %c80 = arith.constant 80 : index
    %c0_149 = arith.constant 0 : index
    %139 = vector.load %arg2[%c0_147, %c0_148, %c80, %c0_149] : memref<1x1x302x32xbf16, #tpu.memory_space<vmem>>, vector<1x1x216x32xbf16>
    %140 = vector.shape_cast %139 : vector<1x1x216x32xbf16> to vector<216x32xbf16>
    %c23 = arith.constant 23 : index
    %c0_150 = arith.constant 0 : index
    %c0_151 = arith.constant 0 : index
    %141 = vector.load %arg3[%c23, %c0_150, %c0_151] : memref<27x32x128xbf16, #tpu.memory_space<vmem>>, vector<1x32x128xbf16>
    %142 = vector.shape_cast %141 : vector<1x32x128xbf16> to vector<32x128xbf16>
    %cst_152 = arith.constant dense<0.000000e+00> : vector<216x128xf32>
    %143 = tpu.matmul %140, %142, %cst_152 {dimension_numbers = #tpu.dot_dimension_numbers<[1], [0], [0], [1], [0, 0, 1, 1], [], []>} : vector<216x32xbf16>, vector<32x128xbf16>, vector<216x128xf32> -> vector<216x128xf32>
    %144 = arith.addf %138, %143 : vector<216x128xf32>
    %c0_153 = arith.constant 0 : index
    %c0_154 = arith.constant 0 : index
    %c84 = arith.constant 84 : index
    %c0_155 = arith.constant 0 : index
    %145 = vector.load %arg2[%c0_153, %c0_154, %c84, %c0_155] : memref<1x1x302x32xbf16, #tpu.memory_space<vmem>>, vector<1x1x216x32xbf16>
    %146 = vector.shape_cast %145 : vector<1x1x216x32xbf16> to vector<216x32xbf16>
    %c24 = arith.constant 24 : index
    %c0_156 = arith.constant 0 : index
    %c0_157 = arith.constant 0 : index
    %147 = vector.load %arg3[%c24, %c0_156, %c0_157] : memref<27x32x128xbf16, #tpu.memory_space<vmem>>, vector<1x32x128xbf16>
    %148 = vector.shape_cast %147 : vector<1x32x128xbf16> to vector<32x128xbf16>
    %cst_158 = arith.constant dense<0.000000e+00> : vector<216x128xf32>
    %149 = tpu.matmul %146, %148, %cst_158 {dimension_numbers = #tpu.dot_dimension_numbers<[1], [0], [0], [1], [0, 0, 1, 1], [], []>} : vector<216x32xbf16>, vector<32x128xbf16>, vector<216x128xf32> -> vector<216x128xf32>
    %150 = arith.addf %144, %149 : vector<216x128xf32>
    %c0_159 = arith.constant 0 : index
    %c0_160 = arith.constant 0 : index
    %c85 = arith.constant 85 : index
    %c0_161 = arith.constant 0 : index
    %151 = vector.load %arg2[%c0_159, %c0_160, %c85, %c0_161] : memref<1x1x302x32xbf16, #tpu.memory_space<vmem>>, vector<1x1x216x32xbf16>
    %152 = vector.shape_cast %151 : vector<1x1x216x32xbf16> to vector<216x32xbf16>
    %c25 = arith.constant 25 : index
    %c0_162 = arith.constant 0 : index
    %c0_163 = arith.constant 0 : index
    %153 = vector.load %arg3[%c25, %c0_162, %c0_163] : memref<27x32x128xbf16, #tpu.memory_space<vmem>>, vector<1x32x128xbf16>
    %154 = vector.shape_cast %153 : vector<1x32x128xbf16> to vector<32x128xbf16>
    %cst_164 = arith.constant dense<0.000000e+00> : vector<216x128xf32>
    %155 = tpu.matmul %152, %154, %cst_164 {dimension_numbers = #tpu.dot_dimension_numbers<[1], [0], [0], [1], [0, 0, 1, 1], [], []>} : vector<216x32xbf16>, vector<32x128xbf16>, vector<216x128xf32> -> vector<216x128xf32>
    %156 = arith.addf %150, %155 : vector<216x128xf32>
    %c0_165 = arith.constant 0 : index
    %c0_166 = arith.constant 0 : index
    %c86 = arith.constant 86 : index
    %c0_167 = arith.constant 0 : index
    %157 = vector.load %arg2[%c0_165, %c0_166, %c86, %c0_167] : memref<1x1x302x32xbf16, #tpu.memory_space<vmem>>, vector<1x1x216x32xbf16>
    %158 = vector.shape_cast %157 : vector<1x1x216x32xbf16> to vector<216x32xbf16>
    %c26 = arith.constant 26 : index
    %c0_168 = arith.constant 0 : index
    %c0_169 = arith.constant 0 : index
    %159 = vector.load %arg3[%c26, %c0_168, %c0_169] : memref<27x32x128xbf16, #tpu.memory_space<vmem>>, vector<1x32x128xbf16>
    %160 = vector.shape_cast %159 : vector<1x32x128xbf16> to vector<32x128xbf16>
    %cst_170 = arith.constant dense<0.000000e+00> : vector<216x128xf32>
    %161 = tpu.matmul %158, %160, %cst_170 {dimension_numbers = #tpu.dot_dimension_numbers<[1], [0], [0], [1], [0, 0, 1, 1], [], []>} : vector<216x32xbf16>, vector<32x128xbf16>, vector<216x128xf32> -> vector<216x128xf32>
    %162 = arith.addf %156, %161 : vector<216x128xf32>
    %c0_171 = arith.constant 0 : index
    %c0_172 = arith.constant 0 : index
    %c0_173 = arith.constant 0 : index
    %c0_174 = arith.constant 0 : index
    %163 = vector.load %arg4[%c0_171, %c0_172, %c0_173, %c0_174] : memref<1x1x216x128xf32, #tpu.memory_space<vmem>>, vector<1x1x216x128xf32>
    %164 = vector.shape_cast %163 : vector<1x1x216x128xf32> to vector<216x128xf32>
    %165 = vector.shape_cast %162 : vector<216x128xf32> to vector<1x1x216x128xf32>
    tpu.vector_store %arg4[%c0_171, %c0_172, %c0_173, %c0_174], %165 {strides = array<i32>} : memref<1x1x216x128xf32, #tpu.memory_space<vmem>>, vector<1x1x216x128xf32>,
    return
  }
  func.func @transform_0(%arg0: i32, %arg1: i32) -> (i32, i32, i32, i32) {
    %c0_i32 = arith.constant 0 : i32
    %c0_i32_0 = arith.constant 0 : i32
    %c0_i32_1 = arith.constant 0 : i32
    return %arg0, %arg1, %c0_i32, %c0_i32_0 : i32, i32, i32, i32
  }
  func.func @transform_1(%arg0: i32, %arg1: i32) -> (i32, i32, i32) {
    %c0_i32 = arith.constant 0 : i32
    %c0_i32_0 = arith.constant 0 : i32
    %c0_i32_1 = arith.constant 0 : i32
    %c0_i32_2 = arith.constant 0 : i32
    return %c0_i32, %c0_i32_0, %c0_i32_1 : i32, i32, i32
  }
  func.func @transform_2(%arg0: i32, %arg1: i32) -> (i32, i32, i32, i32) {
    %c0_i32 = arith.constant 0 : i32
    %c0_i32_0 = arith.constant 0 : i32
    %c0_i32_1 = arith.constant 0 : i32
    return %arg0, %arg1, %c0_i32, %c0_i32_0 : i32, i32, i32, i32
  }
}

</mosaic_0001>

<bundles_post_ra>
// kernel: tpu_custom_call.1
= control target key start
LH: loop header
LB: loop body
LE: loop exit
PB: predicated region body
PF: predicated region fallthrough
CT: control target
= control target key end

     0   :  { %7 = vsyncpa [#allocation3], 0  ;;  %s10862_s0 = inlined_call_operand.vmem [shape: bf16[2,1,302,32], index: 0, kind: input, shape index: {}]   ;;  %s10863_s1 = inlined_call_operand.hbm [shape: bf16[27,32,128], index: 1, kind: input, shape index: {}]   ;;  %s10864_s2 = inlined_call_operand.hbm [shape: f32[2,1,216,128], index: 2, kind: output, shape index: {}]  }
   0x1   :  { %8 = vsyncpa [#allocation4], 0 }
   0x2   :  { %10 = vsyncpa [#allocation4 + $0x1], 0  ;;  %s8541_s9 = smov 0   ;;  %s8543_s10 = smov 0  }
   0x3   :  { %s8545_s11 = smov 0   ;;  %s8547_s12 = smov 0  }
   0x4   :  { %s8549_s13 = smov 0   ;;  %s8551_s14 = smov 0  }
   0x5 LB: > { %s6904_s15 = sadd.s32 4294967295, %s8519_s14   ;;  %s6905_s16 = sadd.s32 4294967294, %s8519_s14   ;;  %s8519_s14 = sphi %s8551_s14, %s16_s14   ;;  %s8515_s13 = sphi %s8549_s13, %s10905_s13   ;;  %s8511_s12 = sphi %s8547_s12, %s10904_s12   ;;  %s8507_s11 = sphi %s8545_s11, %s10903_s11   ;;  %s8503_s10 = sphi %s8543_s10, %s10902_s10   ;;  %s8499_s9 = sphi %s8541_s9, %s10901_s9  }
   0x6   : > { %s28_s17 = sadd.s32 1, %s8515_s13  ;;  %s86_s18 = sadd.s32 1, %s8507_s11 }
   0x7   : > { %p30_p0 = scmp.ge.s32.totalorder %s28_s17, 2  ;;  %p96_p1 = scmp.ne.s32.totalorder %s8507_s11, %s8503_s10 }
   0x8   : > { %p97_p2 = scmp.eq.s32.totalorder %s6904_s15, 1  ;;  %p102_p3 = scmp.ne.s32.totalorder %s8503_s10, %s8499_s9 }
   0x9   : > { %s10907_s17 = smov (%p30_p0, %s28_s17), 0  ;;  %p103_p5 = scmp.eq.s32.totalorder %s6905_s16, 1 }
   0xa   : > { %p8581_p4 = por %p97_p2, %p96_p1  ;;  %s81_s20 = ssub.s32 %s8515_s13, %s10907_s17 }
   0xb   : > { %p6906_p6 = scmp.ge.s32.totalorder %s8519_s14, 1  ;;  %p84_p7 = scmp.eq.s32.totalorder %s81_s20, 0 }
   0xc   : > { %p8588_p8 = por %p103_p5, %p102_p3  ;;  %p110_p9 = scmp.lt.s32.totalorder %s8519_s14, 3 }
   0xd   : > { %s8594_s22 = scalar_select %p84_p7, %s8507_s11, %s86_s18  }
   0xe   : > { %p111_p10 = pnand %p6906_p6, %p110_p9  ;;  %p8343_p11 = scmp.eq.s32.totalorder %s6904_s15, 0 }
   0xf   : > { %s121_s25 = sshll.u32 %s10863_s1, 4  ;;  %s8521_s26 = smov [#allocation2]   ;;  %s122_s25 = int_to_ptr.hbm [resolvable:$true] %s121_s25 }
  0x10   : > { %p8335_p12 = pneg %p111_p10  ;;  %s123_s27 = sshll.u32 %s8521_s26, 4  ;;  %s124_s27 = int_to_ptr.vmem [resolvable:$true] %s123_s27 }
  0x11   : > { %s8522_s28 = smov 64   ;;  %s8523_s29 = smov 4  }
  0x12   : > { %p8336_p13 = pnand %p8343_p11, %p8335_p12  ;;  %151 = sbr.rel (%p111_p10) target bundleno = 1685 (0x695), region = 28 }
  0x14   : > { %8338 = dma.hbm_to_vmem [thread:$0]  (!%p8336_p13), %s122_s25, 6912, %s124_s27, [#allocation3], %s8522_s28, %s8522_s28, %s8523_s29  }
  0x17   : > { %8490 = dma.done.wait (%p8343_p11), [#allocation3], 6912  }
  0x18   : > { %8492 = vsyncadd (%p8343_p11), [#allocation3], 4294960384  ;;  %p178_p0 = scmp.lt.s32.totalorder %s8511_s12, 1  ;;  %v7760_v0 = vld [vmem:[#allocation2 + $0x18] sm:$0xff]  ;;  %v7758_v1 = vld [vmem:[#allocation2 + $0x8] sm:$0xff]  ;;  %vm419_vm1 = vcmask 261120  }
  0x19   : > { %v7762_v2 = vld [vmem:[#allocation2 + $0x28] sm:$0xff]  ;;  %v7759_v3 = vld [vmem:[#allocation2 + $0x10] sm:$0xff]  ;;  %v7757_v4 = vld [vmem:[#allocation2] sm:$0xff]  ;;  %468 = vmatpush.bf16.msra.mxu0 %v7760_v0  ;;  %8272 = vmatpush.bf16.msra.mxu3 %v7760_v0  ;;  %vm295_vm0 = vsmask.f32 7424  ;;  %vm669_vm2 = vcmask 1046528  }
  0x1a   : > { %s179_s30 = scalar_select %p178_p0, %s8511_s12, 1  ;;  %588 = vmatpush.bf16.msra.mxu1 %v7758_v1  ;;  %757 = vmatpush.bf16.msra.mxu2 %v7762_v2  ;;  %v7761_v8 = vld [vmem:[#allocation2 + $0x20] sm:$0xff]  ;;  %v7782_v18 = vld [vmem:[#allocation2 + $0x68] sm:$0xff]  ;;  %v7768_v24 = vld [vmem:[#allocation2 + $0x58] sm:$0xff]  ;;  %vm869_vm3 = vcmask 1044480   ;;  %vm1571_vm5 = vcmask 1045504  }
  0x1b   : > { %v7766_v19 = vld [vmem:[#allocation2 + $0x48] sm:$0xff]  ;;  %vm1065_vm4 = vsmask.f32 4352  ;;  %vm1767_vm6 = vsmask.f32 5376  ;;  %s175_s7 = sand.u32 1, %s8503_s10  }
  0x1c   : > { %s8327_s3 = smul.u32 152, %s179_s30  ;;  %vm3322_vm7 = vsmask.f32 6400  ;;  %s8457_s30 = scalar_lea.hbm %s10864_s2, 432 }
  0x1d   : > { %469 = vmatpush.bf16.msra.mxu0 %v7759_v3  ;;  %8273 = vmatpush.bf16.msra.mxu3 %v7759_v3  ;;  %s8326_s8 = smul.u32 216, %s175_s7 }
  0x1e   : > { %s8604_s6 = scalar_lea.vmem %s10862_s0, %s8327_s3  ;;  %589 = vmatpush.bf16.msra.mxu1 %v7757_v4  ;;  %758 = vmatpush.bf16.msra.mxu2 %v7761_v8  ;;  %s8328_s16 = smul.u32 216, %s8511_s12 }
  0x1f   : > { %v7874_v5 = vld [vmem:[%s8604_s6] sm:$0xff]   ;;  %v8608_v6 = vld [vmem:[%s8604_s6 + $0x8] sm:$0xff]   ;;  %v8611_v7 = vld [vmem:[%s8604_s6 + $0x58] sm:$0xff]   ;;  %s10713_s15 = scalar_lea.vmem [#allocation5], %s8326_s8  ;;  %s6793_s12 = scalar_lea.sflag [#allocation4], %s175_s7 }
  0x20   : > { %v297_v9 = vshrl.u32 %v7874_v5, 16  ;;  %v299_v10 = vshll.u32 %v7874_v5, 16  ;;  %v304_v11 = vshll.u32 %v8608_v6, 16  ;;  %v8615_v12 = vld [vmem:[%s8604_s6 + $0x60] sm:$0xff]   ;;  %v10867_v13 = vshll.u32 %v8611_v7, 16  ;;  %v8651_v39 = vld [vmem:[%s8604_s6 + $0x10] sm:$0xff]   ;;  %s6806_s23 = scalar_lea.hbm %s10864_s2, %s8328_s16 }
  0x21   : > { %v10869_v14 = vshrl.u32 %v8611_v7, 16  ;;  %v10865_v15 = vshll.u32 %v8615_v12, 16  ;;  %v8620_v16 = vunpack.c.h.b16 %v7874_v5  ;;  %v660_v17 = vld [vmem:[%s8604_s6] sm:$0xe]  ;;  %v671_v26 = vrot.slane %v8608_v6, 1  ;;  %1191 = vmatpush.bf16.msrb.mxu0 %v7766_v19  ;;  %8274 = vmatpush.bf16.msrb.mxu3 %v7758_v1  ;;  %v8673_v52 = vld [vmem:[%s8604_s6 + $0x18] sm:$0xff]  }
  0x22   : > { %v301_v20 = vrot.slane %v299_v10, 1  ;;  %v306_v21 = vrot.slane %v304_v11, 1  ;;  %v8627_v22 = vrot.slane %v10867_v13, 1  ;;  %v667_v23 = vunpack.c.l.b16 %v660_v17  ;;  %v214_v27 = vld [vmem:[%s8604_s6 + $0x68] sm:$0xf]  ;;  %1659 = vmatpush.bf16.msrb.mxu2 %v7782_v18  ;;  %1369 = vmatpush.bf16.msrb.mxu1 %v7768_v24  ;;  %v8691_v62 = vld [vmem:[%s8604_s6 + $0x20] sm:$0xff]  }
  0x23   : > { %v394_v25 = vrot.slane %v10865_v15, 1  ;;  %v219_v31 = vld [vmem:[%s8604_s6 + $0x6c] sm:$0x1]  ;;  %v8638_v32 = vunpack.c.l.b16 %v214_v27  ;;  %6942 = vmatmul.msk.bf16.vlgmr.msra.gmra.mxu1 %vm419_vm1, %v7874_v5  ;;  %v308_v40 = vshrl.u32 %v8608_v6, 16  ;;  %v312_v41 = vshll.u32 %v8651_v39, 16  ;;  %v7765_v10 = vld [vmem:[#allocation2 + $0x40] sm:$0xff] }
  0x24   : > { %v302_v28 = vor.u32 %v301_v20, %v297_v9  ;;  %v390_v29 = vor.u32 %v10869_v14, %v8627_v22  ;;  %v668_v30 = vpack.c.b16 %v8620_v16, %v667_v23  ;;  %v280_v33 = vunpack.c.l.b16 %v219_v31  ;;  %v7781_v9 = vld [vmem:[#allocation2 + $0x60] sm:$0xff]  ;;  %v7767_v17 = vld [vmem:[#allocation2 + $0x50] sm:$0xff]  ;;  %s6807_s24 = sshll.u32 %s10713_s15, 4  ;;  %s6809_s25 = sshll.u32 %s6806_s23, 4  ;;  %s6808_s24 = int_to_ptr.vmem [resolvable:$true] %s6807_s24  ;;  %s6810_s25 = int_to_ptr.hbm [resolvable:$true] %s6809_s25 }
  0x25   : > { %8275 = vmatpush.bf16.msrb.mxu3 %v7757_v4  ;;  %v10866_v42 = vshrl.u32 %v8615_v12, 16  ;;  %v310_v44 = vor.u32 %v308_v40, %v306_v21  ;;  %v314_v45 = vrot.slane %v312_v41, 1  ;;  %v673_v48 = vrot.slane %v8651_v39, 1  ;;  %1192 = vmatpush.bf16.msrb.mxu0 %v7765_v10  ;;  %s8451_s26 = sshra.s32 %s6810_s25, 4  ;;  %s8452_s26 = int_to_ptr.hbm [resolvable:$true] %s8451_s26 }
  0x26   : > { %v307_v34 = vsel %vm295_vm0, %v302_v28, %v306_v21  ;;  %v395_v35 = vsel %vm295_vm0, %v390_v29, %v394_v25  ;;  %v670_v36 = vrot.slane %v668_v30, 1  ;;  %v8647_v38 = vpack.c.b16 %v280_v33, %v8638_v32  ;;  %1660 = vmatpush.bf16.msrb.mxu2 %v7781_v9  ;;  %1370 = vmatpush.bf16.msrb.mxu1 %v7767_v17  ;;  %s8453_s27 = scalar_lea.hbm %s8452_s26, 216  ;;  %p8458_p5 = scmp.lt.s32.totalorder %s8452_s26, %s10864_s2 }
  0x27   : > { %6920 = vmatmul.msk.bf16.vlgmr.msra.gmra.mxu0 %vm419_vm1, %v307_v34  ;;  %6931 = vmatmul.msk.bf16.vlgmr.msra.gmra.mxu3 %vm419_vm1, %v395_v35  ;;  %v398_v46 = vor.u32 %v10866_v42, %v394_v25  ;;  %v315_v49 = vsel %vm295_vm0, %v310_v44, %v314_v45  ;;  %v674_v51 = vsel %vm669_vm2, %v671_v26, %v673_v48  ;;  %v316_v53 = vshrl.u32 %v8651_v39, 16  ;;  %p8454_p1 = scmp.ne.s32.totalorder %s8452_s26, %s8453_s27  ;;  %p8459_p6 = scmp.lt.s32.totalorder %s8457_s30, %s8453_s27 }
  0x28   : > { %v672_v37 = vsel %vm669_vm2, %v670_v36, %v671_v26  ;;  %v400_v43 = vshll.u32 %v8647_v38, 16  ;;  %v320_v54 = vshll.u32 %v8673_v52, 16  ;;  %v404_v55 = vshrl.u32 %v8647_v38, 16  ;;  %v8727_v26 = vld [vmem:[%s8604_s6 + $0x30] sm:$0xff]   ;;  %v8746_v36 = vld [vmem:[%s8604_s6 + $0x38] sm:$0xff]  }
  0x29   : > { %6964 = vmatmul.msk.bf16.vlgmr.msra.gmra.mxu2 %vm419_vm1, %v672_v37  ;;  %8276 = vmatpush.bf16.msra.mxu3 %v7762_v2  ;;  %v318_v56 = vor.u32 %v316_v53, %v314_v45  ;;  %v675_v58 = vrot.slane %v8673_v52, 1  ;;  %v324_v63 = vshrl.u32 %v8673_v52, 16  ;;  %v328_v0 = vshll.u32 %v8691_v62, 16  ;;  %p8455_p2 = pnand %p8454_p1, %p8581_p4  ;;  %p8460_p7 = por %p8459_p6, %p8458_p5 }
  0x2a   : > { %v402_v47 = vrot.slane %v400_v43, 1  ;;  %v322_v57 = vrot.slane %v320_v54, 1  ;;  %v677_v3 = vrot.slane %v8691_v62, 1  ;;  %v332_v18 = vshrl.u32 %v8691_v62, 16 }
  0x2b   : > { %v676_v61 = vsel %vm669_vm2, %v673_v48, %v675_v58  ;;  %v330_v2 = vrot.slane %v328_v0, 1  ;;  %v344_v28 = vshll.u32 %v8727_v26, 16  ;;  %v681_v31 = vrot.slane %v8727_v26, 1  ;;  %p8456_p3 = pneg %p8455_p2 }
  0x2c   : > { %v403_v50 = vsel %vm295_vm0, %v398_v46, %v402_v47  ;;  %v406_v59 = vor.u32 %v404_v55, %v402_v47  ;;  %v323_v60 = vsel %vm295_vm0, %v318_v56, %v322_v57  ;;  %v326_v1 = vor.u32 %v324_v63, %v322_v57  ;;  %v7764_v55 = vld [vmem:[#allocation2 + $0x38] sm:$0xff]  ;;  %v8768_v56 = vld [vmem:[%s8604_s6 + $0x40] sm:$0xff]  }
  0x2d   : > { %8277 = vmatpush.bf16.msra.mxu3 %v7761_v8  ;;  %v678_v5 = vsel %vm669_vm2, %v675_v58, %v677_v3  ;;  %v8708_v8 = vld [vmem:[%s8604_s6 + $0x28] sm:$0xff]   ;;  %v334_v20 = vor.u32 %v332_v18, %v330_v2  ;;  %v346_v30 = vrot.slane %v344_v28, 1  ;;  %v540_v33 = vpack.c.b16 %v8638_v32, %v8638_v32  ;;  %p8461_p9 = pnand %p8460_p7, %p8456_p3 }
  0x2e   : > { %v331_v4 = vsel %vm295_vm0, %v326_v1, %v330_v2  ;;  %v336_v19 = vshll.u32 %v8708_v8, 16  ;;  %v679_v23 = vrot.slane %v8708_v8, 1  ;;  %v340_v27 = vshrl.u32 %v8708_v8, 16 }
  0x2f   : > { %v348_v37 = vshrl.u32 %v8727_v26, 16  ;;  %v352_v43 = vshll.u32 %v8746_v36, 16  ;;  %v691_v46 = vrot.slane %v8611_v7, 1  ;;  %v693_v47 = vrot.slane %v8615_v12, 1 }
  0x30   : > { %v338_v21 = vrot.slane %v336_v19, 1  ;;  %v680_v25 = vsel %vm669_vm2, %v677_v3, %v679_v23  ;;  %v682_v35 = vsel %vm669_vm2, %v679_v23, %v681_v31  ;;  %v683_v48 = vrot.slane %v8746_v36, 1 }
  0x31   : > { %v350_v44 = vor.u32 %v348_v37, %v346_v30  ;;  %v354_v45 = vrot.slane %v352_v43, 1  ;;  %v356_v57 = vshrl.u32 %v8746_v36, 16  ;;  %v360_v58 = vshll.u32 %v8768_v56, 16 }
  0x32   : > { %v339_v24 = vsel %vm295_vm0, %v334_v20, %v338_v21  ;;  %v342_v29 = vor.u32 %v340_v27, %v338_v21  ;;  %v685_v1 = vrot.slane %v8768_v56, 1  ;;  %v364_v9 = vshrl.u32 %v8768_v56, 16 }
  0x33   : > { %6943 = vmatmul.msk.bf16.gmra.mxu1 %vm419_vm1, %v8608_v6  ;;  %v875_v42 = vrot.slane %v8673_v52, 3  ;;  %v7879_v13 = vunpack.c.l.b16 %v8608_v6 }
  0x34   : > { %v347_v34 = vsel %vm295_vm0, %v342_v29, %v346_v30  ;;  %v856_v29 = vld [vmem:[%s8604_s6] sm:$0x8] }
  0x37   : > { %6921 = vmatmul.msk.bf16.gmra.mxu0 %vm419_vm1, %v315_v49  ;;  %6932 = vmatmul.msk.bf16.gmra.mxu3 %vm419_vm1, %v403_v50  ;;  %v355_v49 = vsel %vm295_vm0, %v350_v44, %v354_v45  ;;  %v694_v50 = vsel %vm669_vm2, %v691_v46, %v693_v47 }
  0x39   : > { %6965 = vmatmul.msk.bf16.gmra.mxu2 %vm419_vm1, %v674_v51  ;;  %v684_v51 = vsel %vm669_vm2, %v681_v31, %v683_v48 }
  0x43   : > { %6944 = vmatmul.msk.bf16.gmra.mxu1 %vm419_vm1, %v8651_v39 }
  0x47   : > { %6922 = vmatmul.msk.bf16.gmra.mxu0 %vm419_vm1, %v323_v60  ;;  %6933 = vmatmul.msk.bf16.gmra.mxu3 %vm419_vm1, %v406_v59  ;;  %v358_v59 = vor.u32 %v356_v57, %v354_v45  ;;  %v362_v60 = vrot.slane %v360_v58, 1 }
  0x49   : > { %6966 = vmatmul.msk.bf16.gmra.mxu2 %vm419_vm1, %v676_v61  ;;  %v695_v61 = vrot.slane %v8647_v38, 1  ;;  %v363_v2 = vsel %vm295_vm0, %v358_v59, %v362_v60  ;;  %v8787_v38 = vld [vmem:[%s8604_s6 + $0x48] sm:$0xff]   ;;  %v366_v17 = vor.u32 %v364_v9, %v362_v60 }
  0x4a   : > { %v368_v10 = vshll.u32 %v8787_v38, 16  ;;  %v687_v21 = vrot.slane %v8787_v38, 1 }
  0x4b   : > { %v696_v3 = vsel %vm669_vm2, %v693_v47, %v695_v61  ;;  %v372_v47 = vshrl.u32 %v8787_v38, 16 }
  0x4c   : > { %v370_v20 = vrot.slane %v368_v10, 1  ;;  %v688_v31 = vsel %vm669_vm2, %v685_v1, %v687_v21 }
  0x4e   : > { %v374_v59 = vor.u32 %v372_v47, %v370_v20 }
  0x53   : > { %6945 = vmatmul.msk.bf16.gmra.mxu1 %vm419_vm1, %v8673_v52 }
  0x57   : > { %6923 = vmatmul.msk.bf16.gmra.mxu0 %vm419_vm1, %v331_v4  ;;  %6953 = vmatmul.msk.bf16.vlgmr.msrb.gmra.mxu3 %vm419_vm1, %v8611_v7  ;;  %v7763_v4 = vld [vmem:[#allocation2 + $0x30] sm:$0xff] }
  0x58   : > { %957 = vmatpush.bf16.msrb.mxu3 %v7764_v55 }
  0x59   : > { %6967 = vmatmul.msk.bf16.gmra.mxu2 %vm419_vm1, %v678_v5  ;;  %v686_v5 = vsel %vm669_vm2, %v683_v48, %v685_v1  ;;  %v871_v1 = vrot.slane %v8608_v6, 3 }
  0x5c   : > { %958 = vmatpush.bf16.msrb.mxu3 %v7763_v4 }
  0x63   : > { %6946 = vmatmul.msk.bf16.gmra.mxu1 %vm419_vm1, %v8691_v62 }
  0x67   : > { %6924 = vmatmul.msk.bf16.gmra.mxu0 %vm419_vm1, %v339_v24  ;;  %6954 = vmatmul.msk.bf16.gmra.mxu3 %vm419_vm1, %v8615_v12  ;;  %v371_v24 = vsel %vm295_vm0, %v366_v17, %v370_v20 }
  0x69   : > { %6968 = vmatmul.msk.bf16.gmra.mxu2 %vm419_vm1, %v680_v25 }
  0x73   : > { %6947 = vmatmul.msk.bf16.gmra.mxu1 %vm419_vm1, %v8708_v8 }
  0x77   : > { %6925 = vmatmul.msk.bf16.gmra.mxu0 %vm419_vm1, %v347_v34  ;;  %6955 = vmatmul.msk.bf16.gmra.mxu3 %vm419_vm1, %v540_v33  ;;  %v865_v33 = vunpack.c.l.b16 %v856_v29  ;;  %v8805_v34 = vld [vmem:[%s8604_s6 + $0x50] sm:$0xff]  }
  0x78   : > { %v376_v48 = vshll.u32 %v8805_v34, 16 }
  0x79   : > { %6969 = vmatmul.msk.bf16.gmra.mxu2 %vm419_vm1, %v682_v35 }
  0x7a   : > { %v378_v60 = vrot.slane %v376_v48, 1 }
  0x7c   : > { %v379_v17 = vsel %vm295_vm0, %v374_v59, %v378_v60 }
  0x83   : > { %6948 = vmatmul.msk.bf16.gmra.mxu1 %vm419_vm1, %v8727_v26 }
  0x87   : > { %6926 = vmatmul.msk.bf16.gmra.mxu0 %vm419_vm1, %v355_v49  ;;  %6975 = vmatmul.msk.bf16.vlgmr.msra.gmra.mxu3 %vm419_vm1, %v694_v50  ;;  %v8812_v49 = vpack.c.b16 %v8620_v16, %v865_v33 }
  0x89   : > { %6970 = vmatmul.msk.bf16.gmra.mxu2 %vm419_vm1, %v684_v51 }
  0x93   : > { %6949 = vmatmul.msk.bf16.gmra.mxu1 %vm419_vm1, %v8746_v36 }
  0x97   : > { %6927 = vmatmul.msk.bf16.gmra.mxu0 %vm419_vm1, %v363_v2  ;;  %6976 = vmatmul.msk.bf16.gmra.mxu3 %vm419_vm1, %v696_v3  ;;  %v689_v3 = vrot.slane %v8805_v34, 1 }
  0x99   : > { %6971 = vmatmul.msk.bf16.gmra.mxu2 %vm419_vm1, %v686_v5  ;;  %v690_v29 = vsel %vm669_vm2, %v687_v21, %v689_v3 }
  0xa0   : > { %v591_v25 = vpop.f32.mrf.mxu1 }
  0xa3   : > { %6950 = vmatmul.msk.bf16.gmra.mxu1 %vm419_vm1, %v8768_v56 }
  0xa4   : > { %v471_v23 = vpop.f32.mrf.mxu0 }
  0xa5   : > { %v592_v30 = vadd.f32 %v591_v25, %v471_v23 }
  0xa7   : > { %6928 = vmatmul.msk.bf16.gmra.mxu0 %vm419_vm1, %v371_v24  ;;  %6977 = vmatmul.msk.bf16.gmra.mxu3 %vm419_vm1, %v695_v61  ;;  %v870_v61 = vrot.slane %v8812_v49, 3 }
  0xa8   : > { %v593_v51 = vpop.f32.mrf.mxu1 }
  0xa9   : > { %6972 = vmatmul.msk.bf16.gmra.mxu2 %vm419_vm1, %v688_v31  ;;  %v872_v23 = vsel %vm869_vm3, %v870_v61, %v871_v1  ;;  %v7802_v31 = vld [vmem:[#allocation2 + $0xa8] sm:$0xff] }
  0xaa   : > { %v8807_v35 = vpop.f32.mrf.mxu3  ;;  %2730 = vmatpush.bf16.msra.mxu2 %v7802_v31  ;;  %v7786_v61 = vld [vmem:[#allocation2 + $0x88] sm:$0xff] }
  0xab   : > { %2148 = vmatpush.bf16.msra.mxu0 %v7786_v61  ;;  %v8857_v61 = vld [vmem:[%s8604_s6 + $0x8] sm:$0xf] }
  0xac   : > { %v760_v44 = vpop.f32.mrf.mxu2  ;;  %v473_v45 = vpop.f32.mrf.mxu0 }
  0xad   : > { %v8814_v50 = vadd.f32 %v760_v44, %v592_v30  ;;  %v594_v55 = vadd.f32 %v593_v51, %v473_v45  ;;  %v7784_v30 = vld [vmem:[#allocation2 + $0x78] sm:$0xff]  ;;  %v380_v51 = vshrl.u32 %v8805_v34, 16 }
  0xae   : > { %1953 = vmatpush.bf16.msra.mxu3 %v7784_v30 }
  0xb0   : > { %v596_v20 = vpop.f32.mrf.mxu1 }
  0xb2   : > { %v8822_v2 = vpop.f32.mrf.mxu3 }
  0xb3   : > { %6951 = vmatmul.msk.bf16.gmra.mxu1 %vm419_vm1, %v8787_v38 }
  0xb4   : > { %v762_v4 = vpop.f32.mrf.mxu2  ;;  %v476_v5 = vpop.f32.mrf.mxu0 }
  0xb5   : > { %v8827_v24 = vadd.f32 %v762_v4, %v594_v55  ;;  %v597_v25 = vadd.f32 %v596_v20, %v476_v5  ;;  %v7800_v4 = vld [vmem:[#allocation2 + $0x98] sm:$0xff]  ;;  %v382_v5 = vor.u32 %v380_v51, %v378_v60  ;;  %v692_v60 = vsel %vm669_vm2, %v689_v3, %v691_v46 }
  0xb6   : > { %2437 = vmatpush.bf16.msra.mxu1 %v7800_v4  ;;  %v10868_v3 = vunpack.c.l.b16 %v8857_v61 }
  0xb7   : > { %6929 = vmatmul.msk.bf16.gmra.mxu0 %vm419_vm1, %v379_v17  ;;  %6986 = vmatmul.msk.bf16.vlgmr.msrb.gmra.mxu3 %vm419_vm1, %v872_v23  ;;  %v873_v17 = vrot.slane %v8651_v39, 3 }
  0xb8   : > { %v598_v55 = vpop.f32.mrf.mxu1 }
  0xb9   : > { %6973 = vmatmul.msk.bf16.gmra.mxu2 %vm419_vm1, %v690_v29  ;;  %v874_v30 = vsel %vm869_vm3, %v871_v1, %v873_v17  ;;  %v1070_v1 = vshll.u32 %v8812_v49, 16 }
  0xba   : > { %v8835_v33 = vpop.f32.mrf.mxu3 }
  0xbc   : > { %v765_v44 = vpop.f32.mrf.mxu2  ;;  %v478_v45 = vpop.f32.mrf.mxu0 }
  0xbd   : > { %v8838_v21 = vadd.f32 %v765_v44, %v597_v25  ;;  %v599_v59 = vadd.f32 %v598_v55, %v478_v45  ;;  %v387_v25 = vsel %vm295_vm0, %v382_v5, %v8627_v22  ;;  %v1468_v55 = vld [vmem:[%s8604_s6 + $0x4] sm:$0xc]  ;;  %v1067_v22 = vshrl.u32 %v8812_v49, 16 }
  0xbe   : > { %v1529_v46 = vunpack.c.l.b16 %v1468_v55 }
  0xc0   : > { %v601_v44 = vpop.f32.mrf.mxu1  ;;  %v8878_v55 = vpack.c.b16 %v10868_v3, %v1529_v46  ;;  %v1295_v3 = vpack.c.b16 %v7879_v13, %v8620_v16  ;;  %v1078_v16 = vrot.slane %v316_v53, 3 }
  0xc2   : > { %v8843_v23 = vpop.f32.mrf.mxu3 }
  0xc3   : > { %6952 = vmatmul.msk.bf16.gmra.mxu1 %vm419_vm1, %v8805_v34 }
  0xc4   : > { %v767_v20 = vpop.f32.mrf.mxu2  ;;  %v481_v29 = vpop.f32.mrf.mxu0 }
  0xc5   : > { %v8848_v31 = vadd.f32 %v767_v20, %v599_v59  ;;  %v602_v45 = vadd.f32 %v601_v44, %v481_v29  ;;  %v1069_v20 = vrot.slane %v1067_v22, 3  ;;  %v1072_v29 = vrot.slane %v1070_v1, 4 }
  0xc7   : > { %6930 = vmatmul.msk.bf16.gmra.mxu0 %vm419_vm1, %v387_v25  ;;  %6987 = vmatmul.msk.bf16.gmra.mxu3 %vm419_vm1, %v874_v30  ;;  %v1074_v25 = vrot.slane %v308_v40, 3  ;;  %v1075_v30 = vrot.slane %v304_v11, 4  ;;  %v1073_v22 = vor.u32 %v1072_v29, %v1069_v20  ;;  %v1572_v11 = vrot.slane %v8878_v55, 2 }
  0xc8   : > { %v603_v49 = vpop.f32.mrf.mxu1 }
  0xc9   : > { %6974 = vmatmul.msk.bf16.gmra.mxu2 %vm419_vm1, %v692_v60  ;;  %v8874_v60 = vld [vmem:[%s8604_s6 + $0xc] sm:$0xff]  ;;  %v1076_v1 = vor.u32 %v1075_v30, %v1074_v25  ;;  %v1079_v30 = vrot.slane %v312_v41, 4 }
  0xca   : > { %v8864_v59 = vpop.f32.mrf.mxu3 }
  0xcb   : > { %v1077_v46 = vsel %vm1065_vm4, %v1073_v22, %v1076_v1 }
  0xcc   : > { %v770_v4 = vpop.f32.mrf.mxu2  ;;  %v483_v5 = vpop.f32.mrf.mxu0 }
  0xcd   : > { %v8871_v44 = vadd.f32 %v770_v4, %v602_v45  ;;  %v604_v15 = vadd.f32 %v603_v49, %v483_v5  ;;  %v1573_v45 = vrot.slane %v8874_v60, 2  ;;  %v876_v49 = vsel %vm869_vm3, %v873_v17, %v875_v42 }
  0xcf   : > { %v1574_v29 = vsel %vm1571_vm5, %v1572_v11, %v1573_v45 }
  0xd0   : > { %v606_v20 = vpop.f32.mrf.mxu1 }
  0xd2   : > { %v538_v40 = vpop.f32.mrf.mxu3 }
  0xd3   : > { %7030 = vmatmul.msk.bf16.vlgmr.msrb.gmra.mxu1 %vm419_vm1, %v1295_v3  ;;  %v8904_v3 = vld [vmem:[%s8604_s6 + $0x14] sm:$0xff] }
  0xd4   : > { %v772_v4 = vpop.f32.mrf.mxu2  ;;  %v486_v5 = vpop.f32.mrf.mxu0 }
  0xd5   : > { %v8887_v14 = vadd.f32 %v772_v4, %v604_v15  ;;  %v607_v6 = vadd.f32 %v606_v20, %v486_v5  ;;  %v877_v4 = vrot.slane %v8691_v62, 3  ;;  %v1080_v5 = vor.u32 %v1079_v30, %v1078_v16  ;;  %v8136_v62 = vld [vmem:[%s8604_s6 + $0x1c] sm:$0xff]  }
  0xd6   : > { %v1082_v30 = vrot.slane %v324_v63, 3 }
  0xd7   : > { %6988 = vmatmul.msk.bf16.gmra.mxu3 %vm419_vm1, %v876_v49  ;;  %7008 = vmatmul.msk.bf16.vlgmr.msrb.gmra.mxu0 %vm419_vm1, %v1077_v46  ;;  %v1575_v49 = vrot.slane %v8904_v3, 2  ;;  %v878_v39 = vsel %vm869_vm3, %v875_v42, %v877_v4  ;;  %v1081_v41 = vsel %vm1065_vm4, %v1076_v1, %v1080_v5 }
  0xd8   : > { %v608_v40 = vpop.f32.mrf.mxu1 }
  0xd9   : > { %7100 = vmatmul.msk.bf16.vlgmr.msrb.gmra.mxu2 %vm419_vm1, %v1574_v29 }
  0xda   : > { %v646_v17 = vpop.f32.mrf.mxu3 }
  0xdb   : > { %v8895_v25 = vadd.f32 %v646_v17, %v8807_v35 }
  0xdc   : > { %v775_v13 = vpop.f32.mrf.mxu2  ;;  %v488_v15 = vpop.f32.mrf.mxu0 }
  0xdd   : > { %v8901_v22 = vadd.f32 %v775_v13, %v607_v6  ;;  %v609_v11 = vadd.f32 %v608_v40, %v488_v15  ;;  %v8132_v6 = vld [vmem:[%s8604_s6 + $0xc] sm:$0xff]   ;;  %v1576_v15 = vsel %vm1571_vm5, %v1573_v45, %v1575_v49  ;;  %v1083_v45 = vrot.slane %v320_v54, 4 }
  0xe0   : > { %v611_v17 = vpop.f32.mrf.mxu1 }
  0xe2   : > { %v648_v35 = vpop.f32.mrf.mxu3 }
  0xe3   : > { %v8909_v46 = vadd.f32 %v648_v35, %v8822_v2  ;;  %7031 = vmatmul.msk.bf16.gmra.mxu1 %vm419_vm1, %v8132_v6 }
  0xe4   : > { %v777_v20 = vpop.f32.mrf.mxu2  ;;  %v491_v53 = vpop.f32.mrf.mxu0 }
  0xe5   : > { %v8914_v29 = vadd.f32 %v777_v20, %v609_v11  ;;  %v612_v13 = vadd.f32 %v611_v17, %v491_v53  ;;  %v8931_v20 = vld [vmem:[%s8604_s6 + $0x1c] sm:$0xff]  ;;  %v879_v53 = vrot.slane %v8708_v8, 3 }
  0xe7   : > { %6989 = vmatmul.msk.bf16.gmra.mxu3 %vm419_vm1, %v878_v39  ;;  %7009 = vmatmul.msk.bf16.gmra.mxu0 %vm419_vm1, %v1081_v41  ;;  %v1084_v39 = vor.u32 %v1083_v45, %v1082_v30  ;;  %v1577_v41 = vrot.slane %v8931_v20, 2  ;;  %v880_v52 = vsel %vm869_vm3, %v877_v4, %v879_v53  ;;  %v1086_v45 = vrot.slane %v332_v18, 3 }
  0xe8   : > { %v613_v11 = vpop.f32.mrf.mxu1 }
  0xe9   : > { %7101 = vmatmul.msk.bf16.gmra.mxu2 %vm419_vm1, %v1576_v15  ;;  %v1085_v54 = vsel %vm1065_vm4, %v1080_v5, %v1084_v39 }
  0xea   : > { %v651_v2 = vpop.f32.mrf.mxu3 }
  0xeb   : > { %v8922_v42 = vadd.f32 %v651_v2, %v8835_v33 }
  0xec   : > { %v780_v1 = vpop.f32.mrf.mxu2  ;;  %v493_v16 = vpop.f32.mrf.mxu0 }
  0xed   : > { %v8928_v40 = vadd.f32 %v780_v1, %v612_v13  ;;  %v614_v35 = vadd.f32 %v613_v11, %v493_v16  ;;  %v8134_v13 = vld [vmem:[%s8604_s6 + $0x14] sm:$0xff]   ;;  %v1578_v16 = vsel %vm1571_vm5, %v1575_v49, %v1577_v41  ;;  %v1087_v49 = vrot.slane %v328_v0, 4 }
  0xf0   : > { %v616_v2 = vpop.f32.mrf.mxu1 }
  0xf2   : > { %v653_v33 = vpop.f32.mrf.mxu3 }
  0xf3   : > { %v8936_v6 = vadd.f32 %v653_v33, %v8843_v23  ;;  %7032 = vmatmul.msk.bf16.gmra.mxu1 %vm419_vm1, %v8134_v13 }
  0xf4   : > { %v782_v17 = vpop.f32.mrf.mxu2  ;;  %v496_v63 = vpop.f32.mrf.mxu0 }
  0xf5   : > { %v8941_v15 = vadd.f32 %v782_v17, %v614_v35  ;;  %v617_v1 = vadd.f32 %v616_v2, %v496_v63  ;;  %v8958_v17 = vld [vmem:[%s8604_s6 + $0x24] sm:$0xff]  ;;  %v881_v63 = vrot.slane %v8727_v26, 3 }
  0xf7   : > { %6990 = vmatmul.msk.bf16.gmra.mxu3 %vm419_vm1, %v880_v52  ;;  %7010 = vmatmul.msk.bf16.gmra.mxu0 %vm419_vm1, %v1085_v54  ;;  %v1088_v52 = vor.u32 %v1087_v49, %v1086_v45  ;;  %v1579_v54 = vrot.slane %v8958_v17, 2  ;;  %v1090_v49 = vrot.slane %v340_v27, 3 }
  0xf8   : > { %v618_v35 = vpop.f32.mrf.mxu1 }
  0xf9   : > { %7102 = vmatmul.msk.bf16.gmra.mxu2 %vm419_vm1, %v1578_v16  ;;  %v882_v16 = vsel %vm869_vm3, %v879_v53, %v881_v63  ;;  %v1089_v18 = vsel %vm1065_vm4, %v1084_v39, %v1088_v52 }
  0xfa   : > { %v656_v23 = vpop.f32.mrf.mxu3 }
  0xfb   : > { %v8949_v4 = vadd.f32 %v656_v23, %v8864_v59 }
  0xfc   : > { %v785_v5 = vpop.f32.mrf.mxu2  ;;  %v498_v30 = vpop.f32.mrf.mxu0 }
  0xfd   : > { %v8955_v11 = vadd.f32 %v785_v5, %v617_v1  ;;  %v619_v33 = vadd.f32 %v618_v35, %v498_v30  ;;  %v1580_v5 = vsel %vm1571_vm5, %v1577_v41, %v1579_v54  ;;  %v1091_v41 = vrot.slane %v336_v19, 4 }
 0x100   : > { %v621_v1 = vpop.f32.mrf.mxu1 }
 0x102   : > { %v658_v59 = vpop.f32.mrf.mxu3 }
 0x103   : > { %7033 = vmatmul.msk.bf16.gmra.mxu1 %vm419_vm1, %v8136_v62 }
 0x104   : > { %v787_v13 = vpop.f32.mrf.mxu2  ;;  %v501_v2 = vpop.f32.mrf.mxu0 }
 0x105   : > { %v8965_v0 = vadd.f32 %v787_v13, %v619_v33  ;;  %v622_v23 = vadd.f32 %v621_v1, %v501_v2  ;;  %v8982_v13 = vld [vmem:[%s8604_s6 + $0x2c] sm:$0xff]  ;;  %v883_v2 = vrot.slane %v8746_v36, 3 }
 0x107   : > { %6991 = vmatmul.msk.bf16.gmra.mxu3 %vm419_vm1, %v882_v16  ;;  %7011 = vmatmul.msk.bf16.gmra.mxu0 %vm419_vm1, %v1089_v18  ;;  %v1092_v16 = vor.u32 %v1091_v41, %v1090_v49  ;;  %v1581_v18 = vrot.slane %v8982_v13, 2  ;;  %v884_v8 = vsel %vm869_vm3, %v881_v63, %v883_v2  ;;  %v1094_v41 = vrot.slane %v348_v37, 3 }
 0x108   : > { %v623_v33 = vpop.f32.mrf.mxu1 }
 0x109   : > { %7103 = vmatmul.msk.bf16.gmra.mxu2 %vm419_vm1, %v1580_v5  ;;  %v1093_v19 = vsel %vm1065_vm4, %v1088_v52, %v1092_v16 }
 0x10a   : > { %v815_v30 = vpop.f32.mrf.mxu3 }
 0x10b   : > { %v8973_v53 = vadd.f32 %v815_v30, %v8895_v25 }
 0x10c   : > { %v790_v39 = vpop.f32.mrf.mxu2  ;;  %v503_v45 = vpop.f32.mrf.mxu0 }
 0x10d   : > { %v8979_v35 = vadd.f32 %v790_v39, %v622_v23  ;;  %v624_v59 = vadd.f32 %v623_v33, %v503_v45  ;;  %v8138_v23 = vld [vmem:[%s8604_s6 + $0x24] sm:$0xff]   ;;  %v1582_v45 = vsel %vm1571_vm5, %v1579_v54, %v1581_v18  ;;  %v1095_v54 = vrot.slane %v344_v28, 4 }
 0x110   : > { %v626_v30 = vpop.f32.mrf.mxu1 }
 0x112   : > { %v817_v25 = vpop.f32.mrf.mxu3 }
 0x113   : > { %v8987_v62 = vadd.f32 %v817_v25, %v8909_v46  ;;  %7034 = vmatmul.msk.bf16.gmra.mxu1 %vm419_vm1, %v8138_v23 }
 0x114   : > { %v792_v1 = vpop.f32.mrf.mxu2  ;;  %v506_v27 = vpop.f32.mrf.mxu0 }
 0x115   : > { %v8992_v5 = vadd.f32 %v792_v1, %v624_v59  ;;  %v627_v39 = vadd.f32 %v626_v30, %v506_v27  ;;  %v9009_v1 = vld [vmem:[%s8604_s6 + $0x34] sm:$0xff]  ;;  %v885_v27 = vrot.slane %v8768_v56, 3 }
 0x117   : > { %6992 = vmatmul.msk.bf16.gmra.mxu3 %vm419_vm1, %v884_v8  ;;  %7012 = vmatmul.msk.bf16.gmra.mxu0 %vm419_vm1, %v1093_v19  ;;  %v1096_v8 = vor.u32 %v1095_v54, %v1094_v41  ;;  %v1583_v19 = vrot.slane %v9009_v1, 2  ;;  %v886_v26 = vsel %vm869_vm3, %v883_v2, %v885_v27  ;;  %v7783_v41 = vld [vmem:[#allocation2 + $0x70] sm:$0xff] }
 0x118   : > { %v628_v59 = vpop.f32.mrf.mxu1  ;;  %1954 = vmatpush.bf16.msra.mxu3 %v7783_v41 }
 0x119   : > { %7104 = vmatmul.msk.bf16.gmra.mxu2 %vm419_vm1, %v1582_v45  ;;  %v1097_v28 = vsel %vm1065_vm4, %v1092_v16, %v1096_v8 }
 0x11a   : > { %v820_v46 = vpop.f32.mrf.mxu3 }
 0x11b   : > { %v9000_v63 = vadd.f32 %v820_v46, %v8922_v42 }
 0x11c   : > { %v795_v52 = vpop.f32.mrf.mxu2  ;;  %v508_v49 = vpop.f32.mrf.mxu0 }
 0x11d   : > { %v9006_v33 = vadd.f32 %v795_v52, %v627_v39  ;;  %v629_v25 = vadd.f32 %v628_v59, %v508_v49  ;;  %v8140_v39 = vld [vmem:[%s8604_s6 + $0x2c] sm:$0xff]   ;;  %v1584_v49 = vsel %vm1571_vm5, %v1581_v18, %v1583_v19  ;;  %v1098_v18 = vrot.slane %v356_v57, 3 }
 0x120   : > { %v631_v46 = vpop.f32.mrf.mxu1 }
 0x122   : > { %v822_v42 = vpop.f32.mrf.mxu3 }
 0x123   : > { %v9014_v23 = vadd.f32 %v822_v42, %v8936_v6  ;;  %7035 = vmatmul.msk.bf16.gmra.mxu1 %vm419_vm1, %v8140_v39  ;;  %v7801_v6 = vld [vmem:[#allocation2 + $0xa0] sm:$0xff]  ;;  %v7799_v39 = vld [vmem:[#allocation2 + $0x90] sm:$0xff] }
 0x124   : > { %v797_v30 = vpop.f32.mrf.mxu2  ;;  %v511_v37 = vpop.f32.mrf.mxu0  ;;  %2731 = vmatpush.bf16.msra.mxu2 %v7801_v6  ;;  %2438 = vmatpush.bf16.msra.mxu1 %v7799_v39  ;;  %v8142_v6 = vld [vmem:[%s8604_s6 + $0x34] sm:$0xff]  }
 0x125   : > { %v9019_v45 = vadd.f32 %v797_v30, %v629_v25  ;;  %v632_v52 = vadd.f32 %v631_v46, %v511_v37  ;;  %v1099_v25 = vrot.slane %v352_v43, 4 }
 0x127   : > { %6993 = vmatmul.msk.bf16.gmra.mxu3 %vm419_vm1, %v886_v26  ;;  %7013 = vmatmul.msk.bf16.gmra.mxu0 %vm419_vm1, %v1097_v28  ;;  %v9036_v26 = vld [vmem:[%s8604_s6 + $0x3c] sm:$0xff]  ;;  %v1100_v46 = vor.u32 %v1099_v25, %v1098_v18 }
 0x128   : > { %v633_v30 = vpop.f32.mrf.mxu1  ;;  %v7785_v28 = vld [vmem:[#allocation2 + $0x80] sm:$0xff]  ;;  %v1585_v57 = vrot.slane %v9036_v26, 2 }
 0x129   : > { %7105 = vmatmul.msk.bf16.gmra.mxu2 %vm419_vm1, %v1584_v49  ;;  %2149 = vmatpush.bf16.msra.mxu0 %v7785_v28 }
 0x12a   : > { %v825_v2 = vpop.f32.mrf.mxu3 }
 0x12b   : > { %v9027_v16 = vadd.f32 %v825_v2, %v8949_v4  ;;  %v887_v4 = vrot.slane %v8787_v38, 3 }
 0x12c   : > { %v800_v54 = vpop.f32.mrf.mxu2  ;;  %v513_v59 = vpop.f32.mrf.mxu0 }
 0x12d   : > { %v9033_v42 = vadd.f32 %v800_v54, %v632_v52  ;;  %v634_v37 = vadd.f32 %v633_v30, %v513_v59  ;;  %v888_v43 = vsel %vm869_vm3, %v885_v27, %v887_v4  ;;  %v1101_v52 = vsel %vm1065_vm4, %v1096_v8, %v1100_v46 }
 0x12e   : > { %v1586_v30 = vsel %vm1571_vm5, %v1583_v19, %v1585_v57  ;;  %v1103_v19 = vrot.slane %v360_v58, 4  ;;  %v8144_v58 = vld [vmem:[%s8604_s6 + $0x3c] sm:$0xff]  }
 0x130   : > { %v636_v54 = vpop.f32.mrf.mxu1 }
 0x132   : > { %v827_v49 = vpop.f32.mrf.mxu3 }
 0x133   : > { %7036 = vmatmul.msk.bf16.gmra.mxu1 %vm419_vm1, %v8142_v6 }
 0x134   : > { %v802_v41 = vpop.f32.mrf.mxu2  ;;  %v516_v36 = vpop.f32.mrf.mxu0 }
 0x135   : > { %v9043_v2 = vadd.f32 %v802_v41, %v634_v37  ;;  %v637_v59 = vadd.f32 %v636_v54, %v516_v36  ;;  %v1102_v37 = vrot.slane %v364_v9, 3  ;;  %v9058_v41 = vld [vmem:[%s8604_s6 + $0x44] sm:$0xff]  ;;  %v889_v36 = vrot.slane %v8805_v34, 3 }
 0x137   : > { %6994 = vmatmul.msk.bf16.gmra.mxu3 %vm419_vm1, %v888_v43  ;;  %7014 = vmatmul.msk.bf16.gmra.mxu0 %vm419_vm1, %v1101_v52  ;;  %v1104_v43 = vor.u32 %v1103_v19, %v1102_v37  ;;  %v890_v9 = vsel %vm869_vm3, %v887_v4, %v889_v36  ;;  %v1106_v19 = vrot.slane %v372_v47, 3 }
 0x138   : > { %v638_v39 = vpop.f32.mrf.mxu1 }
 0x139   : > { %7106 = vmatmul.msk.bf16.gmra.mxu2 %vm419_vm1, %v1586_v30  ;;  %v1105_v56 = vsel %vm1065_vm4, %v1100_v46, %v1104_v43 }
 0x13a   : > { %v960_v18 = vpop.f32.mrf.mxu3 }
 0x13b   : > { %v1029_v27 = vadd.f32 %v960_v18, %v8814_v50  ;;  %v1587_v50 = vrot.slane %v9058_v41, 2 }
 0x13c   : > { %v805_v8 = vpop.f32.mrf.mxu2  ;;  %v518_v25 = vpop.f32.mrf.mxu0 }
 0x13d   : > { %v9055_v28 = vadd.f32 %v805_v8, %v637_v59  ;;  %v639_v49 = vadd.f32 %v638_v39, %v518_v25  ;;  %v1588_v25 = vsel %vm1571_vm5, %v1585_v57, %v1587_v50  ;;  %v1107_v57 = vrot.slane %v368_v10, 4  ;;  %v8146_v10 = vld [vmem:[%s8604_s6 + $0x44] sm:$0xff]  }
 0x140   : > { %v641_v18 = vpop.f32.mrf.mxu1 }
 0x142   : > { %v962_v52 = vpop.f32.mrf.mxu3 }
 0x143   : > { %v1030_v6 = vadd.f32 %v962_v52, %v8827_v24  ;;  %7037 = vmatmul.msk.bf16.gmra.mxu1 %vm419_vm1, %v8144_v58 }
 0x144   : > { %v807_v54 = vpop.f32.mrf.mxu2  ;;  %v521_v30 = vpop.f32.mrf.mxu0 }
 0x145   : > { %v9066_v59 = vadd.f32 %v807_v54, %v639_v49  ;;  %v642_v8 = vadd.f32 %v641_v18, %v521_v30  ;;  %v9081_v54 = vld [vmem:[%s8604_s6 + $0x4c] sm:$0xff]  ;;  %v891_v30 = vrot.slane %v8611_v7, 3 }
 0x147   : > { %6995 = vmatmul.msk.bf16.gmra.mxu3 %vm419_vm1, %v890_v9  ;;  %7015 = vmatmul.msk.bf16.gmra.mxu0 %vm419_vm1, %v1105_v56  ;;  %v1108_v9 = vor.u32 %v1107_v57, %v1106_v19  ;;  %v892_v47 = vsel %vm869_vm3, %v889_v36, %v891_v30 }
 0x148   : > { %v643_v49 = vpop.f32.mrf.mxu1 }
 0x149   : > { %7107 = vmatmul.msk.bf16.gmra.mxu2 %vm419_vm1, %v1588_v25  ;;  %v1109_v38 = vsel %vm1065_vm4, %v1104_v43, %v1108_v9 }
 0x14a   : > { %v965_v24 = vpop.f32.mrf.mxu3 }
 0x14b   : > { %v1031_v4 = vadd.f32 %v965_v24, %v8838_v21  ;;  %v1589_v21 = vrot.slane %v9081_v54, 2 }
 0x14c   : > { %v810_v46 = vpop.f32.mrf.mxu2  ;;  %v523_v37 = vpop.f32.mrf.mxu0 }
 0x14d   : > { %v9078_v39 = vadd.f32 %v810_v46, %v642_v8  ;;  %v644_v52 = vadd.f32 %v643_v49, %v523_v37  ;;  %v1590_v37 = vsel %vm1571_vm5, %v1587_v50, %v1589_v21  ;;  %v1111_v50 = vrot.slane %v376_v48, 4 }
 0x150   : > { %v1372_v46 = vpop.f32.mrf.mxu1 }
 0x152   : > { %v967_v56 = vpop.f32.mrf.mxu3 }
 0x153   : > { %v1032_v58 = vadd.f32 %v967_v56, %v8848_v31  ;;  %7038 = vmatmul.msk.bf16.gmra.mxu1 %vm419_vm1, %v8146_v10 }
 0x154   : > { %v812_v18 = vpop.f32.mrf.mxu2  ;;  %v1194_v25 = vpop.f32.mrf.mxu0 }
 0x155   : > { %v9089_v8 = vadd.f32 %v812_v18, %v644_v52  ;;  %v1263_v24 = vadd.f32 %v1194_v25, %v1029_v27  ;;  %v1110_v27 = vrot.slane %v380_v51, 3  ;;  %v9104_v18 = vld [vmem:[%s8604_s6 + $0x54] sm:$0xff] }
 0x156   : > { %v1591_v10 = vrot.slane %v9104_v18, 2 }
 0x157   : > { %v1441_v19 = vadd.f32 %v1372_v46, %v1263_v24  ;;  %6996 = vmatmul.msk.bf16.gmra.mxu3 %vm419_vm1, %v892_v47  ;;  %7016 = vmatmul.msk.bf16.gmra.mxu0 %vm419_vm1, %v1109_v38  ;;  %v893_v47 = vrot.slane %v8615_v12, 3 }
 0x158   : > { %v1374_v56 = vpop.f32.mrf.mxu1 }
 0x159   : > { %7108 = vmatmul.msk.bf16.gmra.mxu2 %vm419_vm1, %v1590_v37  ;;  %v894_v48 = vsel %vm869_vm3, %v891_v30, %v893_v47 }
 0x15a   : > { %v970_v31 = vpop.f32.mrf.mxu3 }
 0x15b   : > { %v1033_v36 = vadd.f32 %v970_v31, %v8871_v44  ;;  %v1112_v44 = vor.u32 %v1111_v50, %v1110_v27 }
 0x15c   : > { %v1662_v43 = vpop.f32.mrf.mxu2  ;;  %v1196_v57 = vpop.f32.mrf.mxu0 }
 0x15d   : > { %v9101_v49 = vadd.f32 %v1662_v43, %v1441_v19  ;;  %v1264_v52 = vadd.f32 %v1196_v57, %v1030_v6  ;;  %v1113_v46 = vsel %vm1065_vm4, %v1108_v9, %v1112_v44  ;;  %v8148_v6 = vld [vmem:[%s8604_s6 + $0x4c] sm:$0xff]   ;;  %v1592_v57 = vsel %vm1571_vm5, %v1589_v21, %v1591_v10 }
 0x15e   : > { %v857_v43 = vld [vmem:[%s8604_s6 + $0x6c] sm:$0x7]  ;;  %v10878_v21 = vshrl.u32 %v8611_v7, 16 }
 0x15f   : > { %v1442_v25 = vadd.f32 %v1374_v56, %v1264_v52 }
 0x160   : > { %v1377_v31 = vpop.f32.mrf.mxu1  ;;  %v1114_v56 = vrot.slane %v10878_v21, 3 }
 0x162   : > { %v972_v38 = vpop.f32.mrf.mxu3 }
 0x163   : > { %v1034_v51 = vadd.f32 %v972_v38, %v8887_v14  ;;  %7039 = vmatmul.msk.bf16.gmra.mxu1 %vm419_vm1, %v8148_v6  ;;  %v866_v14 = vunpack.c.l.b16 %v857_v43 }
 0x164   : > { %v1664_v24 = vpop.f32.mrf.mxu2  ;;  %v1199_v34 = vpop.f32.mrf.mxu0 }
 0x165   : > { %v9112_v37 = vadd.f32 %v1664_v24, %v1442_v25  ;;  %v1265_v19 = vadd.f32 %v1199_v34, %v1031_v4  ;;  %v868_v52 = vpack.c.b16 %v866_v14, %v8638_v32  ;;  %v10879_v25 = vshll.u32 %v8611_v7, 16 }
 0x167   : > { %v1443_v27 = vadd.f32 %v1377_v31, %v1265_v19  ;;  %6997 = vmatmul.msk.bf16.gmra.mxu3 %vm419_vm1, %v894_v48  ;;  %7017 = vmatmul.msk.bf16.gmra.mxu0 %vm419_vm1, %v1113_v46  ;;  %v1115_v38 = vrot.slane %v10879_v25, 4  ;;  %v9129_v46 = vld [vmem:[%s8604_s6 + $0x5c] sm:$0xff]  ;;  %v895_v19 = vrot.slane %v868_v52, 3 }
 0x168   : > { %v1379_v48 = vpop.f32.mrf.mxu1  ;;  %v1593_v43 = vrot.slane %v9129_v46, 2 }
 0x169   : > { %7109 = vmatmul.msk.bf16.gmra.mxu2 %vm419_vm1, %v1592_v57  ;;  %v896_v7 = vsel %vm869_vm3, %v893_v47, %v895_v19 }
 0x16a   : > { %v975_v30 = vpop.f32.mrf.mxu3  ;;  %v1594_v52 = vsel %vm1571_vm5, %v1591_v10, %v1593_v43  ;;  %v10883_v10 = vshll.u32 %v8615_v12, 16 }
 0x16b   : > { %v1035_v9 = vadd.f32 %v975_v30, %v8901_v22  ;;  %v1116_v22 = vor.u32 %v1115_v38, %v1114_v56 }
 0x16c   : > { %v1667_v50 = vpop.f32.mrf.mxu2  ;;  %v1201_v4 = vpop.f32.mrf.mxu0 }
 0x16d   : > { %v9126_v24 = vadd.f32 %v1667_v50, %v1443_v27  ;;  %v1266_v34 = vadd.f32 %v1201_v4, %v1032_v58  ;;  %v1117_v27 = vsel %vm1065_vm4, %v1112_v44, %v1116_v22  ;;  %v8150_v50 = vld [vmem:[%s8604_s6 + $0x54] sm:$0xff]  }
 0x16f   : > { %10880 = vst [vmem:[#allocation8_spill] sm:$0xff] %v9126_v24  ;;  %v1444_v6 = vadd.f32 %v1379_v48, %v1266_v34  ;;  %v1119_v34 = vrot.slane %v10883_v10, 4  ;;  %v1056_v48 = vld [vmem:[%s8604_s6 + $0x6c] sm:$0xf] }
 0x170   : > { %v1382_v21 = vpop.f32.mrf.mxu1 }
 0x172   : > { %v977_v31 = vpop.f32.mrf.mxu3 }
 0x173   : > { %v9133_v57 = vadd.f32 %v977_v31, %v8914_v29  ;;  %7040 = vmatmul.msk.bf16.gmra.mxu1 %vm419_vm1, %v8150_v50 }
 0x174   : > { %v1669_v14 = vpop.f32.mrf.mxu2  ;;  %v1204_v30 = vpop.f32.mrf.mxu0 }
 0x175   : > { %v9138_v58 = vadd.f32 %v1669_v14, %v1444_v6  ;;  %v1267_v4 = vadd.f32 %v1204_v30, %v1033_v36  ;;  %v10882_v36 = vshrl.u32 %v8615_v12, 16  ;;  %v9156_v30 = vld [vmem:[%s8604_s6 + $0x64] sm:$0xff] }
 0x176   : > { %10885 = vst [vmem:[#allocation11_spill] sm:$0xff] %v9156_v30 }
 0x177   : > { %10881 = vst [vmem:[#allocation9_spill] sm:$0xff] %v9138_v58  ;;  %v1445_v56 = vadd.f32 %v1382_v21, %v1267_v4  ;;  %6998 = vmatmul.msk.bf16.gmra.mxu3 %vm419_vm1, %v896_v7  ;;  %7018 = vmatmul.msk.bf16.gmra.mxu0 %vm419_vm1, %v1117_v27  ;;  %v1118_v38 = vrot.slane %v10882_v36, 3  ;;  %v9158_v27 = vunpack.c.l.b16 %v1056_v48  ;;  %v1595_v4 = vrot.slane %v9156_v30, 2  ;;  %v9174_v48 = vld [vmem:[%s8604_s6 + $0x6c] sm:$0xf] }
 0x178   : > { %v1384_v14 = vpop.f32.mrf.mxu1 }
 0x179   : > { %7110 = vmatmul.msk.bf16.gmra.mxu2 %vm419_vm1, %v1594_v52  ;;  %v1064_v12 = vpack.c.b16 %v9158_v27, %v8638_v32 }
 0x17a   : > { %v980_v29 = vpop.f32.mrf.mxu3 }
 0x17b   : > { %v9146_v47 = vadd.f32 %v980_v29, %v8928_v40  ;;  %v1120_v40 = vor.u32 %v1119_v34, %v1118_v38  ;;  %v8151_v29 = vld [vmem:[%s8604_s6 + $0x5c] sm:$0xff]   ;;  %v1596_v38 = vsel %vm1571_vm5, %v1593_v43, %v1595_v4  ;;  %v1126_v34 = vshll.u32 %v1064_v12, 16 }
 0x17c   : > { %v1672_v44 = vpop.f32.mrf.mxu2  ;;  %v1206_v25 = vpop.f32.mrf.mxu0  ;;  %v1780_v43 = vshll.u32 %v8874_v60, 16 }
 0x17d   : > { %v9153_v6 = vadd.f32 %v1672_v44, %v1445_v56  ;;  %v1268_v31 = vadd.f32 %v1206_v25, %v1034_v51  ;;  %v1121_v56 = vsel %vm1065_vm4, %v1116_v22, %v1120_v40  ;;  %v1769_v22 = vshrl.u32 %v8878_v55, 16 }
 0x17f   : > { %10884 = vst [vmem:[#allocation10_spill] sm:$0xff] %v9153_v6  ;;  %v1446_v7 = vadd.f32 %v1384_v14, %v1268_v31  ;;  %v1495_v31 = vld [vmem:[%s8604_s6 + $0x70] sm:$0x3]  ;;  %v1772_v14 = vshll.u32 %v8878_v55, 16 }
 0x180   : > { %v1387_v36 = vpop.f32.mrf.mxu1 }
 0x181   : > { %v1774_v55 = vrot.slane %v1772_v14, 3 }
 0x182   : > { %v982_v50 = vpop.f32.mrf.mxu3 }
 0x183   : > { %v9162_v21 = vadd.f32 %v982_v50, %v8941_v15  ;;  %v1123_v15 = vshrl.u32 %v1064_v12, 16  ;;  %7041 = vmatmul.msk.bf16.gmra.mxu1 %vm419_vm1, %v8151_v29  ;;  %v1556_v50 = vunpack.c.l.b16 %v1495_v31 }
 0x184   : > { %v1674_v52 = vpop.f32.mrf.mxu2  ;;  %v1209_v51 = vpop.f32.mrf.mxu0 }
 0x185   : > { %v9168_v44 = vadd.f32 %v1674_v52, %v1446_v7  ;;  %v1269_v25 = vadd.f32 %v1209_v51, %v1035_v9  ;;  %v1777_v9 = vshrl.u32 %v8874_v60, 16  ;;  %v10873_v7 = vunpack.c.l.b16 %v9174_v48 }
 0x186   : > { %v1125_v52 = vrot.slane %v1123_v15, 3  ;;  %v1128_v51 = vrot.slane %v1126_v34, 4 }
 0x187   : > { %10886 = vst [vmem:[#allocation12_spill] sm:$0xff] %v9168_v44  ;;  %v1447_v10 = vadd.f32 %v1387_v36, %v1269_v25  ;;  %6999 = vmatmul.msk.bf16.gmra.mxu3 %vm419_vm1, %v895_v19  ;;  %7019 = vmatmul.msk.bf16.gmra.mxu0 %vm419_vm1, %v1121_v56  ;;  %v1771_v25 = vrot.slane %v1769_v22, 2  ;;  %v1779_v36 = vrot.slane %v1777_v9, 2  ;;  %v1782_v44 = vrot.slane %v1780_v43, 3 }
 0x188   : > { %v1389_v30 = vpop.f32.mrf.mxu1  ;;  %v9192_v31 = vpack.c.b16 %v1556_v50, %v10873_v7 }
 0x189   : > { %7111 = vmatmul.msk.bf16.gmra.mxu2 %vm419_vm1, %v1596_v38  ;;  %v1775_v34 = vor.u32 %v1774_v55, %v1771_v25  ;;  %v1783_v24 = vor.u32 %v1782_v44, %v1779_v36 }
 0x18a   : > { %v985_v19 = vpop.f32.mrf.mxu3  ;;  %v1597_v14 = vrot.slane %v9192_v31, 2 }
 0x18b   : > { %v9185_v12 = vadd.f32 %v985_v19, %v8955_v11  ;;  %v1129_v11 = vor.u32 %v1128_v51, %v1125_v52  ;;  %v8399_v19 = vld [vmem:[%s8604_s6 + $0x60] sm:$0xff]  }
 0x18c   : > { %v1677_v56 = vpop.f32.mrf.mxu2  ;;  %v1211_v29 = vpop.f32.mrf.mxu0  ;;  %v7924_v15 = vunpack.c.h.b16 %v8399_v19 }
 0x18d   : > { %v9187_v6 = vadd.f32 %v1677_v56, %v1447_v10  ;;  %v1270_v38 = vadd.f32 %v1211_v29, %v9133_v57  ;;  %v1130_v43 = vsel %vm1065_vm4, %v1120_v40, %v1129_v11  ;;  %v1598_v56 = vsel %vm1571_vm5, %v1595_v4, %v1597_v14 }
 0x18e   : > { %v1307_v50 = vpack.c.b16 %v8638_v32, %v7924_v15  ;;  %v1786_v32 = vshrl.u32 %v8904_v3, 16  ;;  %v1789_v40 = vshll.u32 %v8904_v3, 16 }
 0x18f   : > { %v1448_v58 = vadd.f32 %v1389_v30, %v1270_v38  ;;  %v1784_v30 = vsel %vm1767_vm6, %v1775_v34, %v1783_v24  ;;  %v2247_v34 = vld [vmem:[%s8604_s6 + $0x10] sm:$0xc] }
 0x190   : > { %v1392_v44 = vpop.f32.mrf.mxu1  ;;  %v1788_v36 = vrot.slane %v1786_v32, 2  ;;  %v1791_v38 = vrot.slane %v1789_v40, 3 }
 0x192   : > { %v987_v22 = vpop.f32.mrf.mxu3 }
 0x193   : > { %v9197_v10 = vadd.f32 %v987_v22, %v8965_v0  ;;  %v7804_v0 = vld [vmem:[#allocation2 + $0xb8] sm:$0xff]  ;;  %7042 = vmatmul.msk.bf16.gmra.mxu1 %vm419_vm1, %v1307_v50 }
 0x194   : > { %v1679_v9 = vpop.f32.mrf.mxu2  ;;  %v1214_v57 = vpop.f32.mrf.mxu0  ;;  %2925 = vmatpush.bf16.msrb.mxu3 %v7804_v0 }
 0x195   : > { %v9202_v52 = vadd.f32 %v1679_v9, %v1448_v58  ;;  %v1271_v51 = vadd.f32 %v1214_v57, %v9146_v47  ;;  %v7810_v58 = vld [vmem:[#allocation2 + $0xe8] sm:$0xff]  ;;  %v9220_v9 = vld [vmem:[%s8604_s6 + $0x14] sm:$0xf] }
 0x196   : > { %3703 = vmatpush.bf16.msrb.mxu2 %v7810_v58  ;;  %v7806_v57 = vld [vmem:[#allocation2 + $0xc8] sm:$0xff] }
 0x197   : > { %v1449_v29 = vadd.f32 %v1392_v44, %v1271_v51  ;;  %7020 = vmatmul.msk.bf16.gmra.mxu0 %vm419_vm1, %v1130_v43  ;;  %7122 = vmatmul.msk.bf16.vlgmr.msra.gmra.mxu3 %vm419_vm1, %v1784_v30  ;;  %v7808_v43 = vld [vmem:[#allocation2 + $0xd8] sm:$0xff]  ;;  %v2308_v30 = vunpack.c.l.b16 %v2247_v34  ;;  %v10872_v51 = vunpack.c.l.b16 %v9220_v9 }
 0x198   : > { %v1394_v15 = vpop.f32.mrf.mxu1  ;;  %3214 = vmatpush.bf16.msrb.mxu0 %v7806_v57  ;;  %3508 = vmatpush.bf16.msrb.mxu1 %v7808_v43 }
 0x199   : > { %7112 = vmatmul.msk.bf16.gmra.mxu2 %vm419_vm1, %v1598_v56 }
 0x19a   : > { %v990_v47 = vpop.f32.mrf.mxu3 }
 0x19b   : > { %v9213_v4 = vadd.f32 %v990_v47, %v8979_v35  ;;  %v1792_v35 = vor.u32 %v1791_v38, %v1788_v36  ;;  %v2052_v47 = vld [vmem:[%s8604_s6 + $0x4] sm:$0x8] }
 0x19c   : > { %v1682_v25 = vpop.f32.mrf.mxu2  ;;  %v1216_v55 = vpop.f32.mrf.mxu0  ;;  %v2059_v36 = vunpack.c.l.b16 %v2052_v47 }
 0x19d   : > { %v9215_v31 = vadd.f32 %v1682_v25, %v1449_v29  ;;  %v1272_v19 = vadd.f32 %v1216_v55, %v9162_v21  ;;  %v1308_v29 = vpack.c.b16 %v9158_v27, %v9158_v27  ;;  %v1793_v0 = vsel %vm1767_vm6, %v1783_v24, %v1792_v35  ;;  %v9234_v25 = vld [vmem:[%s8604_s6 + $0x18] sm:$0xff] }
 0x19e   : > { %v2336_v55 = vpack.c.b16 %v10872_v51, %v2308_v30  ;;  %v1795_v24 = vshrl.u32 %v8931_v20, 16  ;;  %v1798_v27 = vshll.u32 %v8931_v20, 16  ;;  %v2557_v34 = vshll.u32 %v9234_v25, 16 }
 0x19f   : > { %v1450_v22 = vadd.f32 %v1394_v15, %v1272_v19  ;;  %v2554_v15 = vshrl.u32 %v9234_v25, 16  ;;  %v10887_v30 = vunpack.c.l.b16 %v8857_v61 }
 0x1a0   : > { %v1397_v58 = vpop.f32.mrf.mxu1  ;;  %v2546_v38 = vshrl.u32 %v2336_v55, 16  ;;  %v2549_v19 = vshll.u32 %v2336_v55, 16  ;;  %v1797_v43 = vrot.slane %v1795_v24, 2  ;;  %v2559_v47 = vrot.slane %v2557_v34, 3 }
 0x1a1   : > { %v2350_v24 = vrot.slane %v2336_v55, 2 }
 0x1a2   : > { %v992_v50 = vpop.f32.mrf.mxu3 }
 0x1a3   : > { %v9224_v44 = vadd.f32 %v992_v50, %v8992_v5  ;;  %7043 = vmatmul.msk.bf16.gmra.mxu1 %vm419_vm1, %v1308_v29  ;;  %v1800_v50 = vrot.slane %v1798_v27, 3  ;;  %v2351_v27 = vrot.slane %v9234_v25, 2 }
 0x1a4   : > { %v1684_v21 = vpop.f32.mrf.mxu2  ;;  %v1219_v56 = vpop.f32.mrf.mxu0 }
 0x1a5   : > { %v9229_v32 = vadd.f32 %v1684_v21, %v1450_v22  ;;  %v1273_v40 = vadd.f32 %v1219_v56, %v9185_v12  ;;  %v2060_v21 = vpack.c.b16 %v10887_v30, %v2059_v36  ;;  %v1801_v7 = vor.u32 %v1800_v50, %v1797_v43  ;;  %v9267_v50 = vld [vmem:[%s8604_s6 + $0x20] sm:$0xff] }
 0x1a6   : > { %v2352_v55 = vsel %vm1571_vm5, %v2350_v24, %v2351_v27 }
 0x1a7   : > { %v1451_v5 = vadd.f32 %v1397_v58, %v1273_v40  ;;  %7021 = vmatmul.msk.bf16.gmra.mxu0 %vm419_vm1, %v1129_v11  ;;  %7123 = vmatmul.msk.bf16.gmra.mxu3 %vm419_vm1, %v1793_v0  ;;  %v2548_v0 = vrot.slane %v2546_v38, 2  ;;  %v2551_v40 = vrot.slane %v2549_v19, 3  ;;  %v2556_v58 = vrot.slane %v2554_v15, 2 }
 0x1a8   : > { %v1399_v29 = vpop.f32.mrf.mxu1  ;;  %v1802_v19 = vsel %vm1767_vm6, %v1792_v35, %v1801_v7  ;;  %v1807_v35 = vshll.u32 %v8958_v17, 16 }
 0x1a9   : > { %7113 = vmatmul.msk.bf16.gmra.mxu2 %vm419_vm1, %v1597_v14  ;;  %v2552_v36 = vor.u32 %v2551_v40, %v2548_v0 }
 0x1aa   : > { %v995_v12 = vpop.f32.mrf.mxu3 }
 0x1ab   : > { %v9247_v11 = vadd.f32 %v995_v12, %v9006_v33  ;;  %v2061_v33 = vrot.slane %v2060_v21, 3  ;;  %v2062_v12 = vrot.slane %v8874_v60, 3  ;;  %v2566_v21 = vshll.u32 %v9267_v50, 16 }
 0x1ac   : > { %v1687_v22 = vpop.f32.mrf.mxu2  ;;  %v1221_v57 = vpop.f32.mrf.mxu0 }
 0x1ad   : > { %v9251_v56 = vadd.f32 %v1687_v22, %v1451_v5  ;;  %v1274_v14 = vadd.f32 %v1221_v57, %v9197_v10  ;;  %v2560_v5 = vor.u32 %v2559_v47, %v2556_v58  ;;  %v2063_v15 = vsel %vm869_vm3, %v2061_v33, %v2062_v12 }
 0x1ae   : > { %v1809_v58 = vrot.slane %v1807_v35, 3 }
 0x1af   : > { %v1452_v51 = vadd.f32 %v1399_v29, %v1274_v14  ;;  %v2561_v43 = vsel %vm1767_vm6, %v2552_v36, %v2560_v5  ;;  %v2568_v36 = vrot.slane %v2566_v21, 3  ;;  %v9294_v21 = vld [vmem:[%s8604_s6 + $0x28] sm:$0xff] }
 0x1b0   : > { %v1402_v57 = vpop.f32.mrf.mxu1 }
 0x1b2   : > { %v997_v61 = vpop.f32.mrf.mxu3 }
 0x1b3   : > { %v9257_v22 = vadd.f32 %v997_v61, %v9019_v45  ;;  %7214 = vmatmul.msk.bf16.vlgmr.msra.gmra.mxu1 %vm419_vm1, %v2352_v55  ;;  %v1804_v45 = vshrl.u32 %v8958_v17, 16 }
 0x1b4   : > { %v1689_v10 = vpop.f32.mrf.mxu2  ;;  %v1224_v38 = vpop.f32.mrf.mxu0 }
 0x1b5   : > { %v9261_v34 = vadd.f32 %v1689_v10, %v1452_v51  ;;  %v1275_v60 = vadd.f32 %v1224_v38, %v9213_v4  ;;  %v2563_v51 = vshrl.u32 %v9267_v50, 16  ;;  %v1806_v40 = vrot.slane %v1804_v45, 2 }
 0x1b7   : > { %v1453_v30 = vadd.f32 %v1402_v57, %v1275_v60  ;;  %7124 = vmatmul.msk.bf16.gmra.mxu3 %vm419_vm1, %v1802_v19  ;;  %7144 = vmatmul.msk.bf16.vlgmr.msra.gmra.mxu0 %vm419_vm1, %v2063_v15  ;;  %v2565_v61 = vrot.slane %v2563_v51, 2  ;;  %v1810_v38 = vor.u32 %v1809_v58, %v1806_v40  ;;  %v2064_v19 = vrot.slane %v8904_v3, 3 }
 0x1b8   : > { %v1404_v24 = vpop.f32.mrf.mxu1  ;;  %v2353_v15 = vrot.slane %v9267_v50, 2 }
 0x1b9   : > { %7236 = vmatmul.msk.bf16.vlgmr.msra.gmra.mxu2 %vm419_vm1, %v2561_v43 }
 0x1ba   : > { %v1000_v4 = vpop.f32.mrf.mxu3  ;;  %v2354_v3 = vsel %vm1571_vm5, %v2351_v27, %v2353_v15  ;;  %v2575_v27 = vshll.u32 %v9294_v21, 16 }
 0x1bb   : > { %v1045_v14 = vadd.f32 %v1000_v4, %v9033_v42  ;;  %v2569_v42 = vor.u32 %v2568_v36, %v2565_v61 }
 0x1bc   : > { %v1692_v29 = vpop.f32.mrf.mxu2  ;;  %v1226_v0 = vpop.f32.mrf.mxu0 }
 0x1bd   : > { %v9278_v47 = vadd.f32 %v1692_v29, %v1453_v30  ;;  %v1276_v33 = vadd.f32 %v1226_v0, %v9224_v44  ;;  %v1811_v30 = vsel %vm1767_vm6, %v1801_v7, %v1810_v38  ;;  %v2065_v44 = vsel %vm869_vm3, %v2062_v12, %v2064_v19 }
 0x1be   : > { %v2570_v51 = vsel %vm1767_vm6, %v2560_v5, %v2569_v42  ;;  %v1816_v7 = vshll.u32 %v8982_v13, 16  ;;  %v2572_v12 = vshrl.u32 %v9294_v21, 16 }
 0x1bf   : > { %v1454_v10 = vadd.f32 %v1404_v24, %v1276_v33 }
 0x1c0   : > { %v1407_v4 = vpop.f32.mrf.mxu1  ;;  %v1818_v33 = vrot.slane %v1816_v7, 3 }
 0x1c2   : > { %v1002_v60 = vpop.f32.mrf.mxu3 }
 0x1c3   : > { %v9284_v57 = vadd.f32 %v1002_v60, %v9043_v2  ;;  %7215 = vmatmul.msk.bf16.gmra.mxu1 %vm419_vm1, %v2354_v3  ;;  %v1813_v2 = vshrl.u32 %v8982_v13, 16  ;;  %v2577_v60 = vrot.slane %v2575_v27, 3  ;;  %v9320_v27 = vld [vmem:[%s8604_s6 + $0x30] sm:$0xff] }
 0x1c4   : > { %v1694_v55 = vpop.f32.mrf.mxu2  ;;  %v1229_v43 = vpop.f32.mrf.mxu0 }
 0x1c5   : > { %v9288_v45 = vadd.f32 %v1694_v55, %v1454_v10  ;;  %v1277_v35 = vadd.f32 %v1229_v43, %v9247_v11  ;;  %v1815_v58 = vrot.slane %v1813_v2, 2  ;;  %v2574_v10 = vrot.slane %v2572_v12, 2 }
 0x1c7   : > { %v1455_v29 = vadd.f32 %v1407_v4, %v1277_v35  ;;  %7125 = vmatmul.msk.bf16.gmra.mxu3 %vm419_vm1, %v1811_v30  ;;  %7145 = vmatmul.msk.bf16.gmra.mxu0 %vm419_vm1, %v2065_v44  ;;  %v1819_v43 = vor.u32 %v1818_v33, %v1815_v58  ;;  %v2066_v30 = vrot.slane %v8931_v20, 3  ;;  %v2355_v44 = vrot.slane %v9294_v21, 2 }
 0x1c8   : > { %v1409_v36 = vpop.f32.mrf.mxu1 }
 0x1c9   : > { %7237 = vmatmul.msk.bf16.gmra.mxu2 %vm419_vm1, %v2570_v51  ;;  %v2356_v12 = vsel %vm1571_vm5, %v2353_v15, %v2355_v44  ;;  %v2584_v15 = vshll.u32 %v9320_v27, 16 }
 0x1ca   : > { %v1005_v11 = vpop.f32.mrf.mxu3 }
 0x1cb   : > { %v1047_v5 = vadd.f32 %v1005_v11, %v9055_v28  ;;  %v2578_v28 = vor.u32 %v2577_v60, %v2574_v10 }
 0x1cc   : > { %v1697_v0 = vpop.f32.mrf.mxu2  ;;  %v1231_v40 = vpop.f32.mrf.mxu0 }
 0x1cd   : > { %v9305_v24 = vadd.f32 %v1697_v0, %v1455_v29  ;;  %v1278_v61 = vadd.f32 %v1231_v40, %v9257_v22  ;;  %v1820_v29 = vsel %vm1767_vm6, %v1810_v38, %v1819_v43  ;;  %v2067_v22 = vsel %vm869_vm3, %v2064_v19, %v2066_v30 }
 0x1ce   : > { %v2579_v20 = vsel %vm1767_vm6, %v2569_v42, %v2578_v28  ;;  %v1825_v38 = vshll.u32 %v9009_v1, 16  ;;  %v2581_v19 = vshrl.u32 %v9320_v27, 16 }
 0x1cf   : > { %v1456_v55 = vadd.f32 %v1409_v36, %v1278_v61 }
 0x1d0   : > { %v1412_v11 = vpop.f32.mrf.mxu1  ;;  %v1827_v61 = vrot.slane %v1825_v38, 3 }
 0x1d2   : > { %v1007_v35 = vpop.f32.mrf.mxu3 }
 0x1d3   : > { %v9311_v4 = vadd.f32 %v1007_v35, %v9066_v59  ;;  %7216 = vmatmul.msk.bf16.gmra.mxu1 %vm419_vm1, %v2356_v12  ;;  %v1822_v59 = vshrl.u32 %v9009_v1, 16  ;;  %v2586_v35 = vrot.slane %v2584_v15, 3  ;;  %v9346_v15 = vld [vmem:[%s8604_s6 + $0x38] sm:$0xff] }
 0x1d4   : > { %v1699_v3 = vpop.f32.mrf.mxu2  ;;  %v1234_v51 = vpop.f32.mrf.mxu0 }
 0x1d5   : > { %v9315_v2 = vadd.f32 %v1699_v3, %v1456_v55  ;;  %v1279_v7 = vadd.f32 %v1234_v51, %v1045_v14  ;;  %v1824_v33 = vrot.slane %v1822_v59, 2  ;;  %v2583_v55 = vrot.slane %v2581_v19, 2 }
 0x1d7   : > { %v1457_v0 = vadd.f32 %v1412_v11, %v1279_v7  ;;  %7126 = vmatmul.msk.bf16.gmra.mxu3 %vm419_vm1, %v1820_v29  ;;  %7146 = vmatmul.msk.bf16.gmra.mxu0 %vm419_vm1, %v2067_v22  ;;  %v1828_v51 = vor.u32 %v1827_v61, %v1824_v33  ;;  %v2068_v29 = vrot.slane %v8958_v17, 3  ;;  %v2357_v22 = vrot.slane %v9320_v27, 2 }
 0x1d8   : > { %v1414_v60 = vpop.f32.mrf.mxu1 }
 0x1d9   : > { %7238 = vmatmul.msk.bf16.gmra.mxu2 %vm419_vm1, %v2579_v20  ;;  %v2358_v19 = vsel %vm1571_vm5, %v2355_v44, %v2357_v22  ;;  %v2593_v44 = vshll.u32 %v9346_v15, 16 }
 0x1da   : > { %v1010_v14 = vpop.f32.mrf.mxu3 }
 0x1db   : > { %v1049_v42 = vadd.f32 %v1010_v14, %v9078_v39  ;;  %v2587_v39 = vor.u32 %v2586_v35, %v2583_v55 }
 0x1dc   : > { %v1702_v40 = vpop.f32.mrf.mxu2  ;;  %v1236_v58 = vpop.f32.mrf.mxu0 }
 0x1dd   : > { %v9331_v36 = vadd.f32 %v1702_v40, %v1457_v0  ;;  %v1280_v10 = vadd.f32 %v1236_v58, %v9284_v57  ;;  %v1829_v0 = vsel %vm1767_vm6, %v1819_v43, %v1828_v51  ;;  %v2069_v57 = vsel %vm869_vm3, %v2066_v30, %v2068_v29 }
 0x1de   : > { %v2588_v17 = vsel %vm1767_vm6, %v2578_v28, %v2587_v39  ;;  %v1834_v43 = vshll.u32 %v9036_v26, 16  ;;  %v2590_v30 = vshrl.u32 %v9346_v15, 16 }
 0x1df   : > { %v1458_v3 = vadd.f32 %v1414_v60, %v1280_v10 }
 0x1e0   : > { %v1417_v14 = vpop.f32.mrf.mxu1  ;;  %v1836_v10 = vrot.slane %v1834_v43, 3 }
 0x1e2   : > { %v1012_v7 = vpop.f32.mrf.mxu3 }
 0x1e3   : > { %v9337_v11 = vadd.f32 %v1012_v7, %v9089_v8  ;;  %7217 = vmatmul.msk.bf16.gmra.mxu1 %vm419_vm1, %v2358_v19  ;;  %v1831_v8 = vshrl.u32 %v9036_v26, 16  ;;  %v2595_v26 = vrot.slane %v2593_v44, 3 }
 0x1e4   : > { %v1704_v12 = vpop.f32.mrf.mxu2  ;;  %v1239_v20 = vpop.f32.mrf.mxu0 }
 0x1e5   : > { %v9341_v59 = vadd.f32 %v1704_v12, %v1458_v3  ;;  %v1281_v38 = vadd.f32 %v1239_v20, %v1047_v5  ;;  %v1833_v61 = vrot.slane %v1831_v8, 2  ;;  %v2592_v3 = vrot.slane %v2590_v30, 2  ;;  %v9372_v30 = vld [vmem:[%s8604_s6 + $0x40] sm:$0xff] }
 0x1e6   : > { %v2070_v20 = vrot.slane %v8982_v13, 3 }
 0x1e7   : > { %v1459_v40 = vadd.f32 %v1417_v14, %v1281_v38  ;;  %7127 = vmatmul.msk.bf16.gmra.mxu3 %vm419_vm1, %v1829_v0  ;;  %7147 = vmatmul.msk.bf16.gmra.mxu0 %vm419_vm1, %v2069_v57  ;;  %v1837_v12 = vor.u32 %v1836_v10, %v1833_v61  ;;  %v2359_v0 = vrot.slane %v9346_v15, 2 }
 0x1e8   : > { %v1419_v35 = vpop.f32.mrf.mxu1 }
 0x1e9   : > { %7239 = vmatmul.msk.bf16.gmra.mxu2 %vm419_vm1, %v2588_v17  ;;  %v1838_v17 = vsel %vm1767_vm6, %v1828_v51, %v1837_v12  ;;  %v1843_v51 = vshll.u32 %v9058_v41, 16 }
 0x1ea   : > { %v1015_v5 = vpop.f32.mrf.mxu3 }
 0x1eb   : > { %v1051_v28 = vadd.f32 %v1015_v5, %v8973_v53  ;;  %v2596_v53 = vor.u32 %v2595_v26, %v2592_v3  ;;  %v2360_v5 = vsel %vm1571_vm5, %v2357_v22, %v2359_v0  ;;  %v2602_v22 = vshll.u32 %v9372_v30, 16 }
 0x1ec   : > { %v1707_v58 = vpop.f32.mrf.mxu2  ;;  %v1241_v33 = vpop.f32.mrf.mxu0  ;;  %v1845_v10 = vrot.slane %v1843_v51, 3 }
 0x1ed   : > { %v9357_v60 = vadd.f32 %v1707_v58, %v1459_v40  ;;  %v1282_v55 = vadd.f32 %v1241_v33, %v9311_v4  ;;  %v2071_v4 = vsel %vm869_vm3, %v2068_v29, %v2070_v20  ;;  %v2597_v13 = vsel %vm1767_vm6, %v2587_v39, %v2596_v53 }
 0x1ee   : > { %v2599_v29 = vshrl.u32 %v9372_v30, 16  ;;  %v2604_v26 = vrot.slane %v2602_v22, 3 }
 0x1ef   : > { %v1460_v7 = vadd.f32 %v1419_v35, %v1282_v55 }
 0x1f0   : > { %v1422_v43 = vpop.f32.mrf.mxu1 }
 0x1f2   : > { %v1017_v57 = vpop.f32.mrf.mxu3 }
 0x1f3   : > { %v9363_v38 = vadd.f32 %v1017_v57, %v8987_v62  ;;  %7218 = vmatmul.msk.bf16.gmra.mxu1 %vm419_vm1, %v2360_v5  ;;  %v1840_v62 = vshrl.u32 %v9058_v41, 16  ;;  %v2601_v41 = vrot.slane %v2599_v29, 2 }
 0x1f4   : > { %v1709_v14 = vpop.f32.mrf.mxu2  ;;  %v1244_v19 = vpop.f32.mrf.mxu0 }
 0x1f5   : > { %v9367_v40 = vadd.f32 %v1709_v14, %v1460_v7  ;;  %v1283_v8 = vadd.f32 %v1244_v19, %v1049_v42  ;;  %v1842_v61 = vrot.slane %v1840_v62, 2  ;;  %v2072_v14 = vrot.slane %v9009_v1, 3 }
 0x1f6   : > { %v2361_v19 = vrot.slane %v9372_v30, 2 }
 0x1f7   : > { %v1461_v44 = vadd.f32 %v1422_v43, %v1283_v8  ;;  %7128 = vmatmul.msk.bf16.gmra.mxu3 %vm419_vm1, %v1838_v17  ;;  %7148 = vmatmul.msk.bf16.gmra.mxu0 %vm419_vm1, %v2071_v4  ;;  %v1846_v57 = vor.u32 %v1845_v10, %v1842_v61  ;;  %v2605_v17 = vor.u32 %v2604_v26, %v2601_v41  ;;  %v7805_v26 = vld [vmem:[#allocation2 + $0xc0] sm:$0xff] }
 0x1f8   : > { %v1424_v3 = vpop.f32.mrf.mxu1  ;;  %v2362_v51 = vsel %vm1571_vm5, %v2359_v0, %v2361_v19  ;;  %3215 = vmatpush.bf16.msrb.mxu0 %v7805_v26 }
 0x1f9   : > { %7240 = vmatmul.msk.bf16.gmra.mxu2 %vm419_vm1, %v2597_v13  ;;  %v1847_v5 = vsel %vm1767_vm6, %v1837_v12, %v1846_v57  ;;  %v2606_v1 = vsel %vm1767_vm6, %v2596_v53, %v2605_v17  ;;  %v1849_v12 = vshrl.u32 %v9081_v54, 16 }
 0x1fa   : > { %v1020_v42 = vpop.f32.mrf.mxu3 }
 0x1fb   : > { %v9383_v39 = vadd.f32 %v1020_v42, %v9000_v63  ;;  %v9400_v42 = vld [vmem:[%s8604_s6 + $0x48] sm:$0xff]  ;;  %v1851_v10 = vrot.slane %v1849_v12, 2 }
 0x1fc   : > { %v1712_v58 = vpop.f32.mrf.mxu2  ;;  %v1246_v33 = vpop.f32.mrf.mxu0  ;;  %v2608_v53 = vshrl.u32 %v9400_v42, 16  ;;  %v2611_v22 = vshll.u32 %v9400_v42, 16 }
 0x1fd   : > { %v9385_v55 = vadd.f32 %v1712_v58, %v1461_v44  ;;  %v1284_v35 = vadd.f32 %v1246_v33, %v9337_v11  ;;  %v2073_v11 = vsel %vm869_vm3, %v2070_v20, %v2072_v14  ;;  %v1852_v20 = vshll.u32 %v9081_v54, 16 }
 0x1ff   : > { %v1462_v7 = vadd.f32 %v1424_v3, %v1284_v35  ;;  %v1854_v35 = vrot.slane %v1852_v20, 3 }
 0x200   : > { %v1427_v62 = vpop.f32.mrf.mxu1 }
 0x202   : > { %v1022_v63 = vpop.f32.mrf.mxu3 }
 0x203   : > { %v9391_v4 = vadd.f32 %v1022_v63, %v9014_v23  ;;  %v7803_v23 = vld [vmem:[#allocation2 + $0xb0] sm:$0xff]  ;;  %7219 = vmatmul.msk.bf16.gmra.mxu1 %vm419_vm1, %v2362_v51  ;;  %v2610_v63 = vrot.slane %v2608_v53, 2 }
 0x204   : > { %v1714_v8 = vpop.f32.mrf.mxu2  ;;  %v1249_v43 = vpop.f32.mrf.mxu0  ;;  %2926 = vmatpush.bf16.msrb.mxu3 %v7803_v23 }
 0x205   : > { %v9395_v13 = vadd.f32 %v1714_v8, %v1462_v7  ;;  %v1285_v44 = vadd.f32 %v1249_v43, %v1051_v28  ;;  %v7809_v28 = vld [vmem:[#allocation2 + $0xe0] sm:$0xff]  ;;  %v7807_v7 = vld [vmem:[#allocation2 + $0xd0] sm:$0xff]  ;;  %v2613_v8 = vrot.slane %v2611_v22, 3 }
 0x206   : > { %3704 = vmatpush.bf16.msrb.mxu2 %v7809_v28  ;;  %3509 = vmatpush.bf16.msrb.mxu1 %v7807_v7  ;;  %v9426_v22 = vld [vmem:[%s8604_s6 + $0x50] sm:$0xff] }
 0x207   : > { %v1463_v29 = vadd.f32 %v1427_v62, %v1285_v44  ;;  %7129 = vmatmul.msk.bf16.gmra.mxu3 %vm419_vm1, %v1847_v5  ;;  %7149 = vmatmul.msk.bf16.gmra.mxu0 %vm419_vm1, %v2073_v11  ;;  %v8400_v5 = vld [vmem:[%s8604_s6 + $0x3c] sm:$0xff]  ;;  %v2363_v44 = vrot.slane %v9400_v42, 2  ;;  %v2614_v51 = vor.u32 %v2613_v8, %v2610_v63 }
 0x208   : > { %v1429_v41 = vpop.f32.mrf.mxu1  ;;  %v2074_v11 = vrot.slane %v8400_v5, 3 }
 0x209   : > { %7241 = vmatmul.msk.bf16.gmra.mxu2 %vm419_vm1, %v2606_v1  ;;  %v2615_v53 = vsel %vm1767_vm6, %v2605_v17, %v2614_v51  ;;  %v2620_v17 = vshll.u32 %v9426_v22, 16 }
 0x20a   : > { %v1025_v0 = vpop.f32.mrf.mxu3  ;;  %v2075_v23 = vsel %vm869_vm3, %v2072_v14, %v2074_v11  ;;  %v1861_v14 = vshll.u32 %v9104_v18, 16 }
 0x20b   : > { %v9411_v58 = vadd.f32 %v1025_v0, %v9027_v16  ;;  %v1855_v16 = vor.u32 %v1854_v35, %v1851_v10  ;;  %v2364_v0 = vsel %vm1571_vm5, %v2361_v19, %v2363_v44  ;;  %v2617_v19 = vshrl.u32 %v9426_v22, 16 }
 0x20c   : > { %v1717_v33 = vpop.f32.mrf.mxu2  ;;  %v1251_v61 = vpop.f32.mrf.mxu0  ;;  %v2622_v8 = vrot.slane %v2620_v17, 3 }
 0x20d   : > { %v9413_v3 = vadd.f32 %v1717_v33, %v1463_v29  ;;  %v1286_v54 = vadd.f32 %v1251_v61, %v9363_v38  ;;  %v1856_v38 = vsel %vm1767_vm6, %v1846_v57, %v1855_v16  ;;  %v1858_v57 = vshrl.u32 %v9104_v18, 16 }
 0x20e   : > { %v2619_v18 = vrot.slane %v2617_v19, 2  ;;  %v9453_v19 = vld [vmem:[%s8604_s6 + $0x58] sm:$0xff] }
 0x20f   : > { %v1464_v43 = vadd.f32 %v1429_v41, %v1286_v54  ;;  %v1860_v54 = vrot.slane %v1858_v57, 2  ;;  %v1863_v41 = vrot.slane %v1861_v14, 3 }
 0x210   : > { %v1432_v28 = vpop.f32.mrf.mxu1 }
 0x211   : > { %v1864_v5 = vor.u32 %v1863_v41, %v1860_v54 }
 0x212   : > { %v1027_v62 = vpop.f32.mrf.mxu3 }
 0x213   : > { %7220 = vmatmul.msk.bf16.gmra.mxu1 %vm419_vm1, %v2364_v0  ;;  %v8401_v62 = vld [vmem:[%s8604_s6 + $0x44] sm:$0xff]  ;;  %v1865_v0 = vsel %vm1767_vm6, %v1855_v16, %v1864_v5  ;;  %v1870_v16 = vshll.u32 %v9129_v46, 16 }
 0x214   : > { %v1719_v1 = vpop.f32.mrf.mxu2  ;;  %v1254_v29 = vpop.f32.mrf.mxu0 }
 0x215   : > { %v9420_v12 = vadd.f32 %v1719_v1, %v1464_v43  ;;  %v1287_v20 = vadd.f32 %v1254_v29, %v9383_v39  ;;  %v2076_v1 = vrot.slane %v8401_v62, 3  ;;  %v2365_v29 = vrot.slane %v9426_v22, 2  ;;  %v8402_v62 = vld [vmem:[%s8604_s6 + $0x4c] sm:$0xff] }
 0x217   : > { %v1465_v33 = vadd.f32 %v1432_v28, %v1287_v20  ;;  %7130 = vmatmul.msk.bf16.gmra.mxu3 %vm419_vm1, %v1856_v38  ;;  %7150 = vmatmul.msk.bf16.gmra.mxu0 %vm419_vm1, %v2075_v23  ;;  %v2366_v14 = vsel %vm1571_vm5, %v2363_v44, %v2365_v29  ;;  %v2629_v44 = vshll.u32 %v9453_v19, 16 }
 0x218   : > { %v1434_v63 = vpop.f32.mrf.mxu1 }
 0x219   : > { %7242 = vmatmul.msk.bf16.gmra.mxu2 %vm419_vm1, %v2615_v53 }
 0x21a   : > { %v1956_v39 = vpop.f32.mrf.mxu3 }
 0x21b   : > { %v2025_v61 = vadd.f32 %v1956_v39, %v9101_v49  ;;  %v2623_v49 = vor.u32 %v2622_v8, %v2619_v18 }
 0x21c   : > { %v1722_v10 = vpop.f32.mrf.mxu2  ;;  %v1256_v35 = vpop.f32.mrf.mxu0 }
 0x21d   : > { %v9437_v26 = vadd.f32 %v1722_v10, %v1465_v33  ;;  %v1288_v7 = vadd.f32 %v1256_v35, %v9391_v4  ;;  %v2077_v4 = vsel %vm869_vm3, %v2074_v11, %v2076_v1  ;;  %v2624_v39 = vsel %vm1767_vm6, %v2614_v51, %v2623_v49  ;;  %v10888_v51 = vld [vmem:[#allocation8_spill] sm:$0xff] }
 0x21e   : > { %v2626_v11 = vshrl.u32 %v9453_v19, 16 }
 0x21f   : > { %v1466_v43 = vadd.f32 %v1434_v63, %v1288_v7  ;;  %v1872_v7 = vrot.slane %v1870_v16, 3 }
 0x220   : > { %v1437_v57 = vpop.f32.mrf.mxu1  ;;  %v2628_v8 = vrot.slane %v2626_v11, 2 }
 0x222   : > { %v1958_v38 = vpop.f32.mrf.mxu3 }
 0x223   : > { %v9443_v23 = vadd.f32 %v1958_v38, %v9112_v37  ;;  %7221 = vmatmul.msk.bf16.gmra.mxu1 %vm419_vm1, %v2366_v14  ;;  %v1867_v37 = vshrl.u32 %v9129_v46, 16  ;;  %v2078_v38 = vrot.slane %v8402_v62, 3  ;;  %v1758_v62 = vld [vmem:[%s8604_s6 + $0x70] sm:$0x7] }
 0x224   : > { %v1724_v20 = vpop.f32.mrf.mxu2  ;;  %v1259_v28 = vpop.f32.mrf.mxu0 }
 0x225   : > { %v9447_v53 = vadd.f32 %v1724_v20, %v1466_v43  ;;  %v1289_v33 = vadd.f32 %v1259_v28, %v9411_v58  ;;  %v1869_v41 = vrot.slane %v1867_v37, 2  ;;  %v2631_v43 = vrot.slane %v2629_v44, 3  ;;  %v9476_v44 = vld [vmem:[%s8604_s6 + $0x60] sm:$0xff] }
 0x226   : > { %v2367_v20 = vrot.slane %v9453_v19, 2 }
 0x227   : > { %v1467_v17 = vadd.f32 %v1437_v57, %v1289_v33  ;;  %7131 = vmatmul.msk.bf16.gmra.mxu3 %vm419_vm1, %v1865_v0  ;;  %7151 = vmatmul.msk.bf16.gmra.mxu0 %vm419_vm1, %v2077_v4  ;;  %v1873_v46 = vor.u32 %v1872_v7, %v1869_v41  ;;  %v2632_v0 = vor.u32 %v2631_v43, %v2628_v8  ;;  %v10889_v4 = vld [vmem:[#allocation9_spill] sm:$0xff] }
 0x228   : > { %v1439_v18 = vpop.f32.mrf.mxu1 }
 0x229   : > { %7243 = vmatmul.msk.bf16.gmra.mxu2 %vm419_vm1, %v2624_v39  ;;  %v1874_v39 = vsel %vm1767_vm6, %v1864_v5, %v1873_v46  ;;  %v2633_v11 = vsel %vm1767_vm6, %v2623_v49, %v2632_v0  ;;  %v2638_v49 = vshll.u32 %v9476_v44, 16 }
 0x22a   : > { %v1961_v58 = vpop.f32.mrf.mxu3 }
 0x22b   : > { %v2027_v10 = vadd.f32 %v1961_v58, %v10888_v51  ;;  %v2368_v58 = vsel %vm1571_vm5, %v2365_v29, %v2367_v20  ;;  %v2635_v29 = vshrl.u32 %v9476_v44, 16 }
 0x22c   : > { %v1727_v35 = vpop.f32.mrf.mxu2  ;;  %v1261_v54 = vpop.f32.mrf.mxu0 }
 0x22d   : > { %v9464_v63 = vadd.f32 %v1727_v35, %v1467_v17  ;;  %v2079_v17 = vsel %vm869_vm3, %v2076_v1, %v2078_v38  ;;  %v10890_v35 = vld [vmem:[#allocation11_spill] sm:$0xff]  ;;  %v10891_v54 = vld [vmem:[#allocation10_spill] sm:$0xff] }
 0x22e   : > { %v1876_v5 = vshrl.u32 %v10890_v35, 16  ;;  %v1879_v1 = vshll.u32 %v10890_v35, 16  ;;  %v2369_v35 = vrot.slane %v9476_v44, 2 }
 0x230   : > { %v2440_v16 = vpop.f32.mrf.mxu1  ;;  %v1878_v8 = vrot.slane %v1876_v5, 2  ;;  %v1881_v43 = vrot.slane %v1879_v1, 3  ;;  %v10892_v5 = vld [vmem:[#allocation12_spill] sm:$0xff] }
 0x232   : > { %v1963_v28 = vpop.f32.mrf.mxu3 }
 0x233   : > { %v9469_v33 = vadd.f32 %v1963_v28, %v10889_v4  ;;  %7222 = vmatmul.msk.bf16.gmra.mxu1 %vm419_vm1, %v2368_v58  ;;  %v8403_v58 = vld [vmem:[%s8604_s6 + $0x54] sm:$0xff] }
 0x234   : > { %v1729_v57 = vpop.f32.mrf.mxu2  ;;  %v2151_v14 = vpop.f32.mrf.mxu0 }
 0x235   : > { %v2220_v37 = vadd.f32 %v2151_v14, %v2025_v61  ;;  %v2637_v14 = vrot.slane %v2635_v29, 2 }
 0x237   : > { %v2509_v51 = vadd.f32 %v2440_v16, %v2220_v37  ;;  %7132 = vmatmul.msk.bf16.gmra.mxu3 %vm419_vm1, %v1874_v39  ;;  %7152 = vmatmul.msk.bf16.gmra.mxu0 %vm419_vm1, %v2079_v17  ;;  %v2640_v39 = vrot.slane %v2638_v49, 3  ;;  %v1765_v37 = vunpack.c.l.b16 %v1758_v62  ;;  %v1882_v16 = vor.u32 %v1881_v43, %v1878_v8 }
 0x238   : > { %v2442_v57 = vpop.f32.mrf.mxu1 }
 0x239   : > { %7244 = vmatmul.msk.bf16.gmra.mxu2 %vm419_vm1, %v2633_v11  ;;  %v2080_v11 = vrot.slane %v8403_v58, 3  ;;  %v1883_v29 = vsel %vm1767_vm6, %v1873_v46, %v1882_v16 }
 0x23a   : > { %v1966_v61 = vpop.f32.mrf.mxu3 }
 0x23b   : > { %v9487_v41 = vadd.f32 %v1966_v61, %v10891_v54  ;;  %v2641_v54 = vor.u32 %v2640_v39, %v2637_v14  ;;  %v2081_v49 = vsel %vm869_vm3, %v2078_v38, %v2080_v11  ;;  %v9507_v14 = vld [vmem:[%s8604_s6 + $0x68] sm:$0xff] }
 0x23c   : > { %v2733_v7 = vpop.f32.mrf.mxu2  ;;  %v2153_v18 = vpop.f32.mrf.mxu0  ;;  %v2644_v38 = vshrl.u32 %v9507_v14, 16 }
 0x23d   : > { %v9490_v28 = vadd.f32 %v2733_v7, %v2509_v51  ;;  %v2221_v4 = vadd.f32 %v2153_v18, %v9443_v23  ;;  %v10893_v51 = vunpack.c.l.b16 %v9174_v48 }
 0x23f   : > { %v2510_v17 = vadd.f32 %v2442_v57, %v2221_v4  ;;  %v9498_v7 = vpack.c.b16 %v1765_v37, %v10893_v51  ;;  %v2370_v4 = vsel %vm1571_vm5, %v2367_v20, %v2369_v35  ;;  %v2642_v57 = vsel %vm1767_vm6, %v2632_v0, %v2641_v54 }
 0x240   : > { %v2445_v62 = vpop.f32.mrf.mxu1  ;;  %v2647_v20 = vshll.u32 %v9507_v14, 16 }
 0x241   : > { %v1885_v48 = vshrl.u32 %v9498_v7, 16  ;;  %v1888_v46 = vshll.u32 %v9498_v7, 16 }
 0x242   : > { %v1968_v61 = vpop.f32.mrf.mxu3 }
 0x243   : > { %v2030_v1 = vadd.f32 %v1968_v61, %v10892_v5  ;;  %7223 = vmatmul.msk.bf16.gmra.mxu1 %vm419_vm1, %v2370_v4  ;;  %v1887_v58 = vrot.slane %v1885_v48, 2  ;;  %v1890_v61 = vrot.slane %v1888_v46, 3 }
 0x244   : > { %v2735_v23 = vpop.f32.mrf.mxu2  ;;  %v2156_v18 = vpop.f32.mrf.mxu0 }
 0x245   : > { %v9502_v8 = vadd.f32 %v2735_v23, %v2510_v17  ;;  %v2222_v43 = vadd.f32 %v2156_v18, %v2027_v10  ;;  %v2646_v18 = vrot.slane %v2644_v38, 2 }
 0x247   : > { %10894 = vst [vmem:[#allocation8_spill] sm:$0xff] %v9502_v8  ;;  %v2511_v39 = vadd.f32 %v2445_v62, %v2222_v43  ;;  %7133 = vmatmul.msk.bf16.gmra.mxu3 %vm419_vm1, %v1883_v29  ;;  %7153 = vmatmul.msk.bf16.gmra.mxu0 %vm419_vm1, %v2081_v49  ;;  %v2649_v29 = vrot.slane %v2647_v20, 3  ;;  %v1891_v43 = vor.u32 %v1890_v61, %v1887_v58  ;;  %v8404_v62 = vld [vmem:[%s8604_s6 + $0x5c] sm:$0xff]  ;;  %v9534_v61 = vld [vmem:[%s8604_s6 + $0x70] sm:$0xff] }
 0x248   : > { %v2447_v23 = vpop.f32.mrf.mxu1  ;;  %v2082_v4 = vrot.slane %v8404_v62, 3  ;;  %10895 = vst [vmem:[#allocation9_spill] sm:$0xff] %v9534_v61 }
 0x249   : > { %7245 = vmatmul.msk.bf16.gmra.mxu2 %vm419_vm1, %v2642_v57  ;;  %v2371_v57 = vrot.slane %v9507_v14, 2  ;;  %v1892_v46 = vsel %vm1767_vm6, %v1882_v16, %v1891_v43  ;;  %v2656_v16 = vshll.u32 %v9534_v61, 16 }
 0x24a   : > { %v1971_v10 = vpop.f32.mrf.mxu3 }
 0x24b   : > { %v2031_v0 = vadd.f32 %v1971_v10, %v9187_v6  ;;  %v2650_v6 = vor.u32 %v2649_v29, %v2646_v18 }
 0x24c   : > { %v2738_v17 = vpop.f32.mrf.mxu2  ;;  %v2158_v37 = vpop.f32.mrf.mxu0 }
 0x24d   : > { %v9518_v5 = vadd.f32 %v2738_v17, %v2511_v39  ;;  %v2223_v51 = vadd.f32 %v2158_v37, %v9469_v33  ;;  %v2083_v33 = vsel %vm869_vm3, %v2080_v11, %v2082_v4  ;;  %v2372_v37 = vsel %vm1571_vm5, %v2369_v35, %v2371_v57 }
 0x24e   : > { %v2651_v58 = vsel %vm1767_vm6, %v2641_v54, %v2650_v6 }
 0x24f   : > { %v2512_v49 = vadd.f32 %v2447_v23, %v2223_v51 }
 0x250   : > { %v2450_v17 = vpop.f32.mrf.mxu1 }
 0x252   : > { %v1973_v8 = vpop.f32.mrf.mxu3 }
 0x253   : > { %v9524_v10 = vadd.f32 %v1973_v8, %v9202_v52  ;;  %7224 = vmatmul.msk.bf16.gmra.mxu1 %vm419_vm1, %v2372_v37 }
 0x254   : > { %v2740_v48 = vpop.f32.mrf.mxu2  ;;  %v2161_v39 = vpop.f32.mrf.mxu0 }
 0x255   : > { %v9528_v38 = vadd.f32 %v2740_v48, %v2512_v49  ;;  %v2224_v20 = vadd.f32 %v2161_v39, %v9487_v41  ;;  %v2653_v41 = vshrl.u32 %v9534_v61, 16  ;;  %v2658_v49 = vrot.slane %v2656_v16, 3  ;;  %v2273_v48 = vld [vmem:[%s8604_s6 + $0x78] sm:$0xf]  ;;  %v2536_v39 = vld [vmem:[%s8604_s6 + $0x7c] sm:$0x7] }
 0x256   : > { %v2334_v37 = vunpack.c.l.b16 %v2273_v48 }
 0x257   : > { %v2513_v51 = vadd.f32 %v2450_v17, %v2224_v20  ;;  %7134 = vmatmul.msk.bf16.gmra.mxu3 %vm419_vm1, %v1892_v46  ;;  %7154 = vmatmul.msk.bf16.gmra.mxu0 %vm419_vm1, %v2083_v33  ;;  %v2655_v29 = vrot.slane %v2653_v41, 2  ;;  %v8405_v46 = vld [vmem:[%s8604_s6 + $0x64] sm:$0xff]  ;;  %v2373_v20 = vrot.slane %v9534_v61, 2  ;;  %v2274_v61 = vld [vmem:[%s8604_s6 + $0x7c] sm:$0x3] }
 0x258   : > { %v2452_v18 = vpop.f32.mrf.mxu1  ;;  %v2084_v33 = vrot.slane %v8405_v46, 3 }
 0x259   : > { %7246 = vmatmul.msk.bf16.gmra.mxu2 %vm419_vm1, %v2651_v58  ;;  %v2543_v58 = vunpack.c.l.b16 %v2536_v39 }
 0x25a   : > { %v1976_v52 = vpop.f32.mrf.mxu3  ;;  %v2085_v41 = vsel %vm869_vm3, %v2082_v4, %v2084_v33 }
 0x25b   : > { %v9543_v11 = vadd.f32 %v1976_v52, %v9215_v31  ;;  %v2659_v31 = vor.u32 %v2658_v49, %v2655_v29  ;;  %v9561_v29 = vpack.c.b16 %v2543_v58, %v2334_v37 }
 0x25c   : > { %v2743_v35 = vpop.f32.mrf.mxu2  ;;  %v2163_v54 = vpop.f32.mrf.mxu0 }
 0x25d   : > { %v9545_v8 = vadd.f32 %v2743_v35, %v2513_v51  ;;  %v2225_v23 = vadd.f32 %v2163_v54, %v2030_v1  ;;  %v2660_v46 = vsel %vm1767_vm6, %v2650_v6, %v2659_v31  ;;  %10896 = vst [vmem:[#allocation11_spill] sm:$0xff] %v9561_v29 }
 0x25f   : > { %v2514_v62 = vadd.f32 %v2452_v18, %v2225_v23  ;;  %v2374_v23 = vsel %vm1571_vm5, %v2371_v57, %v2373_v20  ;;  %v2829_v18 = vld [vmem:[%s8604_s6 + $0x10] sm:$0x8]  ;;  %v2662_v57 = vshrl.u32 %v9561_v29, 16 }
 0x260   : > { %v2455_v54 = vpop.f32.mrf.mxu1 }
 0x262   : > { %v1978_v17 = vpop.f32.mrf.mxu3 }
 0x263   : > { %v9552_v51 = vadd.f32 %v1978_v17, %v9229_v32  ;;  %7225 = vmatmul.msk.bf16.gmra.mxu1 %vm419_vm1, %v2374_v23  ;;  %v2836_v32 = vunpack.c.l.b16 %v2829_v18  ;;  %v10897_v17 = vunpack.c.l.b16 %v9220_v9  ;;  %v2086_v23 = vrot.slane %v9498_v7, 3 }
 0x264   : > { %v2745_v1 = vpop.f32.mrf.mxu2  ;;  %v2166_v52 = vpop.f32.mrf.mxu0 }
 0x265   : > { %v9555_v16 = vadd.f32 %v2745_v1, %v2514_v62  ;;  %v2226_v35 = vadd.f32 %v2166_v52, %v2031_v0  ;;  %v2335_v0 = vunpack.c.l.b16 %v2274_v61  ;;  %v2665_v62 = vshll.u32 %v9561_v29, 16 }
 0x267   : > { %v2515_v49 = vadd.f32 %v2455_v54, %v2226_v35  ;;  %7135 = vmatmul.msk.bf16.gmra.mxu3 %vm419_vm1, %v1891_v43  ;;  %7155 = vmatmul.msk.bf16.gmra.mxu0 %vm419_vm1, %v2085_v41  ;;  %v2837_v43 = vpack.c.b16 %v10897_v17, %v2836_v32  ;;  %v2349_v41 = vpack.c.b16 %v2335_v0, %v2334_v37  ;;  %v2664_v35 = vrot.slane %v2662_v57, 2 }
 0x268   : > { %v2457_v52 = vpop.f32.mrf.mxu1  ;;  %v2667_v61 = vrot.slane %v2665_v62, 3 }
 0x269   : > { %7247 = vmatmul.msk.bf16.gmra.mxu2 %vm419_vm1, %v2660_v46  ;;  %v2838_v18 = vrot.slane %v2837_v43, 3  ;;  %v2839_v46 = vrot.slane %v9234_v25, 3 }
 0x26a   : > { %v1981_v4 = vpop.f32.mrf.mxu3  ;;  %v2668_v29 = vor.u32 %v2667_v61, %v2664_v35  ;;  %v7827_v61 = vld [vmem:[#allocation2 + $0x108] sm:$0xff] }
 0x26b   : > { %v2035_v6 = vadd.f32 %v1981_v4, %v9251_v56  ;;  %v2375_v56 = vrot.slane %v2349_v41, 2  ;;  %v2840_v37 = vsel %vm869_vm3, %v2838_v18, %v2839_v46  ;;  %v9599_v41 = vld [vmem:[%s8604_s6 + $0x18] sm:$0xff]   ;;  %v2841_v18 = vrot.slane %v9267_v50, 3  ;;  %4257 = vmatpush.bf16.msra.mxu0 %v7827_v61 }
 0x26c   : > { %v2748_v48 = vpop.f32.mrf.mxu2  ;;  %v2168_v39 = vpop.f32.mrf.mxu0  ;;  %v2669_v25 = vsel %vm1767_vm6, %v2659_v31, %v2668_v29  ;;  %v9610_v50 = vld [vmem:[%s8604_s6 + $0x1c] sm:$0xff]  }
 0x26d   : > { %v9572_v58 = vadd.f32 %v2748_v48, %v2515_v49  ;;  %v2227_v1 = vadd.f32 %v2168_v39, %v9524_v10  ;;  %v2087_v10 = vsel %vm869_vm3, %v2084_v33, %v2086_v23  ;;  %v2376_v62 = vsel %vm1571_vm5, %v2373_v20, %v2375_v56  ;;  %v7844_v33 = vld [vmem:[#allocation2 + $0x128] sm:$0xff] }
 0x26e   : > { %4711 = vmatpush.bf16.msra.mxu2 %v7844_v33 }
 0x26f   : > { %v2516_v54 = vadd.f32 %v2457_v52, %v2227_v1  ;;  %v3024_v52 = vld [vmem:[%s8604_s6 + $0x14] sm:$0xe] }
 0x270   : > { %v2460_v7 = vpop.f32.mrf.mxu1 }
 0x272   : > { %v1983_v4 = vpop.f32.mrf.mxu3 }
 0x273   : > { %v9578_v9 = vadd.f32 %v1983_v4, %v9261_v34  ;;  %v7812_v34 = vld [vmem:[#allocation2 + $0xf8] sm:$0xff]  ;;  %7226 = vmatmul.msk.bf16.gmra.mxu1 %vm419_vm1, %v2376_v62  ;;  %v3085_v4 = vunpack.c.l.b16 %v3024_v52 }
 0x274   : > { %v2750_v49 = vpop.f32.mrf.mxu2  ;;  %v2171_v32 = vpop.f32.mrf.mxu0  ;;  %3884 = vmatpush.bf16.msra.mxu3 %v7812_v34  ;;  %v3607_v34 = vld [vmem:[%s8604_s6 + $0x14] sm:$0xc] }
 0x275   : > { %v9582_v0 = vadd.f32 %v2750_v49, %v2516_v54  ;;  %v2228_v57 = vadd.f32 %v2171_v32, %v9543_v11  ;;  %v7829_v54 = vld [vmem:[#allocation2 + $0x118] sm:$0xff] }
 0x276   : > { %4452 = vmatpush.bf16.msra.mxu1 %v7829_v54 }
 0x277   : > { %v2517_v48 = vadd.f32 %v2460_v7, %v2228_v57  ;;  %7156 = vmatmul.msk.bf16.gmra.mxu0 %vm419_vm1, %v2087_v10  ;;  %7258 = vmatmul.msk.bf16.vlgmr.msrb.gmra.mxu3 %vm419_vm1, %v2840_v37  ;;  %v2842_v37 = vsel %vm869_vm3, %v2839_v46, %v2841_v18  ;;  %v3332_v46 = vshrl.u32 %v9610_v50, 16 }
 0x278   : > { %v2462_v1 = vpop.f32.mrf.mxu1 }
 0x279   : > { %7248 = vmatmul.msk.bf16.gmra.mxu2 %vm419_vm1, %v2669_v25  ;;  %v3334_v54 = vrot.slane %v3332_v46, 1 }
 0x27a   : > { %v1986_v11 = vpop.f32.mrf.mxu3 }
 0x27b   : > { %v9592_v39 = vadd.f32 %v1986_v11, %v9278_v47  ;;  %v7927_v47 = vunpack.c.l.b16 %v9599_v41  ;;  %v3335_v11 = vshll.u32 %v9610_v50, 16 }
 0x27c   : > { %v2753_v20 = vpop.f32.mrf.mxu2  ;;  %v2173_v31 = vpop.f32.mrf.mxu0 }
 0x27d   : > { %v9594_v17 = vadd.f32 %v2753_v20, %v2517_v48  ;;  %v2229_v43 = vadd.f32 %v2173_v31, %v9552_v51  ;;  %v3113_v57 = vpack.c.b16 %v7927_v47, %v3085_v4  ;;  %v3614_v20 = vunpack.c.l.b16 %v3607_v34 }
 0x27e   : > { %v3337_v4 = vrot.slane %v3335_v11, 2 }
 0x27f   : > { %v2518_v35 = vadd.f32 %v2462_v1, %v2229_v43  ;;  %v3327_v33 = vshll.u32 %v3113_v57, 16 }
 0x280   : > { %v2465_v25 = vpop.f32.mrf.mxu1 }
 0x281   : > { %v3329_v52 = vrot.slane %v3327_v33, 2 }
 0x282   : > { %v1988_v49 = vpop.f32.mrf.mxu3 }
 0x283   : > { %v9604_v32 = vadd.f32 %v1988_v49, %v9288_v45  ;;  %7227 = vmatmul.msk.bf16.gmra.mxu1 %vm419_vm1, %v2375_v56  ;;  %v3324_v45 = vshrl.u32 %v3113_v57, 16 }
 0x284   : > { %v2755_v51 = vpop.f32.mrf.mxu2  ;;  %v2176_v10 = vpop.f32.mrf.mxu0 }
 0x285   : > { %v9607_v7 = vadd.f32 %v2755_v51, %v2518_v35  ;;  %v2230_v62 = vadd.f32 %v2176_v10, %v2035_v6  ;;  %v2843_v51 = vrot.slane %v9294_v21, 3  ;;  %v3127_v10 = vrot.slane %v3113_v57, 1 }
 0x287   : > { %v2519_v48 = vadd.f32 %v2465_v25, %v2230_v62  ;;  %7157 = vmatmul.msk.bf16.gmra.mxu0 %vm419_vm1, %v2086_v23  ;;  %7259 = vmatmul.msk.bf16.gmra.mxu3 %vm419_vm1, %v2842_v37  ;;  %v3326_v23 = vrot.slane %v3324_v45, 1  ;;  %v3128_v37 = vrot.slane %v9610_v50, 1  ;;  %v3338_v62 = vor.u32 %v3337_v4, %v3334_v54 }
 0x288   : > { %v2467_v61 = vpop.f32.mrf.mxu1 }
 0x289   : > { %7249 = vmatmul.msk.bf16.gmra.mxu2 %vm419_vm1, %v2668_v29  ;;  %v3615_v29 = vpack.c.b16 %v7927_v47, %v3614_v20  ;;  %v2844_v47 = vsel %vm869_vm3, %v2841_v18, %v2843_v51  ;;  %v3129_v46 = vsel %vm669_vm2, %v3127_v10, %v3128_v37  ;;  %v9634_v20 = vld [vmem:[%s8604_s6 + $0x24] sm:$0xff]   ;;  %v2845_v10 = vrot.slane %v9320_v27, 3 }
 0x28a   : > { %v1991_v6 = vpop.f32.mrf.mxu3 }
 0x28b   : > { %v2039_v31 = vadd.f32 %v1991_v6, %v9305_v24  ;;  %v3330_v24 = vor.u32 %v3329_v52, %v3326_v23  ;;  %v3616_v34 = vrot.slane %v3615_v29, 2 }
 0x28c   : > { %v2758_v43 = vpop.f32.mrf.mxu2  ;;  %v2178_v1 = vpop.f32.mrf.mxu0 }
 0x28d   : > { %v9620_v35 = vadd.f32 %v2758_v43, %v2519_v48  ;;  %v2231_v56 = vadd.f32 %v2178_v1, %v9578_v9  ;;  %v3617_v48 = vrot.slane %v9610_v50, 2  ;;  %v3339_v6 = vsel %vm3322_vm7, %v3330_v24, %v3338_v62 }
 0x28e   : > { %v3130_v24 = vrot.slane %v9634_v20, 1 }
 0x28f   : > { %v2520_v49 = vadd.f32 %v2467_v61, %v2231_v56  ;;  %v3618_v43 = vsel %vm1571_vm5, %v3616_v34, %v3617_v48 }
 0x290   : > { %v2470_v11 = vpop.f32.mrf.mxu1 }
 0x292   : > { %v1993_v25 = vpop.f32.mrf.mxu3 }
 0x293   : > { %v2040_v9 = vadd.f32 %v1993_v25, %v9315_v2  ;;  %7302 = vmatmul.msk.bf16.vlgmr.msrb.gmra.mxu1 %vm419_vm1, %v3339_v6  ;;  %v3341_v2 = vshrl.u32 %v9634_v20, 16 }
 0x294   : > { %v2760_v45 = vpop.f32.mrf.mxu2  ;;  %v2181_v33 = vpop.f32.mrf.mxu0 }
 0x295   : > { %v9629_v21 = vadd.f32 %v2760_v45, %v2520_v49  ;;  %v2232_v57 = vadd.f32 %v2181_v33, %v9592_v39  ;;  %v3344_v39 = vshll.u32 %v9634_v20, 16  ;;  %v3343_v4 = vrot.slane %v3341_v2, 1 }
 0x296   : > { %v3619_v45 = vrot.slane %v9634_v20, 2 }
 0x297   : > { %v2521_v50 = vadd.f32 %v2470_v11, %v2232_v57  ;;  %7260 = vmatmul.msk.bf16.gmra.mxu3 %vm419_vm1, %v2844_v47  ;;  %7280 = vmatmul.msk.bf16.vlgmr.msrb.gmra.mxu0 %vm419_vm1, %v3129_v46  ;;  %v3346_v29 = vrot.slane %v3344_v39, 2  ;;  %v2846_v46 = vsel %vm869_vm3, %v2843_v51, %v2845_v10 }
 0x298   : > { %v2472_v54 = vpop.f32.mrf.mxu1 }
 0x299   : > { %7324 = vmatmul.msk.bf16.vlgmr.msrb.gmra.mxu2 %vm419_vm1, %v3618_v43  ;;  %v3347_v25 = vor.u32 %v3346_v29, %v3343_v4  ;;  %v9657_v43 = vld [vmem:[%s8604_s6 + $0x2c] sm:$0xff]  }
 0x29a   : > { %v1996_v18 = vpop.f32.mrf.mxu3  ;;  %v3132_v4 = vrot.slane %v9657_v43, 1 }
 0x29b   : > { %v2041_v1 = vadd.f32 %v1996_v18, %v9331_v36  ;;  %v3348_v27 = vsel %vm3322_vm7, %v3338_v62, %v3347_v25 }
 0x29c   : > { %v2763_v23 = vpop.f32.mrf.mxu2  ;;  %v2183_v52 = vpop.f32.mrf.mxu0 }
 0x29d   : > { %v9644_v56 = vadd.f32 %v2763_v23, %v2521_v50  ;;  %v2233_v61 = vadd.f32 %v2183_v52, %v9604_v32  ;;  %v3131_v32 = vsel %vm669_vm2, %v3128_v37, %v3130_v24  ;;  %v3620_v50 = vsel %vm1571_vm5, %v3617_v48, %v3619_v45 }
 0x29f   : > { %v2522_v49 = vadd.f32 %v2472_v54, %v2233_v61  ;;  %v2847_v54 = vrot.slane %v9346_v15, 3 }
 0x2a0   : > { %v2475_v6 = vpop.f32.mrf.mxu1 }
 0x2a2   : > { %v1998_v34 = vpop.f32.mrf.mxu3 }
 0x2a3   : > { %v2042_v36 = vadd.f32 %v1998_v34, %v9341_v59  ;;  %7303 = vmatmul.msk.bf16.gmra.mxu1 %vm419_vm1, %v3348_v27  ;;  %v3350_v59 = vshrl.u32 %v9657_v43, 16  ;;  %v3621_v34 = vrot.slane %v9657_v43, 2  ;;  %v9679_v27 = vld [vmem:[%s8604_s6 + $0x34] sm:$0xff]  }
 0x2a4   : > { %v2765_v33 = vpop.f32.mrf.mxu2  ;;  %v2186_v47 = vpop.f32.mrf.mxu0 }
 0x2a5   : > { %v9653_v57 = vadd.f32 %v2765_v33, %v2522_v49  ;;  %v2234_v11 = vadd.f32 %v2186_v47, %v2039_v31  ;;  %v3353_v31 = vshll.u32 %v9657_v43, 16  ;;  %v3352_v23 = vrot.slane %v3350_v59, 1 }
 0x2a7   : > { %v2523_v2 = vadd.f32 %v2475_v6, %v2234_v11  ;;  %7261 = vmatmul.msk.bf16.gmra.mxu3 %vm419_vm1, %v2846_v46  ;;  %7281 = vmatmul.msk.bf16.gmra.mxu0 %vm419_vm1, %v3131_v32  ;;  %v3355_v52 = vrot.slane %v3353_v31, 2  ;;  %v2848_v46 = vsel %vm869_vm3, %v2845_v10, %v2847_v54 }
 0x2a8   : > { %v2477_v18 = vpop.f32.mrf.mxu1 }
 0x2a9   : > { %7325 = vmatmul.msk.bf16.gmra.mxu2 %vm419_vm1, %v3620_v50  ;;  %v3356_v29 = vor.u32 %v3355_v52, %v3352_v23  ;;  %v3622_v50 = vsel %vm1571_vm5, %v3619_v45, %v3621_v34 }
 0x2aa   : > { %v2001_v51 = vpop.f32.mrf.mxu3 }
 0x2ab   : > { %v2043_v37 = vadd.f32 %v2001_v51, %v9357_v60  ;;  %v3357_v15 = vsel %vm3322_vm7, %v3347_v25, %v3356_v29 }
 0x2ac   : > { %v2768_v62 = vpop.f32.mrf.mxu2  ;;  %v2188_v20 = vpop.f32.mrf.mxu0 }
 0x2ad   : > { %v9667_v39 = vadd.f32 %v2768_v62, %v2523_v2  ;;  %v2235_v48 = vadd.f32 %v2188_v20, %v2040_v9  ;;  %v3133_v9 = vsel %vm669_vm2, %v3130_v24, %v3132_v4 }
 0x2af   : > { %v2524_v61 = vadd.f32 %v2477_v18, %v2235_v48  ;;  %v2849_v48 = vrot.slane %v9372_v30, 3  ;;  %v3134_v18 = vrot.slane %v9679_v27, 1 }
 0x2b0   : > { %v2480_v6 = vpop.f32.mrf.mxu1 }
 0x2b2   : > { %v2003_v49 = vpop.f32.mrf.mxu3 }
 0x2b3   : > { %v2044_v60 = vadd.f32 %v2003_v49, %v9367_v40  ;;  %7304 = vmatmul.msk.bf16.gmra.mxu1 %vm419_vm1, %v3357_v15  ;;  %v3359_v40 = vshrl.u32 %v9679_v27, 16 }
 0x2b4   : > { %v2770_v33 = vpop.f32.mrf.mxu2  ;;  %v2191_v47 = vpop.f32.mrf.mxu0 }
 0x2b5   : > { %v9675_v32 = vadd.f32 %v2770_v33, %v2524_v61  ;;  %v2236_v11 = vadd.f32 %v2191_v47, %v2041_v1  ;;  %v3362_v1 = vshll.u32 %v9679_v27, 16  ;;  %v3361_v51 = vrot.slane %v3359_v40, 1 }
 0x2b6   : > { %v3623_v61 = vrot.slane %v9679_v27, 2  ;;  %v2850_v47 = vsel %vm869_vm3, %v2847_v54, %v2849_v48 }
 0x2b7   : > { %v2525_v2 = vadd.f32 %v2480_v6, %v2236_v11  ;;  %7262 = vmatmul.msk.bf16.gmra.mxu3 %vm419_vm1, %v2848_v46  ;;  %7282 = vmatmul.msk.bf16.gmra.mxu0 %vm419_vm1, %v3133_v9  ;;  %v3364_v62 = vrot.slane %v3362_v1, 2  ;;  %v9701_v6 = vld [vmem:[%s8604_s6 + $0x3c] sm:$0xff]  }
 0x2b8   : > { %v2482_v31 = vpop.f32.mrf.mxu1  ;;  %v3624_v15 = vsel %vm1571_vm5, %v3621_v34, %v3623_v61 }
 0x2b9   : > { %7326 = vmatmul.msk.bf16.gmra.mxu2 %vm419_vm1, %v3622_v50  ;;  %v3365_v23 = vor.u32 %v3364_v62, %v3361_v51  ;;  %v3625_v62 = vrot.slane %v9701_v6, 2 }
 0x2ba   : > { %v2006_v10 = vpop.f32.mrf.mxu3 }
 0x2bb   : > { %v2045_v24 = vadd.f32 %v2006_v10, %v9385_v55  ;;  %v3366_v30 = vsel %vm3322_vm7, %v3356_v29, %v3365_v23 }
 0x2bc   : > { %v2773_v25 = vpop.f32.mrf.mxu2  ;;  %v2193_v43 = vpop.f32.mrf.mxu0 }
 0x2bd   : > { %v9689_v59 = vadd.f32 %v2773_v25, %v2525_v2  ;;  %v2237_v45 = vadd.f32 %v2193_v43, %v2042_v36  ;;  %v3135_v36 = vsel %vm669_vm2, %v3132_v4, %v3134_v18  ;;  %v2851_v43 = vrot.slane %v9400_v42, 3 }
 0x2bf   : > { %v2526_v20 = vadd.f32 %v2482_v31, %v2237_v45  ;;  %v3136_v45 = vrot.slane %v9701_v6, 1 }
 0x2c0   : > { %v2485_v11 = vpop.f32.mrf.mxu1 }
 0x2c2   : > { %v2008_v52 = vpop.f32.mrf.mxu3 }
 0x2c3   : > { %v2046_v55 = vadd.f32 %v2008_v52, %v9395_v13  ;;  %7305 = vmatmul.msk.bf16.gmra.mxu1 %vm419_vm1, %v3366_v30  ;;  %v3368_v13 = vshrl.u32 %v9701_v6, 16 }
 0x2c4   : > { %v2775_v49 = vpop.f32.mrf.mxu2  ;;  %v2196_v33 = vpop.f32.mrf.mxu0 }
 0x2c5   : > { %v9697_v46 = vadd.f32 %v2775_v49, %v2526_v20  ;;  %v2238_v9 = vadd.f32 %v2196_v33, %v2043_v37  ;;  %v3371_v37 = vshll.u32 %v9701_v6, 16  ;;  %v3370_v1 = vrot.slane %v3368_v13, 1 }
 0x2c6   : > { %v2852_v49 = vsel %vm869_vm3, %v2849_v48, %v2851_v43 }
 0x2c7   : > { %v2527_v50 = vadd.f32 %v2485_v11, %v2238_v9  ;;  %7263 = vmatmul.msk.bf16.gmra.mxu3 %vm419_vm1, %v2850_v47  ;;  %7283 = vmatmul.msk.bf16.gmra.mxu0 %vm419_vm1, %v3135_v36  ;;  %v3373_v10 = vrot.slane %v3371_v37, 2  ;;  %v9723_v9 = vld [vmem:[%s8604_s6 + $0x44] sm:$0xff]   ;;  %v3626_v11 = vsel %vm1571_vm5, %v3623_v61, %v3625_v62 }
 0x2c8   : > { %v2487_v40 = vpop.f32.mrf.mxu1 }
 0x2c9   : > { %7327 = vmatmul.msk.bf16.gmra.mxu2 %vm419_vm1, %v3624_v15  ;;  %v3374_v31 = vor.u32 %v3373_v10, %v3370_v1  ;;  %v3627_v1 = vrot.slane %v9723_v9, 2 }
 0x2ca   : > { %v2011_v54 = vpop.f32.mrf.mxu3 }
 0x2cb   : > { %v2047_v4 = vadd.f32 %v2011_v54, %v9413_v3  ;;  %v3375_v42 = vsel %vm3322_vm7, %v3365_v23, %v3374_v31 }
 0x2cc   : > { %v2778_v29 = vpop.f32.mrf.mxu2  ;;  %v2198_v27 = vpop.f32.mrf.mxu0 }
 0x2cd   : > { %v9711_v2 = vadd.f32 %v2778_v29, %v2527_v50  ;;  %v2239_v34 = vadd.f32 %v2198_v27, %v2044_v60  ;;  %v3137_v60 = vsel %vm669_vm2, %v3134_v18, %v3136_v45  ;;  %v2853_v29 = vrot.slane %v9426_v22, 3 }
 0x2ce   : > { %v3138_v27 = vrot.slane %v9723_v9, 1 }
 0x2cf   : > { %v2528_v25 = vadd.f32 %v2487_v40, %v2239_v34 }
 0x2d0   : > { %v2490_v36 = vpop.f32.mrf.mxu1 }
 0x2d2   : > { %v2013_v51 = vpop.f32.mrf.mxu3 }
 0x2d3   : > { %v2048_v3 = vadd.f32 %v2013_v51, %v9420_v12  ;;  %7306 = vmatmul.msk.bf16.gmra.mxu1 %vm419_vm1, %v3375_v42  ;;  %v3377_v12 = vshrl.u32 %v9723_v9, 16  ;;  %v3139_v51 = vsel %vm669_vm2, %v3136_v45, %v3138_v27  ;;  %v7843_v45 = vld [vmem:[#allocation2 + $0x120] sm:$0xff] }
 0x2d4   : > { %v2780_v20 = vpop.f32.mrf.mxu2  ;;  %v2201_v52 = vpop.f32.mrf.mxu0  ;;  %4712 = vmatpush.bf16.msra.mxu2 %v7843_v45 }
 0x2d5   : > { %v9719_v33 = vadd.f32 %v2780_v20, %v2528_v25  ;;  %v2240_v47 = vadd.f32 %v2201_v52, %v2045_v24  ;;  %v3380_v24 = vshll.u32 %v9723_v9, 16  ;;  %v3379_v13 = vrot.slane %v3377_v12, 1 }
 0x2d7   : > { %v2529_v30 = vadd.f32 %v2490_v36, %v2240_v47  ;;  %7264 = vmatmul.msk.bf16.gmra.mxu3 %vm419_vm1, %v2852_v49  ;;  %7284 = vmatmul.msk.bf16.gmra.mxu0 %vm419_vm1, %v3137_v60  ;;  %v3382_v37 = vrot.slane %v3380_v24, 2  ;;  %v9747_v60 = vld [vmem:[%s8604_s6 + $0x4c] sm:$0xff]   ;;  %v3628_v47 = vsel %vm1571_vm5, %v3625_v62, %v3627_v1 }
 0x2d8   : > { %v2492_v50 = vpop.f32.mrf.mxu1 }
 0x2d9   : > { %7328 = vmatmul.msk.bf16.gmra.mxu2 %vm419_vm1, %v3626_v11  ;;  %v3383_v34 = vor.u32 %v3382_v37, %v3379_v13  ;;  %v3140_v13 = vrot.slane %v9747_v60, 1 }
 0x2da   : > { %v2016_v48 = vpop.f32.mrf.mxu3 }
 0x2db   : > { %v2049_v18 = vadd.f32 %v2016_v48, %v9437_v26  ;;  %v3384_v22 = vsel %vm3322_vm7, %v3374_v31, %v3383_v34 }
 0x2dc   : > { %v2783_v23 = vpop.f32.mrf.mxu2  ;;  %v2203_v6 = vpop.f32.mrf.mxu0 }
 0x2dd   : > { %v9733_v15 = vadd.f32 %v2783_v23, %v2529_v30  ;;  %v2241_v61 = vadd.f32 %v2203_v6, %v2046_v55  ;;  %v2854_v55 = vsel %vm869_vm3, %v2851_v43, %v2853_v29  ;;  %v3386_v43 = vshrl.u32 %v9747_v60, 16  ;;  %v7826_v23 = vld [vmem:[#allocation2 + $0x100] sm:$0xff]  ;;  %v7828_v6 = vld [vmem:[#allocation2 + $0x110] sm:$0xff] }
 0x2de   : > { %4258 = vmatpush.bf16.msra.mxu0 %v7826_v23  ;;  %4453 = vmatpush.bf16.msra.mxu1 %v7828_v6 }
 0x2df   : > { %v2530_v54 = vadd.f32 %v2492_v50, %v2241_v61  ;;  %v3388_v24 = vrot.slane %v3386_v43, 1  ;;  %v2855_v50 = vrot.slane %v9453_v19, 3 }
 0x2e0   : > { %v2495_v49 = vpop.f32.mrf.mxu1 }
 0x2e2   : > { %v2018_v40 = vpop.f32.mrf.mxu3 }
 0x2e3   : > { %v9739_v26 = vadd.f32 %v2018_v40, %v9447_v53  ;;  %v7811_v53 = vld [vmem:[#allocation2 + $0xf0] sm:$0xff]  ;;  %7307 = vmatmul.msk.bf16.gmra.mxu1 %vm419_vm1, %v3384_v22 }
 0x2e4   : > { %v2785_v10 = vpop.f32.mrf.mxu2  ;;  %v2206_v25 = vpop.f32.mrf.mxu0  ;;  %3885 = vmatpush.bf16.msra.mxu3 %v7811_v53  ;;  %v9768_v22 = vld [vmem:[%s8604_s6 + $0x54] sm:$0xff]  }
 0x2e5   : > { %v9743_v20 = vadd.f32 %v2785_v10, %v2530_v54  ;;  %v2242_v52 = vadd.f32 %v2206_v25, %v2047_v4  ;;  %v3389_v4 = vshll.u32 %v9747_v60, 16  ;;  %v3629_v54 = vrot.slane %v9747_v60, 2 }
 0x2e6   : > { %v3141_v25 = vsel %vm669_vm2, %v3138_v27, %v3140_v13 }
 0x2e7   : > { %v2531_v36 = vadd.f32 %v2495_v49, %v2242_v52  ;;  %7265 = vmatmul.msk.bf16.gmra.mxu3 %vm419_vm1, %v2854_v55  ;;  %7285 = vmatmul.msk.bf16.gmra.mxu0 %vm419_vm1, %v3139_v51  ;;  %v3391_v48 = vrot.slane %v3389_v4, 2  ;;  %v3630_v19 = vsel %vm1571_vm5, %v3627_v1, %v3629_v54 }
 0x2e8   : > { %v2497_v12 = vpop.f32.mrf.mxu1 }
 0x2e9   : > { %7329 = vmatmul.msk.bf16.gmra.mxu2 %vm419_vm1, %v3628_v47 }
 0x2ea   : > { %v2021_v31 = vpop.f32.mrf.mxu3 }
 0x2eb   : > { %v2051_v42 = vadd.f32 %v2021_v31, %v9464_v63  ;;  %v3392_v63 = vor.u32 %v3391_v48, %v3388_v24  ;;  %v3631_v24 = vrot.slane %v9768_v22, 2 }
 0x2ec   : > { %v2788_v62 = vpop.f32.mrf.mxu2  ;;  %v2208_v9 = vpop.f32.mrf.mxu0 }
 0x2ed   : > { %v9757_v11 = vadd.f32 %v2788_v62, %v2531_v36  ;;  %v2243_v30 = vadd.f32 %v2208_v9, %v2048_v3  ;;  %v2856_v3 = vsel %vm869_vm3, %v2853_v29, %v2855_v50  ;;  %v3393_v49 = vsel %vm3322_vm7, %v3383_v34, %v3392_v63 }
 0x2ee   : > { %v3395_v29 = vshrl.u32 %v9768_v22, 16  ;;  %v2857_v62 = vrot.slane %v9476_v44, 3  ;;  %v3142_v9 = vrot.slane %v9768_v22, 1 }
 0x2ef   : > { %v2532_v61 = vadd.f32 %v2497_v12, %v2243_v30 }
 0x2f0   : > { %v2500_v52 = vpop.f32.mrf.mxu1  ;;  %v3397_v4 = vrot.slane %v3395_v29, 1  ;;  %v2859_v29 = vrot.slane %v9507_v14, 3 }
 0x2f2   : > { %v2023_v37 = vpop.f32.mrf.mxu3 }
 0x2f3   : > { %7308 = vmatmul.msk.bf16.gmra.mxu1 %vm419_vm1, %v3393_v49 }
 0x2f4   : > { %v2790_v40 = vpop.f32.mrf.mxu2  ;;  %v2211_v10 = vpop.f32.mrf.mxu0 }
 0x2f5   : > { %v9764_v55 = vadd.f32 %v2790_v40, %v2532_v61  ;;  %v2244_v51 = vadd.f32 %v2211_v10, %v2049_v18  ;;  %v3398_v18 = vshll.u32 %v9768_v22, 16  ;;  %v2858_v61 = vsel %vm869_vm3, %v2855_v50, %v2857_v62 }
 0x2f7   : > { %v2533_v47 = vadd.f32 %v2500_v52, %v2244_v51  ;;  %7266 = vmatmul.msk.bf16.gmra.mxu3 %vm419_vm1, %v2856_v3  ;;  %7286 = vmatmul.msk.bf16.gmra.mxu0 %vm419_vm1, %v3141_v25  ;;  %v3400_v45 = vrot.slane %v3398_v18, 2  ;;  %v9791_v3 = vld [vmem:[%s8604_s6 + $0x5c] sm:$0xff]   ;;  %v3632_v25 = vsel %vm1571_vm5, %v3629_v54, %v3631_v24 }
 0x2f8   : > { %v2502_v43 = vpop.f32.mrf.mxu1  ;;  %v3404_v50 = vshrl.u32 %v9791_v3, 16  ;;  %v3144_v18 = vrot.slane %v9791_v3, 1 }
 0x2f9   : > { %7330 = vmatmul.msk.bf16.gmra.mxu2 %vm419_vm1, %v3630_v19  ;;  %v3401_v30 = vor.u32 %v3400_v45, %v3397_v4  ;;  %v2860_v4 = vsel %vm869_vm3, %v2857_v62, %v2859_v29 }
 0x2fa   : > { %v2928_v27 = vpop.f32.mrf.mxu3  ;;  %v3406_v19 = vrot.slane %v3404_v50, 1  ;;  %v3145_v45 = vsel %vm669_vm2, %v3142_v9, %v3144_v18 }
 0x2fb   : > { %v2997_v34 = vadd.f32 %v2928_v27, %v9490_v28  ;;  %v10898_v28 = vld [vmem:[#allocation8_spill] sm:$0xff]  ;;  %v3402_v44 = vsel %vm3322_vm7, %v3392_v63, %v3401_v30 }
 0x2fc   : > { %v2793_v60 = vpop.f32.mrf.mxu2  ;;  %v2213_v36 = vpop.f32.mrf.mxu0 }
 0x2fd   : > { %v9778_v53 = vadd.f32 %v2793_v60, %v2533_v47  ;;  %v2245_v1 = vadd.f32 %v2213_v36, %v9739_v26  ;;  %v3143_v26 = vsel %vm669_vm2, %v3140_v13, %v3142_v9  ;;  %v3633_v36 = vrot.slane %v9791_v3, 2 }
 0x2ff   : > { %v2534_v31 = vadd.f32 %v2502_v43, %v2245_v1  ;;  %v3634_v14 = vsel %vm1571_vm5, %v3631_v24, %v3633_v36 }
 0x300   : > { %v2505_v10 = vpop.f32.mrf.mxu1 }
 0x302   : > { %v2930_v12 = vpop.f32.mrf.mxu3 }
 0x303   : > { %v2998_v48 = vadd.f32 %v2930_v12, %v10898_v28  ;;  %7309 = vmatmul.msk.bf16.gmra.mxu1 %vm419_vm1, %v3402_v44 }
 0x304   : > { %v2795_v23 = vpop.f32.mrf.mxu2  ;;  %v2216_v6 = vpop.f32.mrf.mxu0 }
 0x305   : > { %v9787_v37 = vadd.f32 %v2795_v23, %v2534_v31  ;;  %v2246_v40 = vadd.f32 %v2216_v6, %v2051_v42  ;;  %v3407_v42 = vshll.u32 %v9791_v3, 16  ;;  %v9811_v23 = vld [vmem:[%s8604_s6 + $0x64] sm:$0xff]  }
 0x306   : > { %v3146_v50 = vrot.slane %v9811_v23, 1 }
 0x307   : > { %v2535_v51 = vadd.f32 %v2505_v10, %v2246_v40  ;;  %7267 = vmatmul.msk.bf16.gmra.mxu3 %vm419_vm1, %v2858_v61  ;;  %7287 = vmatmul.msk.bf16.gmra.mxu0 %vm419_vm1, %v3143_v26  ;;  %v3409_v47 = vrot.slane %v3407_v42, 2 }
 0x308   : > { %v2507_v54 = vpop.f32.mrf.mxu1 }
 0x309   : > { %7331 = vmatmul.msk.bf16.gmra.mxu2 %vm419_vm1, %v3632_v25  ;;  %v3410_v27 = vor.u32 %v3409_v47, %v3406_v19  ;;  %v10899_v25 = vld [vmem:[#allocation9_spill] sm:$0xff] }
 0x30a   : > { %v2933_v13 = vpop.f32.mrf.mxu3 }
 0x30b   : > { %v2999_v63 = vadd.f32 %v2933_v13, %v9518_v5  ;;  %v3411_v28 = vsel %vm3322_vm7, %v3401_v30, %v3410_v27 }
 0x30c   : > { %v2798_v52 = vpop.f32.mrf.mxu2  ;;  %v2218_v49 = vpop.f32.mrf.mxu0 }
 0x30d   : > { %v9801_v22 = vadd.f32 %v2798_v52, %v2535_v51  ;;  %v2861_v51 = vrot.slane %v10899_v25, 3  ;;  %v3635_v52 = vrot.slane %v9811_v23, 2 }
 0x30f   : > { %v2862_v19 = vsel %vm869_vm3, %v2859_v29, %v2861_v51 }
 0x310   : > { %v3511_v12 = vpop.f32.mrf.mxu1 }
 0x312   : > { %v2935_v60 = vpop.f32.mrf.mxu3 }
 0x313   : > { %v3000_v1 = vadd.f32 %v2935_v60, %v9528_v38  ;;  %7310 = vmatmul.msk.bf16.gmra.mxu1 %vm419_vm1, %v3411_v28  ;;  %v3413_v38 = vshrl.u32 %v9811_v23, 16 }
 0x314   : > { %v2800_v43 = vpop.f32.mrf.mxu2  ;;  %v3217_v5 = vpop.f32.mrf.mxu0 }
 0x315   : > { %v3286_v31 = vadd.f32 %v3217_v5, %v2997_v34  ;;  %v3416_v34 = vshll.u32 %v9811_v23, 16  ;;  %v3415_v10 = vrot.slane %v3413_v38, 1 }
 0x317   : > { %v3580_v6 = vadd.f32 %v3511_v12, %v3286_v31  ;;  %7268 = vmatmul.msk.bf16.gmra.mxu3 %vm419_vm1, %v2860_v4  ;;  %7288 = vmatmul.msk.bf16.gmra.mxu0 %vm419_vm1, %v3145_v45  ;;  %v3418_v44 = vrot.slane %v3416_v34, 2  ;;  %v9833_v4 = vld [vmem:[%s8604_s6 + $0x6c] sm:$0xff]   ;;  %v3636_v45 = vsel %vm1571_vm5, %v3633_v36, %v3635_v52  ;;  %v10900_v34 = vld [vmem:[#allocation11_spill] sm:$0xff] }
 0x318   : > { %v3513_v40 = vpop.f32.mrf.mxu1 }
 0x319   : > { %7332 = vmatmul.msk.bf16.gmra.mxu2 %vm419_vm1, %v3634_v14  ;;  %v3419_v42 = vor.u32 %v3418_v44, %v3415_v10 }
 0x31a   : > { %v2938_v62 = vpop.f32.mrf.mxu3 }
 0x31b   : > { %v3001_v9 = vadd.f32 %v2938_v62, %v9545_v8  ;;  %v3420_v5 = vsel %vm3322_vm7, %v3410_v27, %v3419_v42  ;;  %v2863_v62 = vrot.slane %v10900_v34, 3 }
 0x31c   : > { %v3706_v30 = vpop.f32.mrf.mxu2  ;;  %v3219_v61 = vpop.f32.mrf.mxu0 }
 0x31d   : > { %v9821_v26 = vadd.f32 %v3706_v30, %v3580_v6  ;;  %v3287_v24 = vadd.f32 %v3219_v61, %v2998_v48  ;;  %v3147_v48 = vsel %vm669_vm2, %v3144_v18, %v3146_v50  ;;  %v3148_v30 = vrot.slane %v9833_v4, 1 }
 0x31f   : > { %v3581_v3 = vadd.f32 %v3513_v40, %v3287_v24  ;;  %v3637_v40 = vrot.slane %v9833_v4, 2 }
 0x320   : > { %v3516_v43 = vpop.f32.mrf.mxu1 }
 0x322   : > { %v2940_v13 = vpop.f32.mrf.mxu3 }
 0x323   : > { %v3002_v8 = vadd.f32 %v2940_v13, %v9555_v16  ;;  %7311 = vmatmul.msk.bf16.gmra.mxu1 %vm419_vm1, %v3420_v5  ;;  %v3422_v16 = vshrl.u32 %v9833_v4, 16 }
 0x324   : > { %v3708_v49 = vpop.f32.mrf.mxu2  ;;  %v3222_v54 = vpop.f32.mrf.mxu0 }
 0x325   : > { %v9829_v47 = vadd.f32 %v3708_v49, %v3581_v3  ;;  %v3288_v60 = vadd.f32 %v3222_v54, %v2999_v63  ;;  %v3425_v63 = vshll.u32 %v9833_v4, 16  ;;  %v3424_v14 = vrot.slane %v3422_v16, 1  ;;  %v9868_v16 = vld [vmem:[%s8604_s6 + $0x78] sm:$0xff]  }
 0x326   : > { %v2864_v3 = vsel %vm869_vm3, %v2861_v51, %v2863_v62 }
 0x327   : > { %v3582_v31 = vadd.f32 %v3516_v43, %v3288_v60  ;;  %7269 = vmatmul.msk.bf16.gmra.mxu3 %vm419_vm1, %v2862_v19  ;;  %7289 = vmatmul.msk.bf16.gmra.mxu0 %vm419_vm1, %v3147_v48  ;;  %v3427_v6 = vrot.slane %v3425_v63, 2  ;;  %v9855_v19 = vld [vmem:[%s8604_s6 + $0x74] sm:$0xff]   ;;  %v3638_v48 = vsel %vm1571_vm5, %v3635_v52, %v3637_v40  ;;  %v3313_v63 = vld [vmem:[%s8604_s6 + $0x80] sm:$0x3] }
 0x328   : > { %v3518_v23 = vpop.f32.mrf.mxu1 }
 0x329   : > { %7333 = vmatmul.msk.bf16.gmra.mxu2 %vm419_vm1, %v3636_v45  ;;  %v3428_v61 = vor.u32 %v3427_v6, %v3424_v14  ;;  %v3639_v14 = vrot.slane %v9855_v19, 2 }
 0x32a   : > { %v2943_v29 = vpop.f32.mrf.mxu3 }
 0x32b   : > { %v3003_v18 = vadd.f32 %v2943_v29, %v9572_v58  ;;  %v3429_v54 = vsel %vm3322_vm7, %v3419_v42, %v3428_v61 }
 0x32c   : > { %v3711_v27 = vpop.f32.mrf.mxu2  ;;  %v3224_v12 = vpop.f32.mrf.mxu0 }
 0x32d   : > { %v9843_v28 = vadd.f32 %v3711_v27, %v3582_v31  ;;  %v3289_v36 = vadd.f32 %v3224_v12, %v3000_v1  ;;  %v3149_v1 = vsel %vm669_vm2, %v3146_v50, %v3148_v30  ;;  %v3150_v27 = vrot.slane %v9855_v19, 1 }
 0x32f   : > { %v3583_v38 = vadd.f32 %v3518_v23, %v3289_v36  ;;  %v7976_v36 = vunpack.c.h.b16 %v9868_v16  ;;  %v3320_v23 = vunpack.c.l.b16 %v3313_v63  ;;  %v3151_v34 = vsel %vm669_vm2, %v3148_v30, %v3150_v27 }
 0x330   : > { %v3521_v49 = vpop.f32.mrf.mxu1 }
 0x332   : > { %v2945_v24 = vpop.f32.mrf.mxu3 }
 0x333   : > { %v3004_v58 = vadd.f32 %v2945_v24, %v9582_v0  ;;  %7312 = vmatmul.msk.bf16.gmra.mxu1 %vm419_vm1, %v3429_v54  ;;  %v3431_v0 = vshrl.u32 %v9855_v19, 16 }
 0x334   : > { %v3713_v10 = vpop.f32.mrf.mxu2  ;;  %v3227_v44 = vpop.f32.mrf.mxu0 }
 0x335   : > { %v9851_v25 = vadd.f32 %v3713_v10, %v3583_v38  ;;  %v3290_v13 = vadd.f32 %v3227_v44, %v3001_v9  ;;  %v3434_v9 = vshll.u32 %v9855_v19, 16  ;;  %v3433_v45 = vrot.slane %v3431_v0, 1 }
 0x337   : > { %v3584_v60 = vadd.f32 %v3521_v49, %v3290_v13  ;;  %7270 = vmatmul.msk.bf16.gmra.mxu3 %vm419_vm1, %v2864_v3  ;;  %7290 = vmatmul.msk.bf16.gmra.mxu0 %vm419_vm1, %v3149_v1  ;;  %v3436_v31 = vrot.slane %v3434_v9, 2  ;;  %v3051_v1 = vld [vmem:[%s8604_s6 + $0x80] sm:$0x1]  ;;  %v9880_v13 = vpack.c.b16 %v3320_v23, %v7976_v36  ;;  %v3640_v49 = vsel %vm1571_vm5, %v3637_v40, %v3639_v14 }
 0x338   : > { %v3523_v4 = vpop.f32.mrf.mxu1 }
 0x339   : > { %7334 = vmatmul.msk.bf16.gmra.mxu2 %vm419_vm1, %v3638_v48  ;;  %v3437_v12 = vor.u32 %v3436_v31, %v3433_v45  ;;  %v3443_v30 = vshll.u32 %v9880_v13, 16  ;;  %v3641_v31 = vrot.slane %v9880_v13, 2 }
 0x33a   : > { %v2948_v51 = vpop.f32.mrf.mxu3 }
 0x33b   : > { %v3005_v50 = vadd.f32 %v2948_v51, %v9594_v17  ;;  %v3438_v3 = vsel %vm3322_vm7, %v3428_v61, %v3437_v12 }
 0x33c   : > { %v3716_v42 = vpop.f32.mrf.mxu2  ;;  %v3229_v52 = vpop.f32.mrf.mxu0 }
 0x33d   : > { %v9865_v43 = vadd.f32 %v3716_v42, %v3584_v60  ;;  %v3291_v5 = vadd.f32 %v3229_v52, %v3002_v8  ;;  %v3445_v42 = vrot.slane %v3443_v30, 2  ;;  %v8101_v30 = vld [vmem:[%s8604_s6 + $0x20] sm:$0xff]  }
 0x33f   : > { %v3585_v29 = vadd.f32 %v3523_v4, %v3291_v5 }
 0x340   : > { %v3526_v44 = vpop.f32.mrf.mxu1 }
 0x342   : > { %v2950_v17 = vpop.f32.mrf.mxu3 }
 0x343   : > { %v3006_v6 = vadd.f32 %v2950_v17, %v9607_v7  ;;  %7313 = vmatmul.msk.bf16.gmra.mxu1 %vm419_vm1, %v3438_v3  ;;  %v3112_v7 = vunpack.c.l.b16 %v3051_v1 }
 0x344   : > { %v3718_v8 = vpop.f32.mrf.mxu2  ;;  %v3232_v38 = vpop.f32.mrf.mxu0 }
 0x345   : > { %v9876_v24 = vadd.f32 %v3718_v8, %v3585_v29  ;;  %v3292_v10 = vadd.f32 %v3232_v38, %v3003_v18  ;;  %v3440_v18 = vshrl.u32 %v9880_v13, 16  ;;  %v3126_v40 = vpack.c.b16 %v3112_v7, %v7976_v36  ;;  %v7848_v13 = vld [vmem:[#allocation2 + $0x148] sm:$0xff] }
 0x346   : > { %v3642_v38 = vsel %vm1571_vm5, %v3639_v14, %v3641_v31  ;;  %5279 = vmatpush.bf16.msrb.mxu0 %v7848_v13 }
 0x347   : > { %v3586_v54 = vadd.f32 %v3526_v44, %v3292_v10  ;;  %7271 = vmatmul.msk.bf16.gmra.mxu3 %vm419_vm1, %v2863_v62  ;;  %7291 = vmatmul.msk.bf16.gmra.mxu0 %vm419_vm1, %v3151_v34  ;;  %v3442_v51 = vrot.slane %v3440_v18, 1  ;;  %v3152_v5 = vrot.slane %v3126_v40, 1  ;;  %v7846_v10 = vld [vmem:[#allocation2 + $0x138] sm:$0xff] }
 0x348   : > { %v3528_v9 = vpop.f32.mrf.mxu1  ;;  %5084 = vmatpush.bf16.msrb.mxu3 %v7846_v10 }
 0x349   : > { %7335 = vmatmul.msk.bf16.gmra.mxu2 %vm419_vm1, %v3640_v49  ;;  %v3446_v4 = vor.u32 %v3445_v42, %v3442_v51  ;;  %v7850_v49 = vld [vmem:[#allocation2 + $0x158] sm:$0xff] }
 0x34a   : > { %v2953_v61 = vpop.f32.mrf.mxu3  ;;  %5478 = vmatpush.bf16.msrb.mxu1 %v7850_v49  ;;  %v8114_v51 = vld [vmem:[%s8604_s6 + $0x18] sm:$0xf0]  ;;  %v8115_v42 = vld [vmem:[%s8604_s6 + $0x18] sm:$0xe]  ;;  %v7830_v49 = vld [vmem:[%s8604_s6 + $0x24] sm:$0xff] }
 0x34b   : > { %v3007_v19 = vadd.f32 %v2953_v61, %v9620_v35  ;;  %v3153_v35 = vsel %vm669_vm2, %v3150_v27, %v3152_v5 }
 0x34c   : > { %v3721_v48 = vpop.f32.mrf.mxu2  ;;  %v3234_v60 = vpop.f32.mrf.mxu0 }
 0x34d   : > { %v9890_v0 = vadd.f32 %v3721_v48, %v3586_v54  ;;  %v3293_v62 = vadd.f32 %v3234_v60, %v3004_v58  ;;  %v3447_v58 = vsel %vm3322_vm7, %v3437_v12, %v3446_v4 }
 0x34f   : > { %v3587_v52 = vadd.f32 %v3528_v9, %v3293_v62  ;;  %v7813_v62 = vld [vmem:[%s8604_s6 + $0x20] sm:$0xff] }
 0x350   : > { %v3531_v8 = vpop.f32.mrf.mxu1  ;;  %v4366_v10 = vrot.slane %v7813_v62, 1 }
 0x352   : > { %v2955_v45 = vpop.f32.mrf.mxu3 }
 0x353   : > { %v3008_v63 = vadd.f32 %v2955_v45, %v9629_v21  ;;  %7314 = vmatmul.msk.bf16.gmra.mxu1 %vm419_vm1, %v3447_v58  ;;  %v7852_v21 = vld [vmem:[#allocation2 + $0x168] sm:$0xff] }
 0x354   : > { %v3723_v29 = vpop.f32.mrf.mxu2  ;;  %v3237_v23 = vpop.f32.mrf.mxu0  ;;  %5711 = vmatpush.bf16.msrb.mxu2 %v7852_v21 }
 0x355   : > { %v9895_v17 = vadd.f32 %v3723_v29, %v3587_v52  ;;  %v3294_v36 = vadd.f32 %v3237_v23, %v3005_v50 }
 0x357   : > { %v3588_v34 = vadd.f32 %v3531_v8, %v3294_v36  ;;  %7292 = vmatmul.msk.bf16.gmra.mxu0 %vm419_vm1, %v3153_v35  ;;  %7346 = vmatmul.msk.bf16.vlgmr.msra.gmra.mxu3 %vm419_vm1, %v9599_v41  ;;  %v4094_v35 = vshll.u32 %v7813_v62, 16 }
 0x358   : > { %v3533_v1 = vpop.f32.mrf.mxu1 }
 0x359   : > { %7336 = vmatmul.msk.bf16.gmra.mxu2 %vm419_vm1, %v3642_v38 }
 0x35a   : > { %v2958_v27 = vpop.f32.mrf.mxu3 }
 0x35b   : > { %v3009_v50 = vadd.f32 %v2958_v27, %v9644_v56 }
 0x35c   : > { %v3726_v12 = vpop.f32.mrf.mxu2  ;;  %v3239_v14 = vpop.f32.mrf.mxu0 }
 0x35d   : > { %v9905_v44 = vadd.f32 %v3726_v12, %v3588_v34  ;;  %v3295_v3 = vadd.f32 %v3239_v14, %v3006_v6  ;;  %v8113_v6 = vld [vmem:[%s8604_s6 + $0x18] sm:$0xff]   ;;  %v9924_v14 = vld [vmem:[%s8604_s6 + $0x28] sm:$0xff]  }
 0x35e   : > { %v4089_v9 = vshll.u32 %v8113_v6, 16  ;;  %v4087_v29 = vshrl.u32 %v8113_v6, 16 }
 0x35f   : > { %v3589_v41 = vadd.f32 %v3533_v1, %v3295_v3 }
 0x360   : > { %v3536_v60 = vpop.f32.mrf.mxu1  ;;  %v4091_v23 = vrot.slane %v4089_v9, 1 }
 0x362   : > { %v2960_v54 = vpop.f32.mrf.mxu3  ;;  %v4092_v38 = vor.u32 %v4091_v23, %v4087_v29 }
 0x363   : > { %v3010_v7 = vadd.f32 %v2960_v54, %v9653_v57  ;;  %7315 = vmatmul.msk.bf16.gmra.mxu1 %vm419_vm1, %v3446_v4  ;;  %v8116_v4 = vor.u32 %v8115_v42, %v8114_v51 }
 0x364   : > { %v3728_v56 = vpop.f32.mrf.mxu2  ;;  %v3242_v18 = vpop.f32.mrf.mxu0 }
 0x365   : > { %v9909_v61 = vadd.f32 %v3728_v56, %v3589_v41  ;;  %v3296_v48 = vadd.f32 %v3242_v18, %v3007_v19  ;;  %v4365_v34 = vrot.slane %v8116_v4, 1 }
 0x367   : > { %v3590_v40 = vadd.f32 %v3536_v60, %v3296_v48  ;;  %7293 = vmatmul.msk.bf16.gmra.mxu0 %vm419_vm1, %v3152_v5  ;;  %7347 = vmatmul.msk.bf16.gmra.mxu3 %vm419_vm1, %v8101_v30  ;;  %v4367_v13 = vsel %vm669_vm2, %v4365_v34, %v4366_v10  ;;  %v4098_v48 = vshrl.u32 %v7813_v62, 16 }
 0x368   : > { %v3538_v8 = vpop.f32.mrf.mxu1 }
 0x369   : > { %7337 = vmatmul.msk.bf16.gmra.mxu2 %vm419_vm1, %v3641_v31  ;;  %v4096_v31 = vrot.slane %v4094_v35, 1  ;;  %v8103_v35 = vld [vmem:[%s8604_s6 + $0x30] sm:$0xff]  }
 0x36a   : > { %v2963_v57 = vpop.f32.mrf.mxu3 }
 0x36b   : > { %v3011_v52 = vadd.f32 %v2963_v57, %v9667_v39  ;;  %v4097_v3 = vsel %vm295_vm0, %v4092_v38, %v4096_v31  ;;  %v4100_v51 = vor.u32 %v4098_v48, %v4096_v31  ;;  %v8104_v48 = vld [vmem:[%s8604_s6 + $0x38] sm:$0xff]  }
 0x36c   : > { %v3731_v45 = vpop.f32.mrf.mxu2  ;;  %v3244_v19 = vpop.f32.mrf.mxu0 }
 0x36d   : > { %v9920_v5 = vadd.f32 %v3731_v45, %v3590_v40  ;;  %v3297_v36 = vadd.f32 %v3244_v19, %v3008_v63 }
 0x36f   : > { %v3591_v58 = vadd.f32 %v3538_v8, %v3297_v36 }
 0x370   : > { %v3541_v41 = vpop.f32.mrf.mxu1 }
 0x372   : > { %v2965_v21 = vpop.f32.mrf.mxu3 }
 0x373   : > { %v3012_v39 = vadd.f32 %v2965_v21, %v9675_v32  ;;  %7442 = vmatmul.msk.bf16.vlgmr.msra.gmra.mxu1 %vm419_vm1, %v4367_v13  ;;  %v7814_v32 = vld [vmem:[%s8604_s6 + $0x28] sm:$0xff] }
 0x374   : > { %v3733_v27 = vpop.f32.mrf.mxu2  ;;  %v3247_v12 = vpop.f32.mrf.mxu0  ;;  %v4102_v60 = vshll.u32 %v7814_v32, 16  ;;  %v4368_v45 = vrot.slane %v7814_v32, 1 }
 0x375   : > { %v9927_v1 = vadd.f32 %v3733_v27, %v3591_v58  ;;  %v3298_v63 = vadd.f32 %v3247_v12, %v3009_v50  ;;  %v7831_v58 = vld [vmem:[%s8604_s6 + $0x2c] sm:$0xff]  ;;  %v4106_v27 = vshrl.u32 %v7814_v32, 16 }
 0x376   : > { %v4104_v42 = vrot.slane %v4102_v60, 1 }
 0x377   : > { %v3592_v54 = vadd.f32 %v3541_v41, %v3298_v63  ;;  %7348 = vmatmul.msk.bf16.gmra.mxu3 %vm419_vm1, %v9924_v14  ;;  %7420 = vmatmul.msk.bf16.vlgmr.msra.gmra.mxu0 %vm419_vm1, %v4097_v3 }
 0x378   : > { %v3543_v9 = vpop.f32.mrf.mxu1  ;;  %v4105_v36 = vsel %vm295_vm0, %v4100_v51, %v4104_v42  ;;  %v4108_v13 = vor.u32 %v4106_v27, %v4104_v42  ;;  %v8105_v27 = vld [vmem:[%s8604_s6 + $0x40] sm:$0xff]  }
 0x379   : > { %7516 = vmatmul.msk.bf16.vlgmr.msra.gmra.mxu2 %vm419_vm1, %v7830_v49 }
 0x37a   : > { %v2968_v56 = vpop.f32.mrf.mxu3 }
 0x37b   : > { %v3013_v18 = vadd.f32 %v2968_v56, %v9689_v59 }
 0x37c   : > { %v3736_v50 = vpop.f32.mrf.mxu2  ;;  %v3249_v30 = vpop.f32.mrf.mxu0 }
 0x37d   : > { %v9938_v6 = vadd.f32 %v3736_v50, %v3592_v54  ;;  %v3299_v40 = vadd.f32 %v3249_v30, %v3010_v7  ;;  %v4369_v7 = vsel %vm669_vm2, %v4366_v10, %v4368_v45 }
 0x37f   : > { %v3593_v57 = vadd.f32 %v3543_v9, %v3299_v40 }
 0x380   : > { %v3546_v4 = vpop.f32.mrf.mxu1 }
 0x382   : > { %v2970_v19 = vpop.f32.mrf.mxu3 }
 0x383   : > { %v3014_v29 = vadd.f32 %v2970_v19, %v9697_v46  ;;  %7443 = vmatmul.msk.bf16.gmra.mxu1 %vm419_vm1, %v4369_v7  ;;  %v7815_v46 = vld [vmem:[%s8604_s6 + $0x30] sm:$0xff] }
 0x384   : > { %v3738_v23 = vpop.f32.mrf.mxu2  ;;  %v3252_v59 = vpop.f32.mrf.mxu0  ;;  %v4110_v12 = vshll.u32 %v7815_v46, 16  ;;  %v4370_v54 = vrot.slane %v7815_v46, 1 }
 0x385   : > { %v9943_v62 = vadd.f32 %v3738_v23, %v3593_v57  ;;  %v3300_v8 = vadd.f32 %v3252_v59, %v3011_v52  ;;  %v7832_v57 = vld [vmem:[%s8604_s6 + $0x34] sm:$0xff]  ;;  %v4114_v59 = vshrl.u32 %v7815_v46, 16 }
 0x386   : > { %v4112_v49 = vrot.slane %v4110_v12, 1 }
 0x387   : > { %v3594_v38 = vadd.f32 %v3546_v4, %v3300_v8  ;;  %7349 = vmatmul.msk.bf16.gmra.mxu3 %vm419_vm1, %v8103_v35  ;;  %7421 = vmatmul.msk.bf16.gmra.mxu0 %vm419_vm1, %v4105_v36 }
 0x388   : > { %v3548_v63 = vpop.f32.mrf.mxu1  ;;  %v4113_v60 = vsel %vm295_vm0, %v4108_v13, %v4112_v49  ;;  %v4116_v7 = vor.u32 %v4114_v59, %v4112_v49  ;;  %v8106_v59 = vld [vmem:[%s8604_s6 + $0x48] sm:$0xff]  }
 0x389   : > { %7517 = vmatmul.msk.bf16.gmra.mxu2 %vm419_vm1, %v7831_v58 }
 0x38a   : > { %v2973_v31 = vpop.f32.mrf.mxu3 }
 0x38b   : > { %v3015_v34 = vadd.f32 %v2973_v31, %v9711_v2 }
 0x38c   : > { %v3741_v21 = vpop.f32.mrf.mxu2  ;;  %v3254_v52 = vpop.f32.mrf.mxu0 }
 0x38d   : > { %v9953_v10 = vadd.f32 %v3741_v21, %v3594_v38  ;;  %v3301_v3 = vadd.f32 %v3254_v52, %v3012_v39  ;;  %v4371_v39 = vsel %vm669_vm2, %v4368_v45, %v4370_v54 }
 0x38f   : > { %v3595_v41 = vadd.f32 %v3548_v63, %v3301_v3 }
 0x390   : > { %v3551_v9 = vpop.f32.mrf.mxu1 }
 0x392   : > { %v2975_v56 = vpop.f32.mrf.mxu3 }
 0x393   : > { %v3016_v50 = vadd.f32 %v2975_v56, %v9719_v33  ;;  %7444 = vmatmul.msk.bf16.gmra.mxu1 %vm419_vm1, %v4371_v39  ;;  %v7816_v33 = vld [vmem:[%s8604_s6 + $0x38] sm:$0xff] }
 0x394   : > { %v3743_v30 = vpop.f32.mrf.mxu2  ;;  %v3257_v2 = vpop.f32.mrf.mxu0  ;;  %v4118_v35 = vshll.u32 %v7816_v33, 16  ;;  %v4372_v38 = vrot.slane %v7816_v33, 1 }
 0x395   : > { %v9958_v32 = vadd.f32 %v3743_v30, %v3595_v41  ;;  %v3302_v40 = vadd.f32 %v3257_v2, %v3013_v18  ;;  %v7833_v41 = vld [vmem:[%s8604_s6 + $0x3c] sm:$0xff]  ;;  %v4122_v2 = vshrl.u32 %v7816_v33, 16 }
 0x396   : > { %v4120_v58 = vrot.slane %v4118_v35, 1 }
 0x397   : > { %v3596_v51 = vadd.f32 %v3551_v9, %v3302_v40  ;;  %7350 = vmatmul.msk.bf16.gmra.mxu3 %vm419_vm1, %v8104_v48  ;;  %7422 = vmatmul.msk.bf16.gmra.mxu0 %vm419_vm1, %v4113_v60 }
 0x398   : > { %v3553_v8 = vpop.f32.mrf.mxu1  ;;  %v4121_v12 = vsel %vm295_vm0, %v4116_v7, %v4120_v58  ;;  %v4124_v39 = vor.u32 %v4122_v2, %v4120_v58  ;;  %v8107_v2 = vld [vmem:[%s8604_s6 + $0x50] sm:$0xff]  }
 0x399   : > { %7518 = vmatmul.msk.bf16.gmra.mxu2 %vm419_vm1, %v7832_v57 }
 0x39a   : > { %v2978_v42 = vpop.f32.mrf.mxu3 }
 0x39b   : > { %v3017_v19 = vadd.f32 %v2978_v42, %v9733_v15 }
 0x39c   : > { %v3746_v23 = vpop.f32.mrf.mxu2  ;;  %v3259_v18 = vpop.f32.mrf.mxu0 }
 0x39d   : > { %v9968_v45 = vadd.f32 %v3746_v23, %v3596_v51  ;;  %v3303_v36 = vadd.f32 %v3259_v18, %v3014_v29  ;;  %v4373_v29 = vsel %vm669_vm2, %v4370_v54, %v4372_v38 }
 0x39f   : > { %v3597_v4 = vadd.f32 %v3553_v8, %v3303_v36 }
 0x3a0   : > { %v3556_v63 = vpop.f32.mrf.mxu1 }
 0x3a2   : > { %v2980_v31 = vpop.f32.mrf.mxu3 }
 0x3a3   : > { %v3018_v21 = vadd.f32 %v2980_v31, %v9743_v20  ;;  %7445 = vmatmul.msk.bf16.gmra.mxu1 %vm419_vm1, %v4373_v29  ;;  %v7817_v20 = vld [vmem:[%s8604_s6 + $0x40] sm:$0xff] }
 0x3a4   : > { %v3748_v52 = vpop.f32.mrf.mxu2  ;;  %v3262_v15 = vpop.f32.mrf.mxu0  ;;  %v4126_v48 = vshll.u32 %v7817_v20, 16  ;;  %v4374_v51 = vrot.slane %v7817_v20, 1 }
 0x3a5   : > { %v9973_v46 = vadd.f32 %v3748_v52, %v3597_v4  ;;  %v3304_v3 = vadd.f32 %v3262_v15, %v3015_v34  ;;  %v7834_v4 = vld [vmem:[%s8604_s6 + $0x44] sm:$0xff]  ;;  %v4130_v15 = vshrl.u32 %v7817_v20, 16 }
 0x3a6   : > { %v4128_v57 = vrot.slane %v4126_v48, 1 }
 0x3a7   : > { %v3598_v13 = vadd.f32 %v3556_v63, %v3304_v3  ;;  %7351 = vmatmul.msk.bf16.gmra.mxu3 %vm419_vm1, %v8105_v27  ;;  %7423 = vmatmul.msk.bf16.gmra.mxu0 %vm419_vm1, %v4121_v12 }
 0x3a8   : > { %v3558_v40 = vpop.f32.mrf.mxu1  ;;  %v4129_v35 = vsel %vm295_vm0, %v4124_v39, %v4128_v57  ;;  %v4132_v29 = vor.u32 %v4130_v15, %v4128_v57  ;;  %v7845_v57 = vld [vmem:[#allocation2 + $0x130] sm:$0xff] }
 0x3a9   : > { %7519 = vmatmul.msk.bf16.gmra.mxu2 %vm419_vm1, %v7833_v41  ;;  %5085 = vmatpush.bf16.msrb.mxu3 %v7845_v57 }
 0x3aa   : > { %v2983_v49 = vpop.f32.mrf.mxu3 }
 0x3ab   : > { %v3019_v56 = vadd.f32 %v2983_v49, %v9757_v11 }
 0x3ac   : > { %v3751_v30 = vpop.f32.mrf.mxu2  ;;  %v3264_v34 = vpop.f32.mrf.mxu0 }
 0x3ad   : > { %v9983_v54 = vadd.f32 %v3751_v30, %v3598_v13  ;;  %v3305_v60 = vadd.f32 %v3264_v34, %v3016_v50  ;;  %v4375_v50 = vsel %vm669_vm2, %v4372_v38, %v4374_v51 }
 0x3af   : > { %v3599_v9 = vadd.f32 %v3558_v40, %v3305_v60 }
 0x3b0   : > { %v3561_v8 = vpop.f32.mrf.mxu1 }
 0x3b2   : > { %v2985_v42 = vpop.f32.mrf.mxu3 }
 0x3b3   : > { %v3020_v23 = vadd.f32 %v2985_v42, %v9764_v55  ;;  %7446 = vmatmul.msk.bf16.gmra.mxu1 %vm419_vm1, %v4375_v50  ;;  %v9996_v55 = vld [vmem:[%s8604_s6 + $0x48] sm:$0xff]  ;;  %v7851_v42 = vld [vmem:[#allocation2 + $0x160] sm:$0xff] }
 0x3b4   : > { %v3753_v18 = vpop.f32.mrf.mxu2  ;;  %v3267_v11 = vpop.f32.mrf.mxu0  ;;  %v4134_v38 = vshll.u32 %v9996_v55, 16  ;;  %v4376_v13 = vrot.slane %v9996_v55, 1  ;;  %5712 = vmatpush.bf16.msrb.mxu2 %v7851_v42 }
 0x3b5   : > { %v9988_v33 = vadd.f32 %v3753_v18, %v3599_v9  ;;  %v3306_v36 = vadd.f32 %v3267_v11, %v3017_v19  ;;  %v7835_v9 = vld [vmem:[%s8604_s6 + $0x4c] sm:$0xff] }
 0x3b6   : > { %v4136_v41 = vrot.slane %v4134_v38, 1  ;;  %v4377_v40 = vsel %vm669_vm2, %v4374_v51, %v4376_v13 }
 0x3b7   : > { %v3600_v7 = vadd.f32 %v3561_v8, %v3306_v36  ;;  %7352 = vmatmul.msk.bf16.gmra.mxu3 %vm419_vm1, %v8106_v59  ;;  %7424 = vmatmul.msk.bf16.gmra.mxu0 %vm419_vm1, %v4129_v35  ;;  %v4138_v59 = vshrl.u32 %v9996_v55, 16  ;;  %v8108_v55 = vld [vmem:[%s8604_s6 + $0x58] sm:$0xff]  }
 0x3b8   : > { %v3563_v3 = vpop.f32.mrf.mxu1  ;;  %v4137_v20 = vsel %vm295_vm0, %v4132_v29, %v4136_v41 }
 0x3b9   : > { %7520 = vmatmul.msk.bf16.gmra.mxu2 %vm419_vm1, %v7834_v4  ;;  %v7847_v4 = vld [vmem:[#allocation2 + $0x140] sm:$0xff] }
 0x3ba   : > { %v2988_v58 = vpop.f32.mrf.mxu3  ;;  %5280 = vmatpush.bf16.msrb.mxu0 %v7847_v4 }
 0x3bb   : > { %v3021_v31 = vadd.f32 %v2988_v58, %v9778_v53 }
 0x3bc   : > { %v3756_v19 = vpop.f32.mrf.mxu2  ;;  %v3269_v52 = vpop.f32.mrf.mxu0 }
 0x3bd   : > { %v10001_v27 = vadd.f32 %v3756_v19, %v3600_v7  ;;  %v3307_v12 = vadd.f32 %v3269_v52, %v3018_v21  ;;  %v7849_v7 = vld [vmem:[#allocation2 + $0x150] sm:$0xff]  ;;  %v4140_v19 = vor.u32 %v4138_v59, %v4136_v41  ;;  %v7820_v41 = vld [vmem:[%s8604_s6 + $0x58] sm:$0xff] }
 0x3be   : > { %5479 = vmatpush.bf16.msrb.mxu1 %v7849_v7 }
 0x3bf   : > { %v3601_v63 = vadd.f32 %v3563_v3, %v3307_v12 }
 0x3c0   : > { %v3566_v21 = vpop.f32.mrf.mxu1 }
 0x3c2   : > { %v2990_v49 = vpop.f32.mrf.mxu3 }
 0x3c3   : > { %v3022_v53 = vadd.f32 %v2990_v49, %v9787_v37  ;;  %7447 = vmatmul.msk.bf16.gmra.mxu1 %vm419_vm1, %v4377_v40  ;;  %v7819_v37 = vld [vmem:[%s8604_s6 + $0x50] sm:$0xff]  ;;  %v4150_v40 = vshll.u32 %v7820_v41, 16 }
 0x3c4   : > { %v3758_v30 = vpop.f32.mrf.mxu2  ;;  %v3272_v34 = vpop.f32.mrf.mxu0  ;;  %v4142_v35 = vshll.u32 %v7819_v37, 16 }
 0x3c5   : > { %v10007_v48 = vadd.f32 %v3758_v30, %v3601_v63  ;;  %v3308_v60 = vadd.f32 %v3272_v34, %v3019_v56  ;;  %v7836_v30 = vld [vmem:[%s8604_s6 + $0x54] sm:$0xff] }
 0x3c6   : > { %v4144_v52 = vrot.slane %v4142_v35, 1 }
 0x3c7   : > { %v3602_v39 = vadd.f32 %v3566_v21, %v3308_v60  ;;  %7353 = vmatmul.msk.bf16.gmra.mxu3 %vm419_vm1, %v8107_v2  ;;  %7425 = vmatmul.msk.bf16.gmra.mxu0 %vm419_vm1, %v4137_v20  ;;  %v4146_v21 = vshrl.u32 %v7819_v37, 16 }
 0x3c8   : > { %v3568_v50 = vpop.f32.mrf.mxu1  ;;  %v4145_v3 = vsel %vm295_vm0, %v4140_v19, %v4144_v52 }
 0x3c9   : > { %7521 = vmatmul.msk.bf16.gmra.mxu2 %vm419_vm1, %v7835_v9  ;;  %v4148_v42 = vor.u32 %v4146_v21, %v4144_v52 }
 0x3ca   : > { %v2993_v18 = vpop.f32.mrf.mxu3 }
 0x3cb   : > { %v3023_v56 = vadd.f32 %v2993_v18, %v9801_v22  ;;  %v4378_v22 = vrot.slane %v7819_v37, 1  ;;  %v4152_v18 = vrot.slane %v4150_v40, 1 }
 0x3cc   : > { %v3761_v11 = vpop.f32.mrf.mxu2  ;;  %v3274_v51 = vpop.f32.mrf.mxu0 }
 0x3cd   : > { %v10018_v36 = vadd.f32 %v3761_v11, %v3602_v39  ;;  %v3309_v8 = vadd.f32 %v3274_v51, %v3020_v23  ;;  %v4379_v49 = vsel %vm669_vm2, %v4376_v13, %v4378_v22  ;;  %v4380_v11 = vrot.slane %v7820_v41, 1 }
 0x3cf   : > { %v3603_v58 = vadd.f32 %v3568_v50, %v3309_v8  ;;  %v8109_v8 = vld [vmem:[%s8604_s6 + $0x60] sm:$0xff]   ;;  %v4153_v50 = vsel %vm295_vm0, %v4148_v42, %v4152_v18 }
 0x3d0   : > { %v3571_v29 = vpop.f32.mrf.mxu1 }
 0x3d2   : > { %v2995_v15 = vpop.f32.mrf.mxu3 }
 0x3d3   : > { %7448 = vmatmul.msk.bf16.gmra.mxu1 %vm419_vm1, %v4379_v49 }
 0x3d4   : > { %v3763_v38 = vpop.f32.mrf.mxu2  ;;  %v3277_v12 = vpop.f32.mrf.mxu0 }
 0x3d5   : > { %v10022_v63 = vadd.f32 %v3763_v38, %v3603_v58  ;;  %v3310_v23 = vadd.f32 %v3277_v12, %v3021_v31  ;;  %v7837_v58 = vld [vmem:[%s8604_s6 + $0x5c] sm:$0xff]  ;;  %v4154_v12 = vshrl.u32 %v7820_v41, 16 }
 0x3d7   : > { %v3604_v34 = vadd.f32 %v3571_v29, %v3310_v23  ;;  %7354 = vmatmul.msk.bf16.gmra.mxu3 %vm419_vm1, %v8108_v55  ;;  %7426 = vmatmul.msk.bf16.gmra.mxu0 %vm419_vm1, %v4145_v3  ;;  %v4156_v23 = vor.u32 %v4154_v12, %v4152_v18 }
 0x3d8   : > { %v3573_v39 = vpop.f32.mrf.mxu1 }
 0x3d9   : > { %7522 = vmatmul.msk.bf16.gmra.mxu2 %vm419_vm1, %v7836_v30 }
 0x3da   : > { %v3887_v2 = vpop.f32.mrf.mxu3 }
 0x3db   : > { %v3956_v20 = vadd.f32 %v3887_v2, %v9821_v26 }
 0x3dc   : > { %v3766_v60 = vpop.f32.mrf.mxu2  ;;  %v3279_v31 = vpop.f32.mrf.mxu0 }
 0x3dd   : > { %v10032_v13 = vadd.f32 %v3766_v60, %v3604_v34  ;;  %v3311_v9 = vadd.f32 %v3279_v31, %v3022_v53  ;;  %v4381_v53 = vsel %vm669_vm2, %v4378_v22, %v4380_v11  ;;  %v8110_v31 = vld [vmem:[%s8604_s6 + $0x68] sm:$0xff]  }
 0x3df   : > { %v3605_v57 = vadd.f32 %v3573_v39, %v3311_v9  ;;  %v7838_v9 = vld [vmem:[%s8604_s6 + $0x64] sm:$0xff] }
 0x3e0   : > { %v3576_v7 = vpop.f32.mrf.mxu1 }
 0x3e2   : > { %v3889_v51 = vpop.f32.mrf.mxu3 }
 0x3e3   : > { %v3957_v59 = vadd.f32 %v3889_v51, %v9829_v47  ;;  %7449 = vmatmul.msk.bf16.gmra.mxu1 %vm419_vm1, %v4381_v53  ;;  %v7821_v47 = vld [vmem:[%s8604_s6 + $0x60] sm:$0xff] }
 0x3e4   : > { %v3768_v35 = vpop.f32.mrf.mxu2  ;;  %v3282_v26 = vpop.f32.mrf.mxu0  ;;  %v4158_v22 = vshll.u32 %v7821_v47, 16  ;;  %v4382_v49 = vrot.slane %v7821_v47, 1  ;;  %v4162_v51 = vshrl.u32 %v7821_v47, 16 }
 0x3e5   : > { %v10037_v37 = vadd.f32 %v3768_v35, %v3605_v57  ;;  %v3312_v4 = vadd.f32 %v3282_v26, %v3023_v56  ;;  %v7822_v57 = vld [vmem:[%s8604_s6 + $0x68] sm:$0xff] }
 0x3e6   : > { %v4160_v29 = vrot.slane %v4158_v22, 1  ;;  %v4383_v41 = vsel %vm669_vm2, %v4380_v11, %v4382_v49  ;;  %v4166_v35 = vshll.u32 %v7822_v57, 16  ;;  %v4384_v53 = vrot.slane %v7822_v57, 1 }
 0x3e7   : > { %v3606_v19 = vadd.f32 %v3576_v7, %v3312_v4  ;;  %7355 = vmatmul.msk.bf16.gmra.mxu3 %vm419_vm1, %v8109_v8  ;;  %7427 = vmatmul.msk.bf16.gmra.mxu0 %vm419_vm1, %v4153_v50 }
 0x3e8   : > { %v3578_v3 = vpop.f32.mrf.mxu1  ;;  %v4164_v4 = vor.u32 %v4162_v51, %v4160_v29  ;;  %v4168_v7 = vrot.slane %v4166_v35, 1 }
 0x3e9   : > { %7523 = vmatmul.msk.bf16.gmra.mxu2 %vm419_vm1, %v7837_v58  ;;  %v7839_v3 = vld [vmem:[%s8604_s6 + $0x6c] sm:$0xff] }
 0x3ea   : > { %v3892_v52 = vpop.f32.mrf.mxu3 }
 0x3eb   : > { %v3958_v15 = vadd.f32 %v3892_v52, %v9843_v28  ;;  %v4161_v28 = vsel %vm295_vm0, %v4156_v23, %v4160_v29 }
 0x3ec   : > { %v3771_v38 = vpop.f32.mrf.mxu2  ;;  %v3284_v56 = vpop.f32.mrf.mxu0 }
 0x3ed   : > { %v10047_v55 = vadd.f32 %v3771_v38, %v3606_v19  ;;  %v8111_v38 = vld [vmem:[%s8604_s6 + $0x70] sm:$0xff]   ;;  %v4169_v56 = vsel %vm295_vm0, %v4164_v4, %v4168_v7 }
 0x3f0   : > { %v4455_v40 = vpop.f32.mrf.mxu1 }
 0x3f2   : > { %v3894_v30 = vpop.f32.mrf.mxu3 }
 0x3f3   : > { %v3959_v34 = vadd.f32 %v3894_v30, %v9851_v25  ;;  %7450 = vmatmul.msk.bf16.gmra.mxu1 %vm419_vm1, %v4383_v41 }
 0x3f4   : > { %v3773_v2 = vpop.f32.mrf.mxu2  ;;  %v4260_v60 = vpop.f32.mrf.mxu0 }
 0x3f5   : > { %v4329_v21 = vadd.f32 %v4260_v60, %v3956_v20 }
 0x3f7   : > { %v4524_v39 = vadd.f32 %v4455_v40, %v4329_v21  ;;  %7356 = vmatmul.msk.bf16.gmra.mxu3 %vm419_vm1, %v8110_v31  ;;  %7428 = vmatmul.msk.bf16.gmra.mxu0 %vm419_vm1, %v4161_v28 }
 0x3f8   : > { %v4457_v8 = vpop.f32.mrf.mxu1 }
 0x3f9   : > { %7524 = vmatmul.msk.bf16.gmra.mxu2 %vm419_vm1, %v7838_v9 }
 0x3fa   : > { %v3897_v25 = vpop.f32.mrf.mxu3 }
 0x3fb   : > { %v3960_v42 = vadd.f32 %v3897_v25, %v9865_v43 }
 0x3fc   : > { %v4714_v18 = vpop.f32.mrf.mxu2  ;;  %v4262_v20 = vpop.f32.mrf.mxu0 }
 0x3fd   : > { %v10060_v11 = vadd.f32 %v4714_v18, %v4524_v39  ;;  %v4330_v26 = vadd.f32 %v4262_v20, %v3957_v59  ;;  %v4385_v59 = vsel %vm669_vm2, %v4382_v49, %v4384_v53 }
 0x3ff   : > { %v4525_v50 = vadd.f32 %v4457_v8, %v4330_v26  ;;  %v7840_v8 = vld [vmem:[%s8604_s6 + $0x74] sm:$0xff] }
 0x400   : > { %v4460_v22 = vpop.f32.mrf.mxu1 }
 0x402   : > { %v3899_v58 = vpop.f32.mrf.mxu3 }
 0x403   : > { %v3961_v19 = vadd.f32 %v3899_v58, %v9876_v24  ;;  %7451 = vmatmul.msk.bf16.gmra.mxu1 %vm419_vm1, %v4385_v59  ;;  %v7823_v24 = vld [vmem:[%s8604_s6 + $0x70] sm:$0xff]  ;;  %v3802_v58 = vld [vmem:[%s8604_s6 + $0x80] sm:$0xf] }
 0x404   : > { %v4716_v52 = vpop.f32.mrf.mxu2  ;;  %v4265_v43 = vpop.f32.mrf.mxu0  ;;  %v4174_v31 = vshll.u32 %v7823_v24, 16  ;;  %v4386_v39 = vrot.slane %v7823_v24, 1  ;;  %v3809_v59 = vunpack.c.l.b16 %v3802_v58 }
 0x405   : > { %v10065_v47 = vadd.f32 %v4716_v52, %v4525_v50  ;;  %v4331_v12 = vadd.f32 %v4265_v43, %v3958_v15  ;;  %v4170_v15 = vshrl.u32 %v7822_v57, 16  ;;  %v4178_v52 = vshrl.u32 %v7823_v24, 16 }
 0x406   : > { %v4176_v9 = vrot.slane %v4174_v31, 1 }
 0x407   : > { %v4526_v23 = vadd.f32 %v4460_v22, %v4331_v12  ;;  %7357 = vmatmul.msk.bf16.gmra.mxu3 %vm419_vm1, %v8111_v38  ;;  %7429 = vmatmul.msk.bf16.gmra.mxu0 %vm419_vm1, %v4169_v56  ;;  %v4172_v41 = vor.u32 %v4170_v15, %v4168_v7  ;;  %v4810_v12 = vld [vmem:[%s8604_s6 + $0x24] sm:$0xf] }
 0x408   : > { %v4462_v21 = vpop.f32.mrf.mxu1 }
 0x409   : > { %7525 = vmatmul.msk.bf16.gmra.mxu2 %vm419_vm1, %v7839_v3  ;;  %v4177_v51 = vsel %vm295_vm0, %v4172_v41, %v4176_v9  ;;  %v4180_v3 = vor.u32 %v4178_v52, %v4176_v9 }
 0x40a   : > { %v3902_v29 = vpop.f32.mrf.mxu3 }
 0x40b   : > { %v3962_v30 = vadd.f32 %v3902_v29, %v9890_v0  ;;  %v4871_v29 = vunpack.c.l.b16 %v4810_v12 }
 0x40c   : > { %v4719_v2 = vpop.f32.mrf.mxu2  ;;  %v4267_v60 = vpop.f32.mrf.mxu0 }
 0x40d   : > { %v10075_v28 = vadd.f32 %v4719_v2, %v4526_v23  ;;  %v4332_v49 = vadd.f32 %v4267_v60, %v3959_v34  ;;  %v4387_v34 = vsel %vm669_vm2, %v4384_v53, %v4386_v39 }
 0x40f   : > { %v4527_v40 = vadd.f32 %v4462_v21, %v4332_v49 }
 0x410   : > { %v4465_v26 = vpop.f32.mrf.mxu1 }
 0x412   : > { %v3904_v25 = vpop.f32.mrf.mxu3 }
 0x413   : > { %v10078_v18 = vadd.f32 %v3904_v25, %v9895_v17  ;;  %7452 = vmatmul.msk.bf16.gmra.mxu1 %vm419_vm1, %v4387_v34  ;;  %v10090_v17 = vld [vmem:[%s8604_s6 + $0x78] sm:$0xff] }
 0x414   : > { %v4721_v20 = vpop.f32.mrf.mxu2  ;;  %v4270_v0 = vpop.f32.mrf.mxu0  ;;  %v4182_v43 = vshll.u32 %v10090_v17, 16  ;;  %v4388_v24 = vrot.slane %v10090_v17, 1  ;;  %v7841_v25 = vld [vmem:[%s8604_s6 + $0x7c] sm:$0xff]  ;;  %v4186_v34 = vshrl.u32 %v10090_v17, 16 }
 0x415   : > { %v10081_v57 = vadd.f32 %v4721_v20, %v4527_v40  ;;  %v4333_v35 = vadd.f32 %v4270_v0, %v3960_v42  ;;  %v7410_v20 = vld [vmem:[%s8604_s6 + $0x80] sm:$0xf]  ;;  %v7825_v0 = vld [vmem:[%s8604_s6 + $0x80] sm:$0x10] }
 0x416   : > { %v4184_v23 = vrot.slane %v4182_v43, 1  ;;  %v4389_v9 = vsel %vm669_vm2, %v4386_v39, %v4388_v24 }
 0x417   : > { %v4528_v50 = vadd.f32 %v4465_v26, %v4333_v35  ;;  %7358 = vmatmul.msk.bf16.gmra.mxu3 %vm419_vm1, %v9868_v16  ;;  %7430 = vmatmul.msk.bf16.gmra.mxu0 %vm419_vm1, %v4177_v51  ;;  %v10122_v35 = vld [vmem:[%s8604_s6 + $0x2c] sm:$0xff]  }
 0x418   : > { %v4467_v56 = vpop.f32.mrf.mxu1  ;;  %v4185_v49 = vsel %vm295_vm0, %v4180_v3, %v4184_v23  ;;  %v4921_v58 = vshll.u32 %v10122_v35, 16  ;;  %v4188_v12 = vor.u32 %v4186_v34, %v4184_v23 }
 0x419   : > { %7526 = vmatmul.msk.bf16.gmra.mxu2 %vm419_vm1, %v7840_v8 }
 0x41a   : > { %v3907_v4 = vpop.f32.mrf.mxu3  ;;  %v4923_v17 = vrot.slane %v4921_v58, 1 }
 0x41b   : > { %v10094_v42 = vadd.f32 %v3907_v4, %v9905_v44  ;;  %v10102_v44 = vunpack.c.l.b16 %v9924_v14 }
 0x41c   : > { %v4724_v7 = vpop.f32.mrf.mxu2  ;;  %v4272_v53 = vpop.f32.mrf.mxu0 }
 0x41d   : > { %v10098_v38 = vadd.f32 %v4724_v7, %v4528_v50  ;;  %v4334_v16 = vadd.f32 %v4272_v53, %v3961_v19  ;;  %v3823_v19 = vpack.c.b16 %v3809_v59, %v3809_v59  ;;  %v4899_v21 = vpack.c.b16 %v10102_v44, %v4871_v29 }
 0x41f   : > { %v4529_v22 = vadd.f32 %v4467_v56, %v4334_v16  ;;  %v4916_v26 = vshll.u32 %v4899_v21, 16  ;;  %v4914_v7 = vshrl.u32 %v4899_v21, 16 }
 0x420   : > { %v4470_v41 = vpop.f32.mrf.mxu1 }
 0x421   : > { %v4918_v53 = vrot.slane %v4916_v26, 1 }
 0x422   : > { %v3909_v2 = vpop.f32.mrf.mxu3 }
 0x423   : > { %v10106_v60 = vadd.f32 %v3909_v2, %v9909_v61  ;;  %7453 = vmatmul.msk.bf16.gmra.mxu1 %vm419_vm1, %v4389_v9  ;;  %v10119_v61 = vor.u32 %v7825_v0, %v7410_v20  ;;  %v10151_v9 = vld [vmem:[%s8604_s6 + $0x34] sm:$0xff]  }
 0x424   : > { %v4726_v15 = vpop.f32.mrf.mxu2  ;;  %v4275_v31 = vpop.f32.mrf.mxu0  ;;  %v4929_v26 = vshll.u32 %v10151_v9, 16 }
 0x425   : > { %v10110_v40 = vadd.f32 %v4726_v15, %v4529_v22  ;;  %v4335_v14 = vadd.f32 %v4275_v31, %v3962_v30  ;;  %v4190_v4 = vshll.u32 %v10119_v61, 16  ;;  %v4919_v22 = vor.u32 %v4918_v53, %v4914_v7  ;;  %v5378_v53 = vld [vmem:[%s8604_s6 + $0x24] sm:$0x8] }
 0x426   : > { %v4390_v59 = vrot.slane %v10119_v61, 1  ;;  %v4194_v7 = vshrl.u32 %v10119_v61, 16 }
 0x427   : > { %v4530_v51 = vadd.f32 %v4470_v41, %v4335_v14  ;;  %7359 = vmatmul.msk.bf16.gmra.mxu3 %vm419_vm1, %v3823_v19  ;;  %7431 = vmatmul.msk.bf16.gmra.mxu0 %vm419_vm1, %v4185_v49  ;;  %v4924_v15 = vsel %vm295_vm0, %v4919_v22, %v4923_v17  ;;  %v7842_v14 = vld [vmem:[%s8604_s6 + $0x84] sm:$0xff] }
 0x428   : > { %v4472_v16 = vpop.f32.mrf.mxu1  ;;  %v4391_v21 = vsel %vm669_vm2, %v4388_v24, %v4390_v59 }
 0x429   : > { %7527 = vmatmul.msk.bf16.gmra.mxu2 %vm419_vm1, %v7841_v25 }
 0x42a   : > { %v3912_v30 = vpop.f32.mrf.mxu3 }
 0x42b   : > { %v10126_v39 = vadd.f32 %v3912_v30, %v9920_v5  ;;  %v4192_v5 = vrot.slane %v4190_v4, 1 }
 0x42c   : > { %v4729_v8 = vpop.f32.mrf.mxu2  ;;  %v4277_v50 = vpop.f32.mrf.mxu0 }
 0x42d   : > { %v10131_v52 = vadd.f32 %v4729_v8, %v4530_v51  ;;  %v4336_v43 = vadd.f32 %v4277_v50, %v10078_v18  ;;  %v4193_v18 = vsel %vm295_vm0, %v4188_v12, %v4192_v5  ;;  %v4925_v51 = vshrl.u32 %v10122_v35, 16  ;;  %v4577_v50 = vld [vmem:[%s8604_s6 + $0x8c] sm:$0xf] }
 0x42e   : > { %v4636_v12 = vunpack.c.l.b16 %v4577_v50 }
 0x42f   : > { %v4531_v56 = vadd.f32 %v4472_v16, %v4336_v43  ;;  %v7868_v43 = vld [vmem:[#allocation2 + $0x188] sm:$0xff]  ;;  %v4927_v16 = vor.u32 %v4925_v51, %v4923_v17 }
 0x430   : > { %v4475_v49 = vpop.f32.mrf.mxu1  ;;  %6178 = vmatpush.bf16.msra.mxu0 %v7868_v43 }
 0x432   : > { %v3914_v3 = vpop.f32.mrf.mxu3 }
 0x433   : > { %v10138_v29 = vadd.f32 %v3914_v3, %v9927_v1  ;;  %v7854_v1 = vld [vmem:[#allocation2 + $0x178] sm:$0xff]  ;;  %7454 = vmatmul.msk.bf16.gmra.mxu1 %vm419_vm1, %v4391_v21  ;;  %v5387_v3 = vunpack.c.l.b16 %v5378_v53  ;;  %v5183_v21 = vld [vmem:[%s8604_s6 + $0x24] sm:$0xe]  ;;  %v5594_v53 = vrot.slane %v4925_v51, 3 }
 0x434   : > { %v4731_v2 = vpop.f32.mrf.mxu2  ;;  %v4280_v19 = vpop.f32.mrf.mxu0  ;;  %5889 = vmatpush.bf16.msra.mxu3 %v7854_v1 }
 0x435   : > { %v10142_v31 = vadd.f32 %v4731_v2, %v4531_v56  ;;  %v4337_v23 = vadd.f32 %v4280_v19, %v10094_v42  ;;  %v7872_v42 = vld [vmem:[#allocation2 + $0x1a8] sm:$0xff]  ;;  %v4931_v56 = vrot.slane %v4929_v26, 1  ;;  %v4196_v2 = vor.u32 %v4194_v7, %v4192_v5 }
 0x436   : > { %6666 = vmatpush.bf16.msra.mxu2 %v7872_v42  ;;  %v5190_v5 = vunpack.c.l.b16 %v5183_v21 }
 0x437   : > { %v4532_v41 = vadd.f32 %v4475_v49, %v4337_v23  ;;  %7432 = vmatmul.msk.bf16.gmra.mxu0 %vm419_vm1, %v4193_v18  ;;  %7538 = vmatmul.msk.bf16.vlgmr.msrb.gmra.mxu3 %vm419_vm1, %v4924_v15  ;;  %v4932_v18 = vsel %vm295_vm0, %v4927_v16, %v4931_v56  ;;  %v4650_v49 = vpack.c.b16 %v4636_v12, %v4636_v12 }
 0x438   : > { %v4477_v8 = vpop.f32.mrf.mxu1  ;;  %v5191_v50 = vpack.c.b16 %v10102_v44, %v5190_v5 }
 0x439   : > { %7528 = vmatmul.msk.bf16.gmra.mxu2 %vm419_vm1, %v7842_v14  ;;  %v5389_v14 = vpack.c.b16 %v10102_v44, %v5387_v3 }
 0x43a   : > { %v3917_v25 = vpop.f32.mrf.mxu3  ;;  %v5192_v3 = vrot.slane %v5191_v50, 1 }
 0x43b   : > { %v10155_v24 = vadd.f32 %v3917_v25, %v9938_v6  ;;  %v7870_v6 = vld [vmem:[#allocation2 + $0x198] sm:$0xff]  ;;  %v5587_v42 = vshrl.u32 %v5389_v14, 16  ;;  %v5391_v44 = vrot.slane %v5389_v14, 3 }
 0x43c   : > { %v4734_v20 = vpop.f32.mrf.mxu2  ;;  %v4282_v0 = vpop.f32.mrf.mxu0  ;;  %6471 = vmatpush.bf16.msra.mxu1 %v7870_v6 }
 0x43d   : > { %v10159_v30 = vadd.f32 %v4734_v20, %v4532_v41  ;;  %v4338_v34 = vadd.f32 %v4282_v0, %v10106_v60  ;;  %v5589_v43 = vrot.slane %v5587_v42, 3 }
 0x43f   : > { %v4533_v4 = vadd.f32 %v4477_v8, %v4338_v34  ;;  %v4933_v34 = vshrl.u32 %v10151_v9, 16 }
 0x440   : > { %v4480_v23 = vpop.f32.mrf.mxu1 }
 0x441   : > { %v4935_v12 = vor.u32 %v4933_v34, %v4931_v56 }
 0x442   : > { %v3919_v22 = vpop.f32.mrf.mxu3 }
 0x443   : > { %v10168_v60 = vadd.f32 %v3919_v22, %v9943_v62  ;;  %7455 = vmatmul.msk.bf16.gmra.mxu1 %vm419_vm1, %v4390_v59  ;;  %v10180_v62 = vld [vmem:[%s8604_s6 + $0x3c] sm:$0xff]  }
 0x444   : > { %v4736_v19 = vpop.f32.mrf.mxu2  ;;  %v4285_v61 = vpop.f32.mrf.mxu0  ;;  %v4937_v8 = vshll.u32 %v10180_v62, 16 }
 0x445   : > { %v10171_v15 = vadd.f32 %v4736_v19, %v4533_v4  ;;  %v4339_v17 = vadd.f32 %v4285_v61, %v10126_v39  ;;  %v5590_v39 = vshll.u32 %v5389_v14, 16  ;;  %v5392_v19 = vrot.slane %v10122_v35, 3 }
 0x446   : > { %v4939_v22 = vrot.slane %v4937_v8, 1 }
 0x447   : > { %v4534_v41 = vadd.f32 %v4480_v23, %v4339_v17  ;;  %7433 = vmatmul.msk.bf16.gmra.mxu0 %vm419_vm1, %v4196_v2  ;;  %7539 = vmatmul.msk.bf16.gmra.mxu3 %vm419_vm1, %v4932_v18  ;;  %v5592_v6 = vrot.slane %v5590_v39, 4  ;;  %v5193_v2 = vrot.slane %v10122_v35, 1  ;;  %v5393_v14 = vsel %vm869_vm3, %v5391_v44, %v5392_v19 }
 0x448   : > { %v4482_v7 = vpop.f32.mrf.mxu1 }
 0x449   : > { %7529 = vmatmul.msk.bf16.gmra.mxu2 %vm419_vm1, %v4650_v49  ;;  %v5194_v56 = vsel %vm669_vm2, %v5192_v3, %v5193_v2 }
 0x44a   : > { %v3922_v1 = vpop.f32.mrf.mxu3 }
 0x44b   : > { %v10184_v25 = vadd.f32 %v3922_v1, %v9953_v10  ;;  %v5595_v10 = vrot.slane %v4921_v58, 4  ;;  %v4940_v58 = vsel %vm295_vm0, %v4935_v12, %v4939_v22  ;;  %v5394_v12 = vrot.slane %v10151_v9, 3 }
 0x44c   : > { %v4739_v20 = vpop.f32.mrf.mxu2  ;;  %v4287_v0 = vpop.f32.mrf.mxu0 }
 0x44d   : > { %v10189_v59 = vadd.f32 %v4739_v20, %v4534_v41  ;;  %v4340_v4 = vadd.f32 %v4287_v0, %v10138_v29  ;;  %v5593_v29 = vor.u32 %v5592_v6, %v5589_v43  ;;  %v5596_v51 = vor.u32 %v5595_v10, %v5594_v53 }
 0x44e   : > { %v4941_v20 = vshrl.u32 %v10180_v62, 16  ;;  %v5598_v53 = vrot.slane %v4933_v34, 3  ;;  %v5599_v43 = vrot.slane %v4929_v26, 4 }
 0x44f   : > { %v4535_v16 = vadd.f32 %v4482_v7, %v4340_v4  ;;  %v5597_v35 = vsel %vm1065_vm4, %v5593_v29, %v5596_v51 }
 0x450   : > { %v4485_v41 = vpop.f32.mrf.mxu1  ;;  %v4943_v10 = vor.u32 %v4941_v20, %v4939_v22  ;;  %v5600_v44 = vor.u32 %v5599_v43, %v5598_v53  ;;  %v5396_v53 = vrot.slane %v10180_v62, 3 }
 0x452   : > { %v3924_v61 = vpop.f32.mrf.mxu3 }
 0x453   : > { %v3971_v18 = vadd.f32 %v3924_v61, %v9958_v32  ;;  %7582 = vmatmul.msk.bf16.vlgmr.msrb.gmra.mxu1 %vm419_vm1, %v5393_v14  ;;  %v10210_v32 = vld [vmem:[%s8604_s6 + $0x44] sm:$0xff]  }
 0x454   : > { %v4741_v17 = vpop.f32.mrf.mxu2  ;;  %v4290_v23 = vpop.f32.mrf.mxu0  ;;  %v4945_v0 = vshll.u32 %v10210_v32, 16 }
 0x455   : > { %v10201_v49 = vadd.f32 %v4741_v17, %v4535_v16  ;;  %v4341_v21 = vadd.f32 %v4290_v23, %v10155_v24  ;;  %v5195_v16 = vrot.slane %v10151_v9, 1  ;;  %v5601_v9 = vsel %vm1065_vm4, %v5596_v51, %v5600_v44 }
 0x457   : > { %v4536_v5 = vadd.f32 %v4485_v41, %v4341_v21  ;;  %7540 = vmatmul.msk.bf16.gmra.mxu3 %vm419_vm1, %v4940_v58  ;;  %7560 = vmatmul.msk.bf16.vlgmr.msrb.gmra.mxu0 %vm419_vm1, %v5194_v56  ;;  %v5196_v26 = vsel %vm669_vm2, %v5193_v2, %v5195_v16  ;;  %v5395_v58 = vsel %vm869_vm3, %v5392_v19, %v5394_v12  ;;  %v4949_v19 = vshrl.u32 %v10210_v32, 16 }
 0x458   : > { %v4487_v7 = vpop.f32.mrf.mxu1 }
 0x459   : > { %7604 = vmatmul.msk.bf16.vlgmr.msrb.gmra.mxu2 %vm419_vm1, %v5597_v35 }
 0x45a   : > { %v3927_v1 = vpop.f32.mrf.mxu3 }
 0x45b   : > { %v3972_v42 = vadd.f32 %v3927_v1, %v9968_v45  ;;  %v4947_v45 = vrot.slane %v4945_v0, 1  ;;  %v5602_v1 = vrot.slane %v4941_v20, 3 }
 0x45c   : > { %v4744_v24 = vpop.f32.mrf.mxu2  ;;  %v4292_v39 = vpop.f32.mrf.mxu0 }
 0x45d   : > { %v10216_v50 = vadd.f32 %v4744_v24, %v4536_v5  ;;  %v4342_v4 = vadd.f32 %v4292_v39, %v10168_v60  ;;  %v4948_v34 = vsel %vm295_vm0, %v4943_v10, %v4947_v45  ;;  %v5603_v24 = vrot.slane %v4937_v8, 4 }
 0x45f   : > { %v4537_v6 = vadd.f32 %v4487_v7, %v4342_v4  ;;  %v4951_v4 = vor.u32 %v4949_v19, %v4947_v45 }
 0x460   : > { %v4490_v23 = vpop.f32.mrf.mxu1 }
 0x462   : > { %v3929_v3 = vpop.f32.mrf.mxu3 }
 0x463   : > { %v3973_v61 = vadd.f32 %v3929_v3, %v9973_v46  ;;  %7583 = vmatmul.msk.bf16.gmra.mxu1 %vm419_vm1, %v5395_v58  ;;  %v10237_v46 = vld [vmem:[%s8604_s6 + $0x4c] sm:$0xff]  }
 0x464   : > { %v4746_v60 = vpop.f32.mrf.mxu2  ;;  %v4295_v29 = vpop.f32.mrf.mxu0  ;;  %v4953_v51 = vshll.u32 %v10237_v46, 16 }
 0x465   : > { %v10228_v17 = vadd.f32 %v4746_v60, %v4537_v6  ;;  %v4343_v22 = vadd.f32 %v4295_v29, %v10184_v25  ;;  %v5604_v6 = vor.u32 %v5603_v24, %v5602_v1  ;;  %v5398_v1 = vrot.slane %v10210_v32, 3 }
 0x466   : > { %v4955_v7 = vrot.slane %v4953_v51, 1 }
 0x467   : > { %v4538_v56 = vadd.f32 %v4490_v23, %v4343_v22  ;;  %7541 = vmatmul.msk.bf16.gmra.mxu3 %vm419_vm1, %v4948_v34  ;;  %7561 = vmatmul.msk.bf16.gmra.mxu0 %vm419_vm1, %v5196_v26  ;;  %v5397_v34 = vsel %vm869_vm3, %v5394_v12, %v5396_v53  ;;  %v5605_v26 = vsel %vm1065_vm4, %v5600_v44, %v5604_v6  ;;  %v4957_v12 = vshrl.u32 %v10237_v46, 16 }
 0x468   : > { %v4492_v5 = vpop.f32.mrf.mxu1  ;;  %v4956_v20 = vsel %vm295_vm0, %v4951_v4, %v4955_v7 }
 0x469   : > { %7605 = vmatmul.msk.bf16.gmra.mxu2 %vm419_vm1, %v5601_v9 }
 0x46a   : > { %v3932_v2 = vpop.f32.mrf.mxu3 }
 0x46b   : > { %v3974_v21 = vadd.f32 %v3932_v2, %v9983_v54  ;;  %v5197_v54 = vrot.slane %v10180_v62, 1  ;;  %v5606_v2 = vrot.slane %v4949_v19, 3 }
 0x46c   : > { %v4749_v25 = vpop.f32.mrf.mxu2  ;;  %v4297_v41 = vpop.f32.mrf.mxu0 }
 0x46d   : > { %v10243_v14 = vadd.f32 %v4749_v25, %v4538_v56  ;;  %v4344_v35 = vadd.f32 %v4297_v41, %v3971_v18  ;;  %v5198_v8 = vsel %vm669_vm2, %v5195_v16, %v5197_v54  ;;  %v5607_v25 = vrot.slane %v4945_v0, 4 }
 0x46f   : > { %v4539_v39 = vadd.f32 %v4492_v5, %v4344_v35  ;;  %v4959_v35 = vor.u32 %v4957_v12, %v4955_v7 }
 0x470   : > { %v4495_v29 = vpop.f32.mrf.mxu1 }
 0x472   : > { %v3934_v43 = vpop.f32.mrf.mxu3 }
 0x473   : > { %v3975_v10 = vadd.f32 %v3934_v43, %v9988_v33  ;;  %7584 = vmatmul.msk.bf16.gmra.mxu1 %vm419_vm1, %v5397_v34  ;;  %v10262_v33 = vld [vmem:[%s8604_s6 + $0x54] sm:$0xff]  }
 0x474   : > { %v4751_v18 = vpop.f32.mrf.mxu2  ;;  %v4300_v3 = vpop.f32.mrf.mxu0  ;;  %v4961_v44 = vshll.u32 %v10262_v33, 16 }
 0x475   : > { %v10254_v60 = vadd.f32 %v4751_v18, %v4539_v39  ;;  %v4345_v45 = vadd.f32 %v4300_v3, %v3972_v42  ;;  %v5608_v39 = vor.u32 %v5607_v25, %v5606_v2  ;;  %v5400_v2 = vrot.slane %v10237_v46, 3 }
 0x476   : > { %v4963_v5 = vrot.slane %v4961_v44, 1 }
 0x477   : > { %v4540_v62 = vadd.f32 %v4495_v29, %v4345_v45  ;;  %7542 = vmatmul.msk.bf16.gmra.mxu3 %vm419_vm1, %v4956_v20  ;;  %7562 = vmatmul.msk.bf16.gmra.mxu0 %vm419_vm1, %v5198_v8  ;;  %v5399_v20 = vsel %vm869_vm3, %v5396_v53, %v5398_v1  ;;  %v5609_v8 = vsel %vm1065_vm4, %v5604_v6, %v5608_v39  ;;  %v4965_v53 = vshrl.u32 %v10262_v33, 16 }
 0x478   : > { %v4497_v56 = vpop.f32.mrf.mxu1  ;;  %v4964_v19 = vsel %vm295_vm0, %v4959_v35, %v4963_v5 }
 0x479   : > { %7606 = vmatmul.msk.bf16.gmra.mxu2 %vm419_vm1, %v5605_v26 }
 0x47a   : > { %v3937_v16 = vpop.f32.mrf.mxu3 }
 0x47b   : > { %v3976_v22 = vadd.f32 %v3937_v16, %v10001_v27  ;;  %v5199_v27 = vrot.slane %v10210_v32, 1  ;;  %v5610_v16 = vrot.slane %v4957_v12, 3 }
 0x47c   : > { %v4754_v42 = vpop.f32.mrf.mxu2  ;;  %v4302_v23 = vpop.f32.mrf.mxu0 }
 0x47d   : > { %v10268_v58 = vadd.f32 %v4754_v42, %v4540_v62  ;;  %v4346_v9 = vadd.f32 %v4302_v23, %v3973_v61  ;;  %v5200_v0 = vsel %vm669_vm2, %v5197_v54, %v5199_v27  ;;  %v5611_v42 = vrot.slane %v4953_v51, 4 }
 0x47f   : > { %v4541_v41 = vadd.f32 %v4497_v56, %v4346_v9  ;;  %v4967_v9 = vor.u32 %v4965_v53, %v4963_v5 }
 0x480   : > { %v4500_v3 = vpop.f32.mrf.mxu1 }
 0x482   : > { %v3939_v24 = vpop.f32.mrf.mxu3 }
 0x483   : > { %v3977_v4 = vadd.f32 %v3939_v24, %v10007_v48  ;;  %7585 = vmatmul.msk.bf16.gmra.mxu1 %vm419_vm1, %v5399_v20  ;;  %v10287_v48 = vld [vmem:[%s8604_s6 + $0x5c] sm:$0xff]  }
 0x484   : > { %v4756_v61 = vpop.f32.mrf.mxu2  ;;  %v4305_v43 = vpop.f32.mrf.mxu0  ;;  %v4969_v6 = vshll.u32 %v10287_v48, 16 }
 0x485   : > { %v10279_v18 = vadd.f32 %v4756_v61, %v4541_v41  ;;  %v4347_v7 = vadd.f32 %v4305_v43, %v3974_v21  ;;  %v5612_v41 = vor.u32 %v5611_v42, %v5610_v16  ;;  %v5402_v16 = vrot.slane %v10262_v33, 3 }
 0x486   : > { %v4971_v56 = vrot.slane %v4969_v6, 1 }
 0x487   : > { %v4542_v32 = vadd.f32 %v4500_v3, %v4347_v7  ;;  %7543 = vmatmul.msk.bf16.gmra.mxu3 %vm419_vm1, %v4964_v19  ;;  %7563 = vmatmul.msk.bf16.gmra.mxu0 %vm419_vm1, %v5200_v0  ;;  %v5401_v19 = vsel %vm869_vm3, %v5398_v1, %v5400_v2  ;;  %v5613_v0 = vsel %vm1065_vm4, %v5608_v39, %v5612_v41  ;;  %v4973_v1 = vshrl.u32 %v10287_v48, 16 }
 0x488   : > { %v4502_v62 = vpop.f32.mrf.mxu1  ;;  %v4972_v12 = vsel %vm295_vm0, %v4967_v9, %v4971_v56 }
 0x489   : > { %7607 = vmatmul.msk.bf16.gmra.mxu2 %vm419_vm1, %v5609_v8 }
 0x48a   : > { %v3942_v54 = vpop.f32.mrf.mxu3 }
 0x48b   : > { %v3978_v45 = vadd.f32 %v3942_v54, %v10018_v36  ;;  %v5201_v36 = vrot.slane %v10237_v46, 1  ;;  %v5614_v54 = vrot.slane %v4965_v53, 3 }
 0x48c   : > { %v4759_v21 = vpop.f32.mrf.mxu2  ;;  %v4307_v29 = vpop.f32.mrf.mxu0 }
 0x48d   : > { %v10293_v34 = vadd.f32 %v4759_v21, %v4542_v32  ;;  %v4348_v26 = vadd.f32 %v4307_v29, %v3975_v10  ;;  %v5202_v51 = vsel %vm669_vm2, %v5199_v27, %v5201_v36  ;;  %v5615_v21 = vrot.slane %v4961_v44, 4 }
 0x48f   : > { %v4543_v23 = vadd.f32 %v4502_v62, %v4348_v26  ;;  %v4975_v26 = vor.u32 %v4973_v1, %v4971_v56  ;;  %v5203_v62 = vrot.slane %v10262_v33, 1 }
 0x490   : > { %v4505_v43 = vpop.f32.mrf.mxu1 }
 0x491   : > { %v5204_v44 = vsel %vm669_vm2, %v5201_v36, %v5203_v62  ;;  %v7871_v36 = vld [vmem:[#allocation2 + $0x1a0] sm:$0xff] }
 0x492   : > { %v3944_v25 = vpop.f32.mrf.mxu3  ;;  %6667 = vmatpush.bf16.msra.mxu2 %v7871_v36 }
 0x493   : > { %v3979_v35 = vadd.f32 %v3944_v25, %v10022_v63  ;;  %7586 = vmatmul.msk.bf16.gmra.mxu1 %vm419_vm1, %v5401_v19  ;;  %v10312_v63 = vld [vmem:[%s8604_s6 + $0x64] sm:$0xff]  }
 0x494   : > { %v4761_v10 = vpop.f32.mrf.mxu2  ;;  %v4310_v24 = vpop.f32.mrf.mxu0  ;;  %v4977_v39 = vshll.u32 %v10312_v63, 16  ;;  %v4981_v19 = vshrl.u32 %v10312_v63, 16 }
 0x495   : > { %v10304_v61 = vadd.f32 %v4761_v10, %v4543_v23  ;;  %v4349_v5 = vadd.f32 %v4310_v24, %v3976_v22  ;;  %v5616_v23 = vor.u32 %v5615_v21, %v5614_v54  ;;  %v5619_v54 = vrot.slane %v4969_v6, 4 }
 0x497   : > { %v4544_v46 = vadd.f32 %v4505_v43, %v4349_v5  ;;  %7544 = vmatmul.msk.bf16.gmra.mxu3 %vm419_vm1, %v4972_v12  ;;  %7564 = vmatmul.msk.bf16.gmra.mxu0 %vm419_vm1, %v5202_v51  ;;  %v5403_v12 = vsel %vm869_vm3, %v5400_v2, %v5402_v16  ;;  %v5617_v33 = vsel %vm1065_vm4, %v5612_v41, %v5616_v23  ;;  %v10341_v5 = vld [vmem:[%s8604_s6 + $0x6c] sm:$0xff]  }
 0x498   : > { %v4507_v32 = vpop.f32.mrf.mxu1 }
 0x499   : > { %7608 = vmatmul.msk.bf16.gmra.mxu2 %vm419_vm1, %v5613_v0  ;;  %v4985_v0 = vshll.u32 %v10341_v5, 16 }
 0x49a   : > { %v3947_v27 = vpop.f32.mrf.mxu3 }
 0x49b   : > { %v10316_v7 = vadd.f32 %v3947_v27, %v10032_v13  ;;  %v4979_v13 = vrot.slane %v4977_v39, 1 }
 0x49c   : > { %v4764_v22 = vpop.f32.mrf.mxu2  ;;  %v4312_v3 = vpop.f32.mrf.mxu0 }
 0x49d   : > { %v10320_v20 = vadd.f32 %v4764_v22, %v4544_v46  ;;  %v4350_v8 = vadd.f32 %v4312_v3, %v3977_v4  ;;  %v4980_v25 = vsel %vm295_vm0, %v4975_v26, %v4979_v13  ;;  %v7867_v3 = vld [vmem:[#allocation2 + $0x180] sm:$0xff]  ;;  %v5205_v26 = vrot.slane %v10287_v48, 1 }
 0x49e   : > { %6179 = vmatpush.bf16.msra.mxu0 %v7867_v3 }
 0x49f   : > { %v4545_v29 = vadd.f32 %v4507_v32, %v4350_v8  ;;  %v7869_v8 = vld [vmem:[#allocation2 + $0x190] sm:$0xff]  ;;  %v5618_v32 = vrot.slane %v4973_v1, 3  ;;  %v5206_v6 = vsel %vm669_vm2, %v5203_v62, %v5205_v26 }
 0x4a0   : > { %v4510_v24 = vpop.f32.mrf.mxu1  ;;  %6472 = vmatpush.bf16.msra.mxu1 %v7869_v8  ;;  %v5207_v8 = vrot.slane %v10312_v63, 1 }
 0x4a2   : > { %v3949_v42 = vpop.f32.mrf.mxu3 }
 0x4a3   : > { %v10329_v9 = vadd.f32 %v3949_v42, %v10037_v37  ;;  %v7853_v37 = vld [vmem:[#allocation2 + $0x170] sm:$0xff]  ;;  %7587 = vmatmul.msk.bf16.gmra.mxu1 %vm419_vm1, %v5403_v12  ;;  %v5404_v42 = vrot.slane %v10287_v48, 3 }
 0x4a4   : > { %v4766_v4 = vpop.f32.mrf.mxu2  ;;  %v4315_v53 = vpop.f32.mrf.mxu0  ;;  %5890 = vmatpush.bf16.msra.mxu3 %v7853_v37  ;;  %v10366_v48 = vld [vmem:[%s8604_s6 + $0x74] sm:$0xff]  }
 0x4a5   : > { %v10333_v56 = vadd.f32 %v4766_v4, %v4545_v29  ;;  %v4351_v10 = vadd.f32 %v4315_v53, %v3978_v45  ;;  %v4987_v29 = vrot.slane %v4985_v0, 1  ;;  %v5620_v4 = vor.u32 %v5619_v54, %v5618_v32 }
 0x4a6   : > { %v5406_v32 = vrot.slane %v10312_v63, 3 }
 0x4a7   : > { %v4546_v51 = vadd.f32 %v4510_v24, %v4351_v10  ;;  %7545 = vmatmul.msk.bf16.gmra.mxu3 %vm419_vm1, %v4980_v25  ;;  %7565 = vmatmul.msk.bf16.gmra.mxu0 %vm419_vm1, %v5204_v44  ;;  %v5405_v24 = vsel %vm869_vm3, %v5402_v16, %v5404_v42  ;;  %v5621_v12 = vsel %vm1065_vm4, %v5616_v23, %v5620_v4  ;;  %v4989_v16 = vshrl.u32 %v10341_v5, 16 }
 0x4a8   : > { %v4512_v22 = vpop.f32.mrf.mxu1  ;;  %v4993_v23 = vshll.u32 %v10366_v48, 16 }
 0x4a9   : > { %7609 = vmatmul.msk.bf16.gmra.mxu2 %vm419_vm1, %v5617_v33  ;;  %v4991_v3 = vor.u32 %v4989_v16, %v4987_v29 }
 0x4aa   : > { %v3952_v45 = vpop.f32.mrf.mxu3 }
 0x4ab   : > { %v3982_v43 = vadd.f32 %v3952_v45, %v10047_v55  ;;  %v4983_v55 = vor.u32 %v4981_v19, %v4979_v13 }
 0x4ac   : > { %v4769_v2 = vpop.f32.mrf.mxu2  ;;  %v4317_v41 = vpop.f32.mrf.mxu0 }
 0x4ad   : > { %v10347_v46 = vadd.f32 %v4769_v2, %v4546_v51  ;;  %v4352_v27 = vadd.f32 %v4317_v41, %v3979_v35  ;;  %v4988_v1 = vsel %vm295_vm0, %v4983_v55, %v4987_v29  ;;  %v5622_v41 = vrot.slane %v4981_v19, 3 }
 0x4af   : > { %v4547_v21 = vadd.f32 %v4512_v22, %v4352_v27  ;;  %v5623_v27 = vrot.slane %v4977_v39, 4  ;;  %v5208_v39 = vsel %vm669_vm2, %v5205_v26, %v5207_v8 }
 0x4b0   : > { %v4515_v10 = vpop.f32.mrf.mxu1 }
 0x4b2   : > { %v3954_v35 = vpop.f32.mrf.mxu3 }
 0x4b3   : > { %7588 = vmatmul.msk.bf16.gmra.mxu1 %vm419_vm1, %v5405_v24 }
 0x4b4   : > { %v4771_v53 = vpop.f32.mrf.mxu2  ;;  %v4320_v25 = vpop.f32.mrf.mxu0 }
 0x4b5   : > { %v10357_v44 = vadd.f32 %v4771_v53, %v4547_v21  ;;  %v4353_v13 = vadd.f32 %v4320_v25, %v10316_v7  ;;  %v5624_v21 = vor.u32 %v5623_v27, %v5622_v41 }
 0x4b7   : > { %v4548_v33 = vadd.f32 %v4515_v10, %v4353_v13  ;;  %7546 = vmatmul.msk.bf16.gmra.mxu3 %vm419_vm1, %v4988_v1  ;;  %7566 = vmatmul.msk.bf16.gmra.mxu0 %vm419_vm1, %v5206_v6  ;;  %v5407_v1 = vsel %vm869_vm3, %v5404_v42, %v5406_v32  ;;  %v5625_v6 = vsel %vm1065_vm4, %v5620_v4, %v5624_v21  ;;  %v4997_v42 = vshrl.u32 %v10366_v48, 16 }
 0x4b8   : > { %v4517_v2 = vpop.f32.mrf.mxu1 }
 0x4b9   : > { %7610 = vmatmul.msk.bf16.gmra.mxu2 %vm419_vm1, %v5621_v12 }
 0x4ba   : > { %v5087_v62 = vpop.f32.mrf.mxu3 }
 0x4bb   : > { %v5156_v51 = vadd.f32 %v5087_v62, %v10060_v11  ;;  %v4995_v11 = vrot.slane %v4993_v23, 1  ;;  %v5627_v62 = vrot.slane %v4985_v0, 4 }
 0x4bc   : > { %v4774_v7 = vpop.f32.mrf.mxu2  ;;  %v4322_v37 = vpop.f32.mrf.mxu0 }
 0x4bd   : > { %v10372_v36 = vadd.f32 %v4774_v7, %v4548_v33  ;;  %v4354_v45 = vadd.f32 %v4322_v37, %v10329_v9  ;;  %v4996_v19 = vsel %vm295_vm0, %v4991_v3, %v4995_v11  ;;  %v5626_v33 = vrot.slane %v4989_v16, 3 }
 0x4be   : > { %v4999_v7 = vor.u32 %v4997_v42, %v4995_v11 }
 0x4bf   : > { %v4549_v22 = vadd.f32 %v4517_v2, %v4354_v45  ;;  %v5209_v45 = vrot.slane %v10341_v5, 1  ;;  %v5628_v41 = vor.u32 %v5627_v62, %v5626_v33  ;;  %v10430_v33 = vld [vmem:[%s8604_s6 + $0x88] sm:$0xff]   ;;  %v4837_v62 = vld [vmem:[%s8604_s6 + $0x90] sm:$0x1] }
 0x4c0   : > { %v4520_v25 = vpop.f32.mrf.mxu1 }
 0x4c2   : > { %v5089_v54 = vpop.f32.mrf.mxu3 }
 0x4c3   : > { %v5157_v55 = vadd.f32 %v5089_v54, %v10065_v47  ;;  %7589 = vmatmul.msk.bf16.gmra.mxu1 %vm419_vm1, %v5407_v1  ;;  %v10392_v47 = vld [vmem:[%s8604_s6 + $0x7c] sm:$0xff]   ;;  %v5210_v54 = vsel %vm669_vm2, %v5207_v8, %v5209_v45 }
 0x4c4   : > { %v4776_v9 = vpop.f32.mrf.mxu2  ;;  %v4325_v35 = vpop.f32.mrf.mxu0  ;;  %v5001_v4 = vshll.u32 %v10392_v47, 16 }
 0x4c5   : > { %v10384_v53 = vadd.f32 %v4776_v9, %v4549_v22  ;;  %v4355_v29 = vadd.f32 %v4325_v35, %v3982_v43  ;;  %v5629_v35 = vsel %vm1065_vm4, %v5624_v21, %v5628_v41  ;;  %v5005_v21 = vshrl.u32 %v10392_v47, 16 }
 0x4c6   : > { %v5003_v37 = vrot.slane %v5001_v4, 1 }
 0x4c7   : > { %v4550_v63 = vadd.f32 %v4520_v25, %v4355_v29  ;;  %7547 = vmatmul.msk.bf16.gmra.mxu3 %vm419_vm1, %v4996_v19  ;;  %7567 = vmatmul.msk.bf16.gmra.mxu0 %vm419_vm1, %v5208_v39 }
 0x4c8   : > { %v4522_v12 = vpop.f32.mrf.mxu1  ;;  %v5004_v16 = vsel %vm295_vm0, %v4999_v7, %v5003_v37 }
 0x4c9   : > { %7611 = vmatmul.msk.bf16.gmra.mxu2 %vm419_vm1, %v5625_v6  ;;  %v5630_v6 = vrot.slane %v4997_v42, 3  ;;  %v5410_v12 = vrot.slane %v10366_v48, 3 }
 0x4ca   : > { %v5092_v26 = vpop.f32.mrf.mxu3 }
 0x4cb   : > { %v5158_v13 = vadd.f32 %v5092_v26, %v10075_v28  ;;  %v5408_v28 = vrot.slane %v10341_v5, 3 }
 0x4cc   : > { %v4779_v43 = vpop.f32.mrf.mxu2  ;;  %v4327_v10 = vpop.f32.mrf.mxu0 }
 0x4cd   : > { %v10398_v24 = vadd.f32 %v4779_v43, %v4550_v63  ;;  %v5409_v9 = vsel %vm869_vm3, %v5406_v32, %v5408_v28  ;;  %v5631_v63 = vrot.slane %v4993_v23, 4  ;;  %v5007_v43 = vor.u32 %v5005_v21, %v5003_v37 }
 0x4ce   : > { %v5211_v10 = vrot.slane %v10366_v48, 1 }
 0x4d0   : > { %v5481_v11 = vpop.f32.mrf.mxu1  ;;  %v5212_v37 = vsel %vm669_vm2, %v5209_v45, %v5211_v10 }
 0x4d2   : > { %v5094_v2 = vpop.f32.mrf.mxu3 }
 0x4d3   : > { %v5159_v27 = vadd.f32 %v5094_v2, %v10081_v57  ;;  %7590 = vmatmul.msk.bf16.gmra.mxu1 %vm419_vm1, %v5409_v9  ;;  %v10415_v57 = vld [vmem:[%s8604_s6 + $0x84] sm:$0xff]   ;;  %v5632_v2 = vor.u32 %v5631_v63, %v5630_v6  ;;  %v5635_v6 = vrot.slane %v5001_v4, 4 }
 0x4d4   : > { %v4781_v22 = vpop.f32.mrf.mxu2  ;;  %v5282_v3 = vpop.f32.mrf.mxu0  ;;  %v5009_v39 = vshll.u32 %v10415_v57, 16 }
 0x4d5   : > { %v5351_v0 = vadd.f32 %v5282_v3, %v5156_v51  ;;  %v10437_v3 = vunpack.c.h.b16 %v10430_v33  ;;  %v5633_v9 = vsel %vm1065_vm4, %v5628_v41, %v5632_v2 }
 0x4d7   : > { %v5550_v19 = vadd.f32 %v5481_v11, %v5351_v0  ;;  %7548 = vmatmul.msk.bf16.gmra.mxu3 %vm419_vm1, %v5004_v16  ;;  %7568 = vmatmul.msk.bf16.gmra.mxu0 %vm419_vm1, %v5210_v54  ;;  %v4898_v16 = vunpack.c.l.b16 %v4837_v62  ;;  %v5411_v11 = vsel %vm869_vm3, %v5408_v28, %v5410_v12  ;;  %v5013_v28 = vshrl.u32 %v10415_v57, 16 }
 0x4d8   : > { %v5483_v1 = vpop.f32.mrf.mxu1  ;;  %v5213_v62 = vrot.slane %v10392_v47, 1 }
 0x4d9   : > { %7612 = vmatmul.msk.bf16.gmra.mxu2 %vm419_vm1, %v5629_v35 }
 0x4da   : > { %v5097_v5 = vpop.f32.mrf.mxu3 }
 0x4db   : > { %v5160_v51 = vadd.f32 %v5097_v5, %v10098_v38  ;;  %v5011_v38 = vrot.slane %v5009_v39, 1 }
 0x4dc   : > { %v5714_v8 = vpop.f32.mrf.mxu2  ;;  %v5284_v32 = vpop.f32.mrf.mxu0 }
 0x4dd   : > { %v10421_v29 = vadd.f32 %v5714_v8, %v5550_v19  ;;  %v5352_v25 = vadd.f32 %v5284_v32, %v5157_v55  ;;  %v5012_v23 = vsel %vm295_vm0, %v5007_v43, %v5011_v38 }
 0x4df   : > { %v5551_v26 = vadd.f32 %v5483_v1, %v5352_v25  ;;  %v5634_v1 = vrot.slane %v5005_v21, 3  ;;  %v5214_v21 = vsel %vm669_vm2, %v5211_v10, %v5213_v62 }
 0x4e0   : > { %v5486_v0 = vpop.f32.mrf.mxu1 }
 0x4e2   : > { %v5099_v7 = vpop.f32.mrf.mxu3 }
 0x4e3   : > { %v5161_v55 = vadd.f32 %v5099_v7, %v10110_v40  ;;  %7591 = vmatmul.msk.bf16.gmra.mxu1 %vm419_vm1, %v5411_v11  ;;  %v10447_v40 = vpack.c.b16 %v4898_v16, %v10437_v3 }
 0x4e4   : > { %v5716_v42 = vpop.f32.mrf.mxu2  ;;  %v5287_v22 = vpop.f32.mrf.mxu0 }
 0x4e5   : > { %v10439_v54 = vadd.f32 %v5716_v42, %v5551_v26  ;;  %v5353_v48 = vadd.f32 %v5287_v22, %v5158_v13  ;;  %v5017_v41 = vshll.u32 %v10447_v40, 16  ;;  %v5015_v26 = vor.u32 %v5013_v28, %v5011_v38 }
 0x4e6   : > { %v5636_v42 = vor.u32 %v5635_v6, %v5634_v1 }
 0x4e7   : > { %v5552_v35 = vadd.f32 %v5486_v0, %v5353_v48  ;;  %7549 = vmatmul.msk.bf16.gmra.mxu3 %vm419_vm1, %v5012_v23  ;;  %7569 = vmatmul.msk.bf16.gmra.mxu0 %vm419_vm1, %v5212_v37  ;;  %v5019_v43 = vrot.slane %v5017_v41, 1  ;;  %v5577_v41 = vld [vmem:[%s8604_s6 + $0x90] sm:$0xf] }
 0x4e8   : > { %v5488_v25 = vpop.f32.mrf.mxu1  ;;  %v5637_v0 = vsel %vm1065_vm4, %v5632_v2, %v5636_v42  ;;  %v5638_v2 = vrot.slane %v5013_v28, 3  ;;  %v10479_v6 = vunpack.c.l.b16 %v5577_v41 }
 0x4e9   : > { %7613 = vmatmul.msk.bf16.gmra.mxu2 %vm419_vm1, %v5633_v9 }
 0x4ea   : > { %v5102_v45 = vpop.f32.mrf.mxu3 }
 0x4eb   : > { %v5162_v13 = vadd.f32 %v5102_v45, %v10131_v52  ;;  %v5412_v52 = vrot.slane %v10392_v47, 3  ;;  %v5639_v45 = vrot.slane %v5009_v39, 4 }
 0x4ec   : > { %v5719_v19 = vpop.f32.mrf.mxu2  ;;  %v5289_v5 = vpop.f32.mrf.mxu0 }
 0x4ed   : > { %v10453_v8 = vadd.f32 %v5719_v19, %v5552_v35  ;;  %v5354_v32 = vadd.f32 %v5289_v5, %v5159_v27  ;;  %v5020_v27 = vsel %vm295_vm0, %v5015_v26, %v5019_v43  ;;  %v5413_v38 = vsel %vm869_vm3, %v5410_v12, %v5412_v52 }
 0x4ee   : > { %v5021_v5 = vshrl.u32 %v10447_v40, 16  ;;  %v5640_v1 = vor.u32 %v5639_v45, %v5638_v2  ;;  %v5217_v2 = vrot.slane %v10447_v40, 1 }
 0x4ef   : > { %v5553_v63 = vadd.f32 %v5488_v25, %v5354_v32  ;;  %v5215_v32 = vrot.slane %v10415_v57, 1  ;;  %v5414_v25 = vrot.slane %v10415_v57, 3  ;;  %v5379_v57 = vld [vmem:[%s8604_s6 + $0x90] sm:$0x7] }
 0x4f0   : > { %v5491_v48 = vpop.f32.mrf.mxu1 }
 0x4f1   : > { %v5216_v39 = vsel %vm669_vm2, %v5213_v62, %v5215_v32 }
 0x4f2   : > { %v5104_v7 = vpop.f32.mrf.mxu3 }
 0x4f3   : > { %v5163_v22 = vadd.f32 %v5104_v7, %v10142_v31  ;;  %7592 = vmatmul.msk.bf16.gmra.mxu1 %vm419_vm1, %v5413_v38 }
 0x4f4   : > { %v5721_v23 = vpop.f32.mrf.mxu2  ;;  %v5292_v37 = vpop.f32.mrf.mxu0 }
 0x4f5   : > { %v10462_v16 = vadd.f32 %v5721_v23, %v5553_v63  ;;  %v5355_v4 = vadd.f32 %v5292_v37, %v5160_v51  ;;  %v5023_v63 = vor.u32 %v5021_v5, %v5019_v43 }
 0x4f7   : > { %v5554_v11 = vadd.f32 %v5491_v48, %v5355_v4  ;;  %7550 = vmatmul.msk.bf16.gmra.mxu3 %vm419_vm1, %v5020_v27  ;;  %7570 = vmatmul.msk.bf16.gmra.mxu0 %vm419_vm1, %v5214_v21  ;;  %v5415_v27 = vsel %vm869_vm3, %v5412_v52, %v5414_v25  ;;  %v5641_v21 = vsel %vm1065_vm4, %v5636_v42, %v5640_v1 }
 0x4f8   : > { %v5493_v35 = vpop.f32.mrf.mxu1  ;;  %v5585_v4 = vpack.c.b16 %v10479_v6, %v10437_v3 }
 0x4f9   : > { %7614 = vmatmul.msk.bf16.gmra.mxu2 %vm419_vm1, %v5637_v0 }
 0x4fa   : > { %v5107_v31 = vpop.f32.mrf.mxu3  ;;  %v5643_v43 = vshrl.u32 %v5585_v4, 16  ;;  %v5646_v62 = vshll.u32 %v5585_v4, 16 }
 0x4fb   : > { %v5164_v47 = vadd.f32 %v5107_v31, %v10159_v30 }
 0x4fc   : > { %v5724_v10 = vpop.f32.mrf.mxu2  ;;  %v5294_v51 = vpop.f32.mrf.mxu0 }
 0x4fd   : > { %v10471_v9 = vadd.f32 %v5724_v10, %v5554_v11  ;;  %v5356_v12 = vadd.f32 %v5294_v51, %v5161_v55  ;;  %v5645_v51 = vrot.slane %v5643_v43, 3 }
 0x4ff   : > { %v5555_v19 = vadd.f32 %v5493_v35, %v5356_v12  ;;  %v5648_v12 = vrot.slane %v5646_v62, 4 }
 0x500   : > { %v5496_v37 = vpop.f32.mrf.mxu1 }
 0x501   : > { %v5649_v5 = vor.u32 %v5648_v12, %v5645_v51  ;;  %v6570_v12 = vld [vmem:[%s8604_s6 + $0x28] sm:$0x8] }
 0x502   : > { %v5109_v30 = vpop.f32.mrf.mxu3 }
 0x503   : > { %v5165_v55 = vadd.f32 %v5109_v30, %v10171_v15  ;;  %7593 = vmatmul.msk.bf16.gmra.mxu1 %vm419_vm1, %v5415_v27  ;;  %v5388_v15 = vunpack.c.l.b16 %v5379_v57  ;;  %v5989_v57 = vld [vmem:[%s8604_s6 + $0x2c] sm:$0xf] }
 0x504   : > { %v5726_v28 = vpop.f32.mrf.mxu2  ;;  %v5297_v26 = vpop.f32.mrf.mxu0 }
 0x505   : > { %v10483_v7 = vadd.f32 %v5726_v28, %v5555_v19  ;;  %v5357_v23 = vadd.f32 %v5297_v26, %v5162_v13  ;;  %v5390_v10 = vpack.c.b16 %v5388_v15, %v10437_v3  ;;  %v6050_v15 = vunpack.c.l.b16 %v5989_v57 }
 0x507   : > { %v5556_v48 = vadd.f32 %v5496_v37, %v5357_v23  ;;  %7551 = vmatmul.msk.bf16.gmra.mxu3 %vm419_vm1, %v5023_v63  ;;  %7571 = vmatmul.msk.bf16.gmra.mxu0 %vm419_vm1, %v5216_v39  ;;  %v5416_v45 = vrot.slane %v5390_v10, 3  ;;  %v5218_v63 = vsel %vm669_vm2, %v5215_v32, %v5217_v2  ;;  %v5650_v39 = vsel %vm1065_vm4, %v5640_v1, %v5649_v5  ;;  %v8406_v23 = vld [vmem:[%s8604_s6 + $0x28] sm:$0xff]   ;;  %v10522_v10 = vld [vmem:[%s8604_s6 + $0x30] sm:$0xff] }
 0x508   : > { %v5498_v31 = vpop.f32.mrf.mxu1 }
 0x509   : > { %7615 = vmatmul.msk.bf16.gmra.mxu2 %vm419_vm1, %v5641_v21  ;;  %v5417_v3 = vsel %vm869_vm3, %v5414_v25, %v5416_v45  ;;  %v5988_v21 = vld [vmem:[%s8604_s6 + $0x28] sm:$0xc] }
 0x50a   : > { %v5112_v13 = vpop.f32.mrf.mxu3 }
 0x50b   : > { %v5166_v52 = vadd.f32 %v5112_v13, %v10189_v59 }
 0x50c   : > { %v5729_v42 = vpop.f32.mrf.mxu2  ;;  %v5299_v38 = vpop.f32.mrf.mxu0 }
 0x50d   : > { %v10495_v0 = vadd.f32 %v5729_v42, %v5556_v48  ;;  %v5358_v11 = vadd.f32 %v5299_v38, %v5163_v22  ;;  %v6049_v48 = vunpack.c.l.b16 %v5988_v21 }
 0x50f   : > { %v5557_v35 = vadd.f32 %v5498_v31, %v5358_v11  ;;  %v6077_v38 = vpack.c.b16 %v6050_v15, %v6049_v48 }
 0x510   : > { %v5501_v26 = vpop.f32.mrf.mxu1 }
 0x512   : > { %v5114_v19 = vpop.f32.mrf.mxu3 }
 0x513   : > { %v5167_v41 = vadd.f32 %v5114_v19, %v10201_v49  ;;  %7594 = vmatmul.msk.bf16.gmra.mxu1 %vm419_vm1, %v5417_v3  ;;  %v6295_v19 = vshrl.u32 %v10522_v10, 16 }
 0x514   : > { %v5731_v59 = vpop.f32.mrf.mxu2  ;;  %v5302_v30 = vpop.f32.mrf.mxu0 }
 0x515   : > { %v10501_v28 = vadd.f32 %v5731_v59, %v5557_v35  ;;  %v5359_v22 = vadd.f32 %v5302_v30, %v5164_v47  ;;  %v6290_v35 = vshll.u32 %v6077_v38, 16  ;;  %v6298_v59 = vshll.u32 %v10522_v10, 16 }
 0x516   : > { %v6577_v30 = vunpack.c.l.b16 %v6570_v12 }
 0x517   : > { %v5558_v40 = vadd.f32 %v5501_v26, %v5359_v22  ;;  %7572 = vmatmul.msk.bf16.gmra.mxu0 %vm419_vm1, %v5218_v63  ;;  %7626 = vmatmul.msk.bf16.vlgmr.msra.gmra.mxu3 %vm419_vm1, %v8406_v23  ;;  %v6292_v3 = vrot.slane %v6290_v35, 3  ;;  %v6297_v23 = vrot.slane %v6295_v19, 2 }
 0x518   : > { %v5503_v1 = vpop.f32.mrf.mxu1 }
 0x519   : > { %7616 = vmatmul.msk.bf16.gmra.mxu2 %vm419_vm1, %v5650_v39 }
 0x51a   : > { %v5117_v49 = vpop.f32.mrf.mxu3 }
 0x51b   : > { %v5168_v47 = vadd.f32 %v5117_v49, %v10216_v50  ;;  %v8118_v50 = vld [vmem:[%s8604_s6 + $0x30] sm:$0xff]   ;;  %v6300_v49 = vrot.slane %v6298_v59, 3 }
 0x51c   : > { %v5734_v32 = vpop.f32.mrf.mxu2  ;;  %v5304_v37 = vpop.f32.mrf.mxu0 }
 0x51d   : > { %v10511_v25 = vadd.f32 %v5734_v32, %v5558_v40  ;;  %v5360_v27 = vadd.f32 %v5304_v37, %v5165_v55  ;;  %v6091_v37 = vrot.slane %v6077_v38, 2  ;;  %v6301_v21 = vor.u32 %v6300_v49, %v6297_v23 }
 0x51f   : > { %v5559_v4 = vadd.f32 %v5503_v1, %v5360_v27  ;;  %v6092_v27 = vrot.slane %v10522_v10, 2 }
 0x520   : > { %v5506_v55 = vpop.f32.mrf.mxu1 }
 0x522   : > { %v5119_v13 = vpop.f32.mrf.mxu3 }
 0x523   : > { %v10516_v43 = vadd.f32 %v5119_v13, %v10228_v17  ;;  %7595 = vmatmul.msk.bf16.gmra.mxu1 %vm419_vm1, %v5416_v45  ;;  %v6287_v17 = vshrl.u32 %v6077_v38, 16 }
 0x524   : > { %v5736_v62 = vpop.f32.mrf.mxu2  ;;  %v5307_v42 = vpop.f32.mrf.mxu0 }
 0x525   : > { %v10519_v11 = vadd.f32 %v5736_v62, %v5559_v4  ;;  %v5361_v31 = vadd.f32 %v5307_v42, %v5166_v52  ;;  %v6580_v4 = vrot.slane %v10522_v10, 3  ;;  %v8119_v62 = vld [vmem:[%s8604_s6 + $0x38] sm:$0xff]   ;;  %v6093_v42 = vsel %vm1571_vm5, %v6091_v37, %v6092_v27 }
 0x527   : > { %v5560_v51 = vadd.f32 %v5506_v55, %v5361_v31  ;;  %7573 = vmatmul.msk.bf16.gmra.mxu0 %vm419_vm1, %v5217_v2  ;;  %7627 = vmatmul.msk.bf16.gmra.mxu3 %vm419_vm1, %v8118_v50  ;;  %v6289_v2 = vrot.slane %v6287_v17, 2  ;;  %v10543_v55 = vld [vmem:[%s8604_s6 + $0x38] sm:$0xff] }
 0x528   : > { %v5508_v45 = vpop.f32.mrf.mxu1  ;;  %v6582_v23 = vrot.slane %v10543_v55, 3 }
 0x529   : > { %7617 = vmatmul.msk.bf16.gmra.mxu2 %vm419_vm1, %v5649_v5  ;;  %v6578_v5 = vpack.c.b16 %v6050_v15, %v6577_v30  ;;  %v6293_v1 = vor.u32 %v6292_v3, %v6289_v2  ;;  %v6094_v3 = vrot.slane %v10543_v55, 2 }
 0x52a   : > { %v5122_v52 = vpop.f32.mrf.mxu3 }
 0x52b   : > { %v5170_v63 = vadd.f32 %v5122_v52, %v10243_v14  ;;  %v6579_v57 = vrot.slane %v6578_v5, 3  ;;  %v6302_v31 = vsel %vm1767_vm6, %v6293_v1, %v6301_v21  ;;  %v6095_v37 = vsel %vm1571_vm5, %v6092_v27, %v6094_v3 }
 0x52c   : > { %v5739_v22 = vpop.f32.mrf.mxu2  ;;  %v5309_v26 = vpop.f32.mrf.mxu0 }
 0x52d   : > { %v10532_v39 = vadd.f32 %v5739_v22, %v5560_v51  ;;  %v5362_v40 = vadd.f32 %v5309_v26, %v5167_v41  ;;  %v6581_v51 = vsel %vm869_vm3, %v6579_v57, %v6580_v4 }
 0x52f   : > { %v5561_v32 = vadd.f32 %v5508_v45, %v5362_v40 }
 0x530   : > { %v5511_v38 = vpop.f32.mrf.mxu1 }
 0x532   : > { %v5124_v14 = vpop.f32.mrf.mxu3 }
 0x533   : > { %v5171_v48 = vadd.f32 %v5124_v14, %v10254_v60  ;;  %7718 = vmatmul.msk.bf16.vlgmr.msra.gmra.mxu1 %vm419_vm1, %v6302_v31  ;;  %v6304_v60 = vshrl.u32 %v10543_v55, 16 }
 0x534   : > { %v5741_v13 = vpop.f32.mrf.mxu2  ;;  %v5312_v41 = vpop.f32.mrf.mxu0 }
 0x535   : > { %v10539_v50 = vadd.f32 %v5741_v13, %v5561_v32  ;;  %v5363_v15 = vadd.f32 %v5312_v41, %v5168_v47  ;;  %v6307_v47 = vshll.u32 %v10543_v55, 16  ;;  %v6306_v22 = vrot.slane %v6304_v60, 2  ;;  %v8120_v32 = vld [vmem:[%s8604_s6 + $0x40] sm:$0xff]  }
 0x536   : > { %v10565_v13 = vld [vmem:[%s8604_s6 + $0x40] sm:$0xff]  ;;  %v6583_v41 = vsel %vm869_vm3, %v6580_v4, %v6582_v23 }
 0x537   : > { %v5562_v12 = vadd.f32 %v5511_v38, %v5363_v15  ;;  %7628 = vmatmul.msk.bf16.gmra.mxu3 %vm419_vm1, %v8119_v62  ;;  %7696 = vmatmul.msk.bf16.vlgmr.msra.gmra.mxu0 %vm419_vm1, %v6093_v42  ;;  %v6309_v26 = vrot.slane %v6307_v47, 3  ;;  %v6096_v60 = vrot.slane %v10565_v13, 2 }
 0x538   : > { %v5513_v30 = vpop.f32.mrf.mxu1 }
 0x539   : > { %7740 = vmatmul.msk.bf16.vlgmr.msra.gmra.mxu2 %vm419_vm1, %v6581_v51  ;;  %v6310_v40 = vor.u32 %v6309_v26, %v6306_v22  ;;  %v6097_v22 = vsel %vm1571_vm5, %v6094_v3, %v6096_v60 }
 0x53a   : > { %v5127_v10 = vpop.f32.mrf.mxu3 }
 0x53b   : > { %v5172_v17 = vadd.f32 %v5127_v10, %v10268_v58  ;;  %v6311_v57 = vsel %vm1767_vm6, %v6301_v21, %v6310_v40 }
 0x53c   : > { %v5744_v35 = vpop.f32.mrf.mxu2  ;;  %v5314_v19 = vpop.f32.mrf.mxu0 }
 0x53d   : > { %v10553_v59 = vadd.f32 %v5744_v35, %v5562_v12  ;;  %v5364_v52 = vadd.f32 %v5314_v19, %v10516_v43  ;;  %v6584_v35 = vrot.slane %v10565_v13, 3 }
 0x53f   : > { %v5563_v2 = vadd.f32 %v5513_v30, %v5364_v52  ;;  %v8121_v30 = vld [vmem:[%s8604_s6 + $0x48] sm:$0xff]  }
 0x540   : > { %v5516_v14 = vpop.f32.mrf.mxu1 }
 0x542   : > { %v5129_v45 = vpop.f32.mrf.mxu3 }
 0x543   : > { %v5173_v58 = vadd.f32 %v5129_v45, %v10279_v18  ;;  %7719 = vmatmul.msk.bf16.gmra.mxu1 %vm419_vm1, %v6311_v57  ;;  %v6313_v18 = vshrl.u32 %v10565_v13, 16 }
 0x544   : > { %v5746_v49 = vpop.f32.mrf.mxu2  ;;  %v5317_v5 = vpop.f32.mrf.mxu0 }
 0x545   : > { %v10561_v1 = vadd.f32 %v5746_v49, %v5563_v2  ;;  %v5365_v43 = vadd.f32 %v5317_v5, %v5170_v63  ;;  %v6316_v63 = vshll.u32 %v10565_v13, 16  ;;  %v6315_v55 = vrot.slane %v6313_v18, 2  ;;  %v10586_v49 = vld [vmem:[%s8604_s6 + $0x48] sm:$0xff] }
 0x546   : > { %v6585_v5 = vsel %vm869_vm3, %v6582_v23, %v6584_v35  ;;  %v6098_v18 = vrot.slane %v10586_v49, 2 }
 0x547   : > { %v5564_v62 = vadd.f32 %v5516_v14, %v5365_v43  ;;  %7629 = vmatmul.msk.bf16.gmra.mxu3 %vm419_vm1, %v8120_v32  ;;  %7697 = vmatmul.msk.bf16.gmra.mxu0 %vm419_vm1, %v6095_v37  ;;  %v6318_v51 = vrot.slane %v6316_v63, 3 }
 0x548   : > { %v5518_v31 = vpop.f32.mrf.mxu1 }
 0x549   : > { %7741 = vmatmul.msk.bf16.gmra.mxu2 %vm419_vm1, %v6583_v41  ;;  %v6319_v47 = vor.u32 %v6318_v51, %v6315_v55  ;;  %v6099_v55 = vsel %vm1571_vm5, %v6096_v60, %v6098_v18 }
 0x54a   : > { %v5132_v27 = vpop.f32.mrf.mxu3 }
 0x54b   : > { %v5174_v21 = vadd.f32 %v5132_v27, %v10293_v34  ;;  %v6320_v45 = vsel %vm1767_vm6, %v6310_v40, %v6319_v47 }
 0x54c   : > { %v5749_v42 = vpop.f32.mrf.mxu2  ;;  %v5319_v15 = vpop.f32.mrf.mxu0 }
 0x54d   : > { %v10575_v4 = vadd.f32 %v5749_v42, %v5564_v62  ;;  %v5366_v38 = vadd.f32 %v5319_v15, %v5171_v48  ;;  %v6586_v42 = vrot.slane %v10586_v49, 3 }
 0x54f   : > { %v5565_v12 = vadd.f32 %v5518_v31, %v5366_v38  ;;  %v8122_v31 = vld [vmem:[%s8604_s6 + $0x50] sm:$0xff]  }
 0x550   : > { %v5521_v2 = vpop.f32.mrf.mxu1 }
 0x552   : > { %v5134_v10 = vpop.f32.mrf.mxu3 }
 0x553   : > { %v5175_v19 = vadd.f32 %v5134_v10, %v10304_v61  ;;  %7720 = vmatmul.msk.bf16.gmra.mxu1 %vm419_vm1, %v6320_v45  ;;  %v6322_v61 = vshrl.u32 %v10586_v49, 16 }
 0x554   : > { %v5751_v34 = vpop.f32.mrf.mxu2  ;;  %v5322_v52 = vpop.f32.mrf.mxu0 }
 0x555   : > { %v10582_v26 = vadd.f32 %v5751_v34, %v5565_v12  ;;  %v5367_v48 = vadd.f32 %v5322_v52, %v5172_v17  ;;  %v6325_v17 = vshll.u32 %v10586_v49, 16  ;;  %v6324_v13 = vrot.slane %v6322_v61, 2  ;;  %v10607_v34 = vld [vmem:[%s8604_s6 + $0x50] sm:$0xff] }
 0x556   : > { %v6587_v52 = vsel %vm869_vm3, %v6584_v35, %v6586_v42  ;;  %v6100_v61 = vrot.slane %v10607_v34, 2 }
 0x557   : > { %v5566_v32 = vadd.f32 %v5521_v2, %v5367_v48  ;;  %7630 = vmatmul.msk.bf16.gmra.mxu3 %vm419_vm1, %v8121_v30  ;;  %7698 = vmatmul.msk.bf16.gmra.mxu0 %vm419_vm1, %v6097_v22  ;;  %v6327_v41 = vrot.slane %v6325_v17, 3 }
 0x558   : > { %v5523_v57 = vpop.f32.mrf.mxu1 }
 0x559   : > { %7742 = vmatmul.msk.bf16.gmra.mxu2 %vm419_vm1, %v6585_v5  ;;  %v6328_v63 = vor.u32 %v6327_v41, %v6324_v13  ;;  %v6101_v13 = vsel %vm1571_vm5, %v6098_v18, %v6100_v61 }
 0x55a   : > { %v5137_v3 = vpop.f32.mrf.mxu3 }
 0x55b   : > { %v5176_v40 = vadd.f32 %v5137_v3, %v10320_v20  ;;  %v6329_v10 = vsel %vm1767_vm6, %v6319_v47, %v6328_v63 }
 0x55c   : > { %v5754_v37 = vpop.f32.mrf.mxu2  ;;  %v5324_v43 = vpop.f32.mrf.mxu0 }
 0x55d   : > { %v10596_v23 = vadd.f32 %v5754_v37, %v5566_v32  ;;  %v5368_v14 = vadd.f32 %v5324_v43, %v5173_v58  ;;  %v6588_v37 = vrot.slane %v10607_v34, 3 }
 0x55f   : > { %v5567_v62 = vadd.f32 %v5523_v57, %v5368_v14  ;;  %v8123_v57 = vld [vmem:[%s8604_s6 + $0x58] sm:$0xff]  }
 0x560   : > { %v5526_v12 = vpop.f32.mrf.mxu1 }
 0x562   : > { %v5139_v27 = vpop.f32.mrf.mxu3 }
 0x563   : > { %v5177_v15 = vadd.f32 %v5139_v27, %v10333_v56  ;;  %7721 = vmatmul.msk.bf16.gmra.mxu1 %vm419_vm1, %v6329_v10  ;;  %v6331_v56 = vshrl.u32 %v10607_v34, 16 }
 0x564   : > { %v5756_v20 = vpop.f32.mrf.mxu2  ;;  %v5327_v38 = vpop.f32.mrf.mxu0 }
 0x565   : > { %v10603_v51 = vadd.f32 %v5756_v20, %v5567_v62  ;;  %v5369_v58 = vadd.f32 %v5327_v38, %v5174_v21  ;;  %v6334_v21 = vshll.u32 %v10607_v34, 16  ;;  %v6333_v49 = vrot.slane %v6331_v56, 2  ;;  %v10628_v20 = vld [vmem:[%s8604_s6 + $0x58] sm:$0xff] }
 0x566   : > { %v6589_v38 = vsel %vm869_vm3, %v6586_v42, %v6588_v37  ;;  %v6102_v56 = vrot.slane %v10628_v20, 2 }
 0x567   : > { %v5568_v30 = vadd.f32 %v5526_v12, %v5369_v58  ;;  %7631 = vmatmul.msk.bf16.gmra.mxu3 %vm419_vm1, %v8122_v31  ;;  %7699 = vmatmul.msk.bf16.gmra.mxu0 %vm419_vm1, %v6099_v55  ;;  %v6336_v5 = vrot.slane %v6334_v21, 3 }
 0x568   : > { %v5528_v45 = vpop.f32.mrf.mxu1 }
 0x569   : > { %7743 = vmatmul.msk.bf16.gmra.mxu2 %vm419_vm1, %v6587_v52  ;;  %v6337_v17 = vor.u32 %v6336_v5, %v6333_v49  ;;  %v6103_v49 = vsel %vm1571_vm5, %v6100_v61, %v6102_v56 }
 0x56a   : > { %v5142_v60 = vpop.f32.mrf.mxu3 }
 0x56b   : > { %v5178_v47 = vadd.f32 %v5142_v60, %v10347_v46  ;;  %v6338_v27 = vsel %vm1767_vm6, %v6328_v63, %v6337_v17 }
 0x56c   : > { %v5759_v22 = vpop.f32.mrf.mxu2  ;;  %v5329_v48 = vpop.f32.mrf.mxu0 }
 0x56d   : > { %v10617_v35 = vadd.f32 %v5759_v22, %v5568_v30  ;;  %v5370_v2 = vadd.f32 %v5329_v48, %v5175_v19  ;;  %v6590_v22 = vrot.slane %v10628_v20, 3 }
 0x56f   : > { %v5569_v32 = vadd.f32 %v5528_v45, %v5370_v2  ;;  %v8124_v45 = vld [vmem:[%s8604_s6 + $0x60] sm:$0xff]  }
 0x570   : > { %v5531_v62 = vpop.f32.mrf.mxu1 }
 0x572   : > { %v5144_v3 = vpop.f32.mrf.mxu3 }
 0x573   : > { %v5179_v43 = vadd.f32 %v5144_v3, %v10357_v44  ;;  %7722 = vmatmul.msk.bf16.gmra.mxu1 %vm419_vm1, %v6338_v27  ;;  %v6340_v44 = vshrl.u32 %v10628_v20, 16 }
 0x574   : > { %v5761_v46 = vpop.f32.mrf.mxu2  ;;  %v5332_v14 = vpop.f32.mrf.mxu0 }
 0x575   : > { %v10624_v41 = vadd.f32 %v5761_v46, %v5569_v32  ;;  %v5371_v19 = vadd.f32 %v5332_v14, %v5176_v40  ;;  %v6343_v40 = vshll.u32 %v10628_v20, 16  ;;  %v6342_v34 = vrot.slane %v6340_v44, 2  ;;  %v10649_v46 = vld [vmem:[%s8604_s6 + $0x60] sm:$0xff] }
 0x576   : > { %v6591_v14 = vsel %vm869_vm3, %v6588_v37, %v6590_v22  ;;  %v6104_v44 = vrot.slane %v10649_v46, 2 }
 0x577   : > { %v5570_v31 = vadd.f32 %v5531_v62, %v5371_v19  ;;  %7632 = vmatmul.msk.bf16.gmra.mxu3 %vm419_vm1, %v8123_v57  ;;  %7700 = vmatmul.msk.bf16.gmra.mxu0 %vm419_vm1, %v6101_v13  ;;  %v6345_v52 = vrot.slane %v6343_v40, 3 }
 0x578   : > { %v5533_v10 = vpop.f32.mrf.mxu1 }
 0x579   : > { %7744 = vmatmul.msk.bf16.gmra.mxu2 %vm419_vm1, %v6589_v38  ;;  %v6346_v21 = vor.u32 %v6345_v52, %v6342_v34 }
 0x57a   : > { %v5147_v18 = vpop.f32.mrf.mxu3 }
 0x57b   : > { %v5180_v63 = vadd.f32 %v5147_v18, %v10372_v36  ;;  %v6347_v3 = vsel %vm1767_vm6, %v6337_v17, %v6346_v21 }
 0x57c   : > { %v5764_v55 = vpop.f32.mrf.mxu2  ;;  %v5334_v58 = vpop.f32.mrf.mxu0 }
 0x57d   : > { %v10638_v42 = vadd.f32 %v5764_v55, %v5570_v31  ;;  %v5372_v12 = vadd.f32 %v5334_v58, %v5177_v15  ;;  %v6592_v55 = vrot.slane %v10649_v46, 3 }
 0x57f   : > { %v5571_v30 = vadd.f32 %v5533_v10, %v5372_v12  ;;  %v8125_v10 = vld [vmem:[%s8604_s6 + $0x68] sm:$0xff]  }
 0x580   : > { %v5536_v32 = vpop.f32.mrf.mxu1 }
 0x582   : > { %v5149_v60 = vpop.f32.mrf.mxu3 }
 0x583   : > { %v5181_v48 = vadd.f32 %v5149_v60, %v10384_v53  ;;  %7723 = vmatmul.msk.bf16.gmra.mxu1 %vm419_vm1, %v6347_v3  ;;  %v6349_v53 = vshrl.u32 %v10649_v46, 16  ;;  %v7862_v60 = vld [vmem:[%s8604_s6 + $0x68] sm:$0xff] }
 0x584   : > { %v5766_v36 = vpop.f32.mrf.mxu2  ;;  %v5337_v2 = vpop.f32.mrf.mxu0 }
 0x585   : > { %v10645_v5 = vadd.f32 %v5766_v36, %v5571_v30  ;;  %v5373_v15 = vadd.f32 %v5337_v2, %v5178_v47  ;;  %v6352_v47 = vshll.u32 %v10649_v46, 16  ;;  %v6351_v20 = vrot.slane %v6349_v53, 2 }
 0x586   : > { %v6593_v36 = vsel %vm869_vm3, %v6590_v22, %v6592_v55 }
 0x587   : > { %v5572_v57 = vadd.f32 %v5536_v32, %v5373_v15  ;;  %7633 = vmatmul.msk.bf16.gmra.mxu3 %vm419_vm1, %v8124_v45  ;;  %7701 = vmatmul.msk.bf16.gmra.mxu0 %vm419_vm1, %v6103_v49  ;;  %v6354_v38 = vrot.slane %v6352_v47, 3  ;;  %v6358_v45 = vshrl.u32 %v7862_v60, 16 }
 0x588   : > { %v5538_v27 = vpop.f32.mrf.mxu1 }
 0x589   : > { %7745 = vmatmul.msk.bf16.gmra.mxu2 %vm419_vm1, %v6591_v14  ;;  %v6355_v40 = vor.u32 %v6354_v38, %v6351_v20  ;;  %v6360_v22 = vrot.slane %v6358_v45, 2 }
 0x58a   : > { %v5152_v61 = vpop.f32.mrf.mxu3 }
 0x58b   : > { %v5182_v17 = vadd.f32 %v5152_v61, %v10398_v24  ;;  %v6105_v24 = vsel %vm1571_vm5, %v6102_v56, %v6104_v44  ;;  %v6356_v30 = vsel %vm1767_vm6, %v6346_v21, %v6355_v40  ;;  %v6361_v56 = vshll.u32 %v7862_v60, 16 }
 0x58c   : > { %v5769_v13 = vpop.f32.mrf.mxu2  ;;  %v5339_v19 = vpop.f32.mrf.mxu0  ;;  %v6594_v61 = vrot.slane %v7862_v60, 3 }
 0x58d   : > { %v10659_v37 = vadd.f32 %v5769_v13, %v5572_v57  ;;  %v5374_v62 = vadd.f32 %v5339_v19, %v5179_v43  ;;  %v6363_v46 = vrot.slane %v6361_v56, 3  ;;  %v6106_v57 = vrot.slane %v7862_v60, 2 }
 0x58f   : > { %v5573_v31 = vadd.f32 %v5538_v27, %v5374_v62  ;;  %v6364_v53 = vor.u32 %v6363_v46, %v6360_v22  ;;  %v8126_v62 = vld [vmem:[%s8604_s6 + $0x70] sm:$0xff]   ;;  %v6107_v27 = vsel %vm1571_vm5, %v6104_v44, %v6106_v57 }
 0x590   : > { %v5541_v43 = vpop.f32.mrf.mxu1 }
 0x592   : > { %v5154_v18 = vpop.f32.mrf.mxu3 }
 0x593   : > { %7724 = vmatmul.msk.bf16.gmra.mxu1 %vm419_vm1, %v6356_v30  ;;  %v10682_v18 = vld [vmem:[%s8604_s6 + $0x70] sm:$0xff] }
 0x594   : > { %v5771_v58 = vpop.f32.mrf.mxu2  ;;  %v5342_v12 = vpop.f32.mrf.mxu0  ;;  %v6367_v44 = vshrl.u32 %v10682_v18, 16  ;;  %v6108_v60 = vrot.slane %v10682_v18, 2  ;;  %v6596_v45 = vrot.slane %v10682_v18, 3 }
 0x595   : > { %v10665_v34 = vadd.f32 %v5771_v58, %v5573_v31  ;;  %v5375_v52 = vadd.f32 %v5342_v12, %v5180_v63  ;;  %v6595_v58 = vsel %vm869_vm3, %v6592_v55, %v6594_v61 }
 0x597   : > { %v5574_v2 = vadd.f32 %v5541_v43, %v5375_v52  ;;  %7634 = vmatmul.msk.bf16.gmra.mxu3 %vm419_vm1, %v8125_v10  ;;  %7702 = vmatmul.msk.bf16.gmra.mxu0 %vm419_vm1, %v6105_v24  ;;  %v6369_v43 = vrot.slane %v6367_v44, 2 }
 0x598   : > { %v5543_v3 = vpop.f32.mrf.mxu1 }
 0x599   : > { %7746 = vmatmul.msk.bf16.gmra.mxu2 %vm419_vm1, %v6593_v36 }
 0x59a   : > { %v5892_v49 = vpop.f32.mrf.mxu3 }
 0x59c   : > { %v5774_v63 = vpop.f32.mrf.mxu2  ;;  %v5344_v15 = vpop.f32.mrf.mxu0 }
 0x59d   : > { %v10674_v32 = vadd.f32 %v5774_v63, %v5574_v2  ;;  %v5376_v21 = vadd.f32 %v5344_v15, %v5181_v48  ;;  %v6365_v48 = vsel %vm1767_vm6, %v6355_v40, %v6364_v53  ;;  %v8127_v15 = vld [vmem:[%s8604_s6 + $0x78] sm:$0xff]  }
 0x59f   : > { %v5575_v14 = vadd.f32 %v5543_v3, %v5376_v21  ;;  %v6109_v21 = vsel %vm1571_vm5, %v6106_v57, %v6108_v60  ;;  %v5961_v3 = vadd.f32 %v5892_v49, %v10421_v29 }
 0x5a0   : > { %v5546_v31 = vpop.f32.mrf.mxu1 }
 0x5a2   : > { %v5894_v47 = vpop.f32.mrf.mxu3 }
 0x5a3   : > { %7725 = vmatmul.msk.bf16.gmra.mxu1 %vm419_vm1, %v6365_v48 }
 0x5a4   : > { %v5776_v13 = vpop.f32.mrf.mxu2  ;;  %v5347_v19 = vpop.f32.mrf.mxu0 }
 0x5a5   : > { %v10678_v20 = vadd.f32 %v5776_v13, %v5575_v14  ;;  %v5377_v38 = vadd.f32 %v5347_v19, %v5182_v17  ;;  %v6370_v17 = vshll.u32 %v10682_v18, 16  ;;  %v10701_v14 = vld [vmem:[%s8604_s6 + $0x78] sm:$0xff]  ;;  %v6597_v13 = vsel %vm869_vm3, %v6594_v61, %v6596_v45 }
 0x5a6   : > { %v6376_v29 = vshrl.u32 %v10701_v14, 16  ;;  %v6379_v49 = vshll.u32 %v10701_v14, 16  ;;  %v5962_v61 = vadd.f32 %v5894_v47, %v10439_v54  ;;  %v8128_v47 = vld [vmem:[%s8604_s6 + $0x80] sm:$0xff]  }
 0x5a7   : > { %v5576_v12 = vadd.f32 %v5546_v31, %v5377_v38  ;;  %7635 = vmatmul.msk.bf16.gmra.mxu3 %vm419_vm1, %v8126_v62  ;;  %7703 = vmatmul.msk.bf16.gmra.mxu0 %vm419_vm1, %v6107_v27  ;;  %v6372_v30 = vrot.slane %v6370_v17, 3 }
 0x5a8   : > { %v5548_v55 = vpop.f32.mrf.mxu1  ;;  %v6378_v48 = vrot.slane %v6376_v29, 2  ;;  %v6381_v18 = vrot.slane %v6379_v49, 3 }
 0x5a9   : > { %7747 = vmatmul.msk.bf16.gmra.mxu2 %vm419_vm1, %v6595_v58  ;;  %v6373_v36 = vor.u32 %v6372_v30, %v6369_v43 }
 0x5aa   : > { %v5897_v10 = vpop.f32.mrf.mxu3  ;;  %v6382_v44 = vor.u32 %v6381_v18, %v6378_v48 }
 0x5ab   : > { %v6374_v46 = vsel %vm1767_vm6, %v6364_v53, %v6373_v36  ;;  %v5963_v30 = vadd.f32 %v5897_v10, %v10453_v8 }
 0x5ac   : > { %v5779_v40 = vpop.f32.mrf.mxu2  ;;  %v5349_v24 = vpop.f32.mrf.mxu0 }
 0x5ad   : > { %v10691_v52 = vadd.f32 %v5779_v40, %v5576_v12  ;;  %v6110_v12 = vrot.slane %v10701_v14, 2  ;;  %v6598_v40 = vrot.slane %v10701_v14, 3 }
 0x5af   : > { %v6111_v43 = vsel %vm1571_vm5, %v6108_v60, %v6110_v12 }
 0x5b0   : > { %v6474_v22 = vpop.f32.mrf.mxu1 }
 0x5b2   : > { %v5899_v2 = vpop.f32.mrf.mxu3 }
 0x5b3   : > { %7726 = vmatmul.msk.bf16.gmra.mxu1 %vm419_vm1, %v6374_v46 }
 0x5b4   : > { %v5781_v56 = vpop.f32.mrf.mxu2  ;;  %v6181_v63 = vpop.f32.mrf.mxu0 }
 0x5b5   : > { %v6250_v19 = vadd.f32 %v6181_v63, %v5961_v3  ;;  %v6599_v3 = vsel %vm869_vm3, %v6596_v45, %v6598_v40  ;;  %v5964_v45 = vadd.f32 %v5899_v2, %v10462_v16 }
 0x5b7   : > { %7636 = vmatmul.msk.bf16.gmra.mxu3 %vm419_vm1, %v8127_v15  ;;  %7704 = vmatmul.msk.bf16.gmra.mxu0 %vm419_vm1, %v6109_v21  ;;  %v6543_v53 = vadd.f32 %v6474_v22, %v6250_v19  ;;  %v6383_v15 = vsel %vm1767_vm6, %v6373_v36, %v6382_v44  ;;  %v10723_v21 = vld [vmem:[%s8604_s6 + $0x80] sm:$0xff] }
 0x5b8   : > { %v6476_v31 = vpop.f32.mrf.mxu1  ;;  %v6385_v8 = vshrl.u32 %v10723_v21, 16  ;;  %v6388_v10 = vshll.u32 %v10723_v21, 16 }
 0x5b9   : > { %7748 = vmatmul.msk.bf16.gmra.mxu2 %vm419_vm1, %v6597_v13 }
 0x5ba   : > { %v5902_v57 = vpop.f32.mrf.mxu3  ;;  %v6387_v29 = vrot.slane %v6385_v8, 2  ;;  %v6390_v49 = vrot.slane %v6388_v10, 3 }
 0x5bb   : > { %v5965_v2 = vadd.f32 %v5902_v57, %v10471_v9 }
 0x5bc   : > { %v6669_v62 = vpop.f32.mrf.mxu2  ;;  %v6183_v27 = vpop.f32.mrf.mxu0 }
 0x5bd   : > { %v6738_v38 = vadd.f32 %v6669_v62, %v6543_v53  ;;  %v6251_v58 = vadd.f32 %v6183_v27, %v5962_v61  ;;  %v6112_v62 = vrot.slane %v10723_v21, 2  ;;  %v6391_v27 = vor.u32 %v6390_v49, %v6387_v29 }
 0x5bf   : > { %6765 = vst [vmem:[%s10713_s15] sm:$0xff] %v6738_v38  ;;  %v6544_v24 = vadd.f32 %v6476_v31, %v6251_v58  ;;  %v6600_v38 = vrot.slane %v10723_v21, 3  ;;  %v6113_v16 = vsel %vm1571_vm5, %v6110_v12, %v6112_v62 }
 0x5c0   : > { %v6479_v63 = vpop.f32.mrf.mxu1 }
 0x5c2   : > { %v5904_v17 = vpop.f32.mrf.mxu3 }
 0x5c3   : > { %7727 = vmatmul.msk.bf16.gmra.mxu1 %vm419_vm1, %v6383_v15 }
 0x5c4   : > { %v6671_v55 = vpop.f32.mrf.mxu2  ;;  %v6186_v54 = vpop.f32.mrf.mxu0 }
 0x5c5   : > { %v6739_v56 = vadd.f32 %v6671_v55, %v6544_v24  ;;  %v6252_v22 = vadd.f32 %v6186_v54, %v5963_v30  ;;  %v6392_v55 = vsel %vm1767_vm6, %v6382_v44, %v6391_v27  ;;  %v10743_v54 = vld [vmem:[%s8604_s6 + $0x88] sm:$0xff] }
 0x5c6   : > { %v6394_v9 = vshrl.u32 %v10743_v54, 16  ;;  %v6397_v57 = vshll.u32 %v10743_v54, 16  ;;  %v6114_v10 = vrot.slane %v10743_v54, 2 }
 0x5c7   : > { %6766 = vst [vmem:[%s10713_s15 + $0x8] sm:$0xff] %v6739_v56  ;;  %7637 = vmatmul.msk.bf16.gmra.mxu3 %vm419_vm1, %v8128_v47  ;;  %7705 = vmatmul.msk.bf16.gmra.mxu0 %vm419_vm1, %v6111_v43  ;;  %v6545_v36 = vadd.f32 %v6479_v63, %v6252_v22  ;;  %v6601_v47 = vsel %vm869_vm3, %v6598_v40, %v6600_v38  ;;  %v6277_v22 = vld [vmem:[%s8604_s6 + $0x94] sm:$0x7] }
 0x5c8   : > { %v6481_v19 = vpop.f32.mrf.mxu1  ;;  %v5966_v56 = vadd.f32 %v5904_v17, %v10483_v7  ;;  %v6396_v15 = vrot.slane %v6394_v9, 2  ;;  %v6399_v21 = vrot.slane %v6397_v57, 3  ;;  %v5828_v7 = vpack.c.b16 %v10479_v6, %v10479_v6 }
 0x5c9   : > { %7749 = vmatmul.msk.bf16.gmra.mxu2 %vm419_vm1, %v6599_v3  ;;  %v6014_v3 = vld [vmem:[%s8604_s6 + $0x90] sm:$0xf]  ;;  %v6115_v49 = vsel %vm1571_vm5, %v6112_v62, %v6114_v10 }
 0x5ca   : > { %v5907_v60 = vpop.f32.mrf.mxu3 }
 0x5cc   : > { %v6674_v46 = vpop.f32.mrf.mxu2  ;;  %v6188_v14 = vpop.f32.mrf.mxu0 }
 0x5cd   : > { %v6740_v13 = vadd.f32 %v6674_v46, %v6545_v36  ;;  %v6253_v53 = vadd.f32 %v6188_v14, %v5964_v45  ;;  %v6400_v36 = vor.u32 %v6399_v21, %v6396_v15  ;;  %v6075_v46 = vunpack.c.l.b16 %v6014_v3 }
 0x5ce   : > { %v6284_v14 = vunpack.c.l.b16 %v6277_v22 }
 0x5cf   : > { %6767 = vst [vmem:[%s10713_s15 + $0x10] sm:$0xff] %v6740_v13  ;;  %v6546_v31 = vadd.f32 %v6481_v19, %v6253_v53  ;;  %v6602_v13 = vrot.slane %v10743_v54, 3  ;;  %v5967_v53 = vadd.f32 %v5907_v60, %v10495_v0 }
 0x5d0   : > { %v6484_v24 = vpop.f32.mrf.mxu1 }
 0x5d2   : > { %v10736_v61 = vpop.f32.mrf.mxu3 }
 0x5d3   : > { %7728 = vmatmul.msk.bf16.gmra.mxu1 %vm419_vm1, %v6392_v55 }
 0x5d4   : > { %v6676_v48 = vpop.f32.mrf.mxu2  ;;  %v6191_v18 = vpop.f32.mrf.mxu0 }
 0x5d5   : > { %v6741_v58 = vadd.f32 %v6676_v48, %v6546_v31  ;;  %v6254_v43 = vadd.f32 %v6191_v18, %v5965_v2  ;;  %v6401_v18 = vsel %vm1767_vm6, %v6391_v27, %v6400_v36  ;;  %v6285_v2 = vpack.c.b16 %v6284_v14, %v6075_v46 }
 0x5d7   : > { %6768 = vst [vmem:[%s10713_s15 + $0x18] sm:$0xff] %v6741_v58  ;;  %7638 = vmatmul.msk.bf16.gmra.mxu3 %vm419_vm1, %v10430_v33  ;;  %7706 = vmatmul.msk.bf16.gmra.mxu0 %vm419_vm1, %v6113_v16  ;;  %v6547_v44 = vadd.f32 %v6484_v24, %v6254_v43  ;;  %v6015_v16 = vld [vmem:[%s8604_s6 + $0x94] sm:$0x3]  ;;  %v6603_v58 = vsel %vm869_vm3, %v6600_v38, %v6602_v13  ;;  %v6403_v0 = vshrl.u32 %v6285_v2, 16  ;;  %v6406_v60 = vshll.u32 %v6285_v2, 16 }
 0x5d8   : > { %v6486_v33 = vpop.f32.mrf.mxu1  ;;  %v6076_v6 = vunpack.c.l.b16 %v6015_v16  ;;  %v5968_v38 = vadd.f32 %v10736_v61, %v10501_v28 }
 0x5d9   : > { %7750 = vmatmul.msk.bf16.gmra.mxu2 %vm419_vm1, %v6601_v47  ;;  %v6405_v57 = vrot.slane %v6403_v0, 2 }
 0x5da   : > { %v5912_v12 = vpop.f32.mrf.mxu3  ;;  %v6090_v47 = vpack.c.b16 %v6076_v6, %v6075_v46 }
 0x5dc   : > { %v6679_v40 = vpop.f32.mrf.mxu2  ;;  %v6193_v30 = vpop.f32.mrf.mxu0 }
 0x5dd   : > { %v6742_v63 = vadd.f32 %v6679_v40, %v6547_v44  ;;  %v6255_v8 = vadd.f32 %v6193_v30, %v5966_v56  ;;  %v6408_v44 = vrot.slane %v6406_v60, 3  ;;  %v6116_v30 = vrot.slane %v6090_v47, 2 }
 0x5df   : > { %6769 = vst [vmem:[%s10713_s15 + $0x20] sm:$0xff] %v6742_v63  ;;  %v6548_v19 = vadd.f32 %v6486_v33, %v6255_v8  ;;  %v6409_v56 = vor.u32 %v6408_v44, %v6405_v57  ;;  %v6604_v33 = vrot.slane %v6285_v2, 3  ;;  %v6117_v22 = vsel %vm1571_vm5, %v6114_v10, %v6116_v30 }
 0x5e0   : > { %v6489_v48 = vpop.f32.mrf.mxu1  ;;  %v5969_v8 = vadd.f32 %v5912_v12, %v10511_v25 }
 0x5e1   : > { %v6410_v61 = vsel %vm1767_vm6, %v6400_v36, %v6409_v56  ;;  %v6605_v14 = vsel %vm869_vm3, %v6602_v13, %v6604_v33 }
 0x5e2   : > { %v5914_v45 = vpop.f32.mrf.mxu3 }
 0x5e3   : > { %7729 = vmatmul.msk.bf16.gmra.mxu1 %vm419_vm1, %v6401_v18  ;;  %v5970_v12 = vadd.f32 %v5914_v45, %v10519_v11 }
 0x5e4   : > { %v6681_v17 = vpop.f32.mrf.mxu2  ;;  %v6196_v29 = vpop.f32.mrf.mxu0 }
 0x5e5   : > { %v6743_v31 = vadd.f32 %v6681_v17, %v6548_v19  ;;  %v6256_v24 = vadd.f32 %v6196_v29, %v5967_v53 }
 0x5e7   : > { %6770 = vst [vmem:[%s10713_s15 + $0x28] sm:$0xff] %v6743_v31  ;;  %7639 = vmatmul.msk.bf16.gmra.mxu3 %vm419_vm1, %v5828_v7  ;;  %7707 = vmatmul.msk.bf16.gmra.mxu0 %vm419_vm1, %v6115_v49  ;;  %v6549_v27 = vadd.f32 %v6489_v48, %v6256_v24 }
 0x5e8   : > { %v6491_v9 = vpop.f32.mrf.mxu1 }
 0x5e9   : > { %7751 = vmatmul.msk.bf16.gmra.mxu2 %vm419_vm1, %v6603_v58 }
 0x5ea   : > { %v5917_v62 = vpop.f32.mrf.mxu3 }
 0x5eb   : > { %v5971_v18 = vadd.f32 %v5917_v62, %v10532_v39 }
 0x5ec   : > { %v6684_v55 = vpop.f32.mrf.mxu2  ;;  %v6198_v54 = vpop.f32.mrf.mxu0 }
 0x5ed   : > { %v6744_v43 = vadd.f32 %v6684_v55, %v6549_v27  ;;  %v6257_v40 = vadd.f32 %v6198_v54, %v5968_v38 }
 0x5ef   : > { %6771 = vst [vmem:[%s10713_s15 + $0x30] sm:$0xff] %v6744_v43  ;;  %v6550_v15 = vadd.f32 %v6491_v9, %v6257_v40 }
 0x5f0   : > { %v6494_v28 = vpop.f32.mrf.mxu1 }
 0x5f2   : > { %v5919_v63 = vpop.f32.mrf.mxu3 }
 0x5f3   : > { %7730 = vmatmul.msk.bf16.gmra.mxu1 %vm419_vm1, %v6410_v61  ;;  %v5972_v0 = vadd.f32 %v5919_v63, %v10539_v50 }
 0x5f4   : > { %v6686_v21 = vpop.f32.mrf.mxu2  ;;  %v6201_v3 = vpop.f32.mrf.mxu0 }
 0x5f5   : > { %v6745_v46 = vadd.f32 %v6686_v21, %v6550_v15  ;;  %v6258_v19 = vadd.f32 %v6201_v3, %v5969_v8 }
 0x5f7   : > { %6772 = vst [vmem:[%s10713_s15 + $0x38] sm:$0xff] %v6745_v46  ;;  %7708 = vmatmul.msk.bf16.gmra.mxu0 %vm419_vm1, %v6117_v22  ;;  %v6551_v10 = vadd.f32 %v6494_v28, %v6258_v19 }
 0x5f8   : > { %v6496_v49 = vpop.f32.mrf.mxu1 }
 0x5f9   : > { %7752 = vmatmul.msk.bf16.gmra.mxu2 %vm419_vm1, %v6605_v14 }
 0x5fa   : > { %v5922_v7 = vpop.f32.mrf.mxu3 }
 0x5fb   : > { %v5973_v38 = vadd.f32 %v5922_v7, %v10553_v59 }
 0x5fc   : > { %v6689_v17 = vpop.f32.mrf.mxu2  ;;  %v6203_v25 = vpop.f32.mrf.mxu0 }
 0x5fd   : > { %v6746_v29 = vadd.f32 %v6689_v17, %v6551_v10  ;;  %v6259_v36 = vadd.f32 %v6203_v25, %v5970_v12 }
 0x5ff   : > { %6773 = vst [vmem:[%s10713_s15 + $0x40] sm:$0xff] %v6746_v29  ;;  %v6552_v53 = vadd.f32 %v6496_v49, %v6259_v36 }
 0x600   : > { %v6499_v2 = vpop.f32.mrf.mxu1 }
 0x602   : > { %v5924_v13 = vpop.f32.mrf.mxu3 }
 0x603   : > { %7731 = vmatmul.msk.bf16.gmra.mxu1 %vm419_vm1, %v6409_v56  ;;  %v5974_v56 = vadd.f32 %v5924_v13, %v10561_v1 }
 0x604   : > { %v6691_v31 = vpop.f32.mrf.mxu2  ;;  %v6206_v48 = vpop.f32.mrf.mxu0 }
 0x605   : > { %v6747_v16 = vadd.f32 %v6691_v31, %v6552_v53  ;;  %v6260_v58 = vadd.f32 %v6206_v48, %v5971_v18 }
 0x607   : > { %6774 = vst [vmem:[%s10713_s15 + $0x48] sm:$0xff] %v6747_v16  ;;  %7709 = vmatmul.msk.bf16.gmra.mxu0 %vm419_vm1, %v6116_v30  ;;  %v6553_v45 = vadd.f32 %v6499_v2, %v6260_v58 }
 0x608   : > { %v6501_v27 = vpop.f32.mrf.mxu1 }
 0x609   : > { %7753 = vmatmul.msk.bf16.gmra.mxu2 %vm419_vm1, %v6604_v33 }
 0x60a   : > { %v5927_v11 = vpop.f32.mrf.mxu3 }
 0x60b   : > { %v5975_v8 = vadd.f32 %v5927_v11, %v10575_v4 }
 0x60c   : > { %v6694_v24 = vpop.f32.mrf.mxu2  ;;  %v6208_v6 = vpop.f32.mrf.mxu0 }
 0x60d   : > { %v6748_v60 = vadd.f32 %v6694_v24, %v6553_v45  ;;  %v6261_v39 = vadd.f32 %v6208_v6, %v5972_v0 }
 0x60f   : > { %6775 = vst [vmem:[%s10713_s15 + $0x50] sm:$0xff] %v6748_v60  ;;  %v6554_v55 = vadd.f32 %v6501_v27, %v6261_v39 }
 0x610   : > { %v6504_v9 = vpop.f32.mrf.mxu1 }
 0x612   : > { %v5929_v62 = vpop.f32.mrf.mxu3 }
 0x613   : > { %v5976_v10 = vadd.f32 %v5929_v62, %v10582_v26 }
 0x614   : > { %v6696_v54 = vpop.f32.mrf.mxu2  ;;  %v6211_v47 = vpop.f32.mrf.mxu0 }
 0x615   : > { %v6749_v43 = vadd.f32 %v6696_v54, %v6554_v55  ;;  %v6262_v57 = vadd.f32 %v6211_v47, %v5973_v38 }
 0x617   : > { %6776 = vst [vmem:[%s10713_s15 + $0x58] sm:$0xff] %v6749_v43  ;;  %v6555_v40 = vadd.f32 %v6504_v9, %v6262_v57 }
 0x618   : > { %v6506_v33 = vpop.f32.mrf.mxu1 }
 0x61a   : > { %v5932_v44 = vpop.f32.mrf.mxu3 }
 0x61b   : > { %v5977_v13 = vadd.f32 %v5932_v44, %v10596_v23 }
 0x61c   : > { %v6699_v30 = vpop.f32.mrf.mxu2  ;;  %v6213_v50 = vpop.f32.mrf.mxu0 }
 0x61d   : > { %v6750_v63 = vadd.f32 %v6699_v30, %v6555_v40  ;;  %v6263_v15 = vadd.f32 %v6213_v50, %v5974_v56 }
 0x61f   : > { %6777 = vst [vmem:[%s10713_s15 + $0x60] sm:$0xff] %v6750_v63  ;;  %v6556_v3 = vadd.f32 %v6506_v33, %v6263_v15 }
 0x620   : > { %v6509_v28 = vpop.f32.mrf.mxu1 }
 0x622   : > { %v5934_v21 = vpop.f32.mrf.mxu3 }
 0x623   : > { %v5978_v58 = vadd.f32 %v5934_v21, %v10603_v51 }
 0x624   : > { %v6701_v22 = vpop.f32.mrf.mxu2  ;;  %v6216_v59 = vpop.f32.mrf.mxu0 }
 0x625   : > { %v6751_v46 = vadd.f32 %v6701_v22, %v6556_v3  ;;  %v6264_v61 = vadd.f32 %v6216_v59, %v5975_v8 }
 0x627   : > { %6778 = vst [vmem:[%s10713_s15 + $0x68] sm:$0xff] %v6751_v46  ;;  %v6557_v19 = vadd.f32 %v6509_v28, %v6264_v61 }
 0x628   : > { %v6511_v25 = vpop.f32.mrf.mxu1 }
 0x62a   : > { %v5937_v14 = vpop.f32.mrf.mxu3 }
 0x62b   : > { %v5979_v27 = vadd.f32 %v5937_v14, %v10617_v35 }
 0x62c   : > { %v6704_v7 = vpop.f32.mrf.mxu2  ;;  %v6218_v1 = vpop.f32.mrf.mxu0 }
 0x62d   : > { %v6752_v17 = vadd.f32 %v6704_v7, %v6557_v19  ;;  %v6265_v12 = vadd.f32 %v6218_v1, %v5976_v10 }
 0x62f   : > { %6779 = vst [vmem:[%s10713_s15 + $0x70] sm:$0xff] %v6752_v17  ;;  %v6558_v49 = vadd.f32 %v6511_v25, %v6265_v12 }
 0x630   : > { %v6514_v31 = vpop.f32.mrf.mxu1 }
 0x632   : > { %v5939_v29 = vpop.f32.mrf.mxu3 }
 0x633   : > { %v5980_v43 = vadd.f32 %v5939_v29, %v10624_v41 }
 0x634   : > { %v6706_v36 = vpop.f32.mrf.mxu2  ;;  %v6221_v4 = vpop.f32.mrf.mxu0 }
 0x635   : > { %v6753_v53 = vadd.f32 %v6706_v36, %v6558_v49  ;;  %v6266_v48 = vadd.f32 %v6221_v4, %v5977_v13 }
 0x637   : > { %6780 = vst [vmem:[%s10713_s15 + $0x78] sm:$0xff] %v6753_v53  ;;  %v6559_v16 = vadd.f32 %v6514_v31, %v6266_v48 }
 0x638   : > { %v6516_v45 = vpop.f32.mrf.mxu1 }
 0x63a   : > { %v5942_v18 = vpop.f32.mrf.mxu3 }
 0x63b   : > { %v5981_v56 = vadd.f32 %v5942_v18, %v10638_v42 }
 0x63c   : > { %v6709_v2 = vpop.f32.mrf.mxu2  ;;  %v6223_v26 = vpop.f32.mrf.mxu0 }
 0x63d   : > { %v6754_v11 = vadd.f32 %v6709_v2, %v6559_v16  ;;  %v6267_v24 = vadd.f32 %v6223_v26, %v5978_v58 }
 0x63f   : > { %6781 = vst [vmem:[%s10713_s15 + $0x80] sm:$0xff] %v6754_v11  ;;  %v6560_v0 = vadd.f32 %v6516_v45, %v6267_v24 }
 0x640   : > { %v6519_v62 = vpop.f32.mrf.mxu1 }
 0x642   : > { %v5944_v6 = vpop.f32.mrf.mxu3 }
 0x643   : > { %v5982_v59 = vadd.f32 %v5944_v6, %v10645_v5 }
 0x644   : > { %v6711_v60 = vpop.f32.mrf.mxu2  ;;  %v6226_v23 = vpop.f32.mrf.mxu0 }
 0x645   : > { %v6755_v39 = vadd.f32 %v6711_v60, %v6560_v0  ;;  %v6268_v55 = vadd.f32 %v6226_v23, %v5979_v27 }
 0x647   : > { %6782 = vst [vmem:[%s10713_s15 + $0x88] sm:$0xff] %v6755_v39  ;;  %v6561_v47 = vadd.f32 %v6519_v62, %v6268_v55 }
 0x648   : > { %v6521_v57 = vpop.f32.mrf.mxu1 }
 0x64a   : > { %v5947_v54 = vpop.f32.mrf.mxu3 }
 0x64b   : > { %v5983_v7 = vadd.f32 %v5947_v54, %v10659_v37 }
 0x64c   : > { %v6714_v38 = vpop.f32.mrf.mxu2  ;;  %v6228_v51 = vpop.f32.mrf.mxu0 }
 0x64d   : > { %v6756_v9 = vadd.f32 %v6714_v38, %v6561_v47  ;;  %v6269_v44 = vadd.f32 %v6228_v51, %v5980_v43 }
 0x64f   : > { %6783 = vst [vmem:[%s10713_s15 + $0x90] sm:$0xff] %v6756_v9  ;;  %v6562_v30 = vadd.f32 %v6521_v57, %v6269_v44 }
 0x650   : > { %v6524_v33 = vpop.f32.mrf.mxu1 }
 0x652   : > { %v5949_v40 = vpop.f32.mrf.mxu3 }
 0x653   : > { %v5984_v49 = vadd.f32 %v5949_v40, %v10665_v34 }
 0x654   : > { %v6716_v50 = vpop.f32.mrf.mxu2  ;;  %v6231_v35 = vpop.f32.mrf.mxu0 }
 0x655   : > { %v6757_v63 = vadd.f32 %v6716_v50, %v6562_v30  ;;  %v6270_v15 = vadd.f32 %v6231_v35, %v5981_v56 }
 0x657   : > { %6784 = vst [vmem:[%s10713_s15 + $0x98] sm:$0xff] %v6757_v63  ;;  %v6563_v3 = vadd.f32 %v6524_v33, %v6270_v15 }
 0x658   : > { %v6526_v46 = vpop.f32.mrf.mxu1 }
 0x65a   : > { %v5952_v21 = vpop.f32.mrf.mxu3 }
 0x65b   : > { %v5985_v18 = vadd.f32 %v5952_v21, %v10674_v32 }
 0x65c   : > { %v6719_v22 = vpop.f32.mrf.mxu2  ;;  %v6233_v41 = vpop.f32.mrf.mxu0 }
 0x65d   : > { %v6758_v8 = vadd.f32 %v6719_v22, %v6563_v3  ;;  %v6271_v28 = vadd.f32 %v6233_v41, %v5982_v59 }
 0x65f   : > { %6785 = vst [vmem:[%s10713_s15 + $0xa0] sm:$0xff] %v6758_v8  ;;  %v6564_v14 = vadd.f32 %v6526_v46, %v6271_v28 }
 0x660   : > { %v6529_v10 = vpop.f32.mrf.mxu1 }
 0x662   : > { %v5954_v61 = vpop.f32.mrf.mxu3 }
 0x663   : > { %v5986_v45 = vadd.f32 %v5954_v61, %v10678_v20 }
 0x664   : > { %v6721_v19 = vpop.f32.mrf.mxu2  ;;  %v6236_v42 = vpop.f32.mrf.mxu0 }
 0x665   : > { %v6759_v1 = vadd.f32 %v6721_v19, %v6564_v14  ;;  %v6272_v17 = vadd.f32 %v6236_v42, %v5983_v7 }
 0x667   : > { %6786 = vst [vmem:[%s10713_s15 + $0xa8] sm:$0xff] %v6759_v1  ;;  %v6565_v12 = vadd.f32 %v6529_v10, %v6272_v17 }
 0x668   : > { %v6531_v4 = vpop.f32.mrf.mxu1 }
 0x66a   : > { %v5957_v25 = vpop.f32.mrf.mxu3 }
 0x66b   : > { %v5987_v32 = vadd.f32 %v5957_v25, %v10691_v52 }
 0x66c   : > { %v6724_v29 = vpop.f32.mrf.mxu2  ;;  %v6238_v5 = vpop.f32.mrf.mxu0 }
 0x66d   : > { %v6760_v36 = vadd.f32 %v6724_v29, %v6565_v12  ;;  %v6273_v13 = vadd.f32 %v6238_v5, %v5984_v49 }
 0x66f   : > { %6787 = vst [vmem:[%s10713_s15 + $0xb0] sm:$0xff] %v6760_v36  ;;  %v6566_v31 = vadd.f32 %v6531_v4, %v6273_v13 }
 0x670   : > { %v6534_v2 = vpop.f32.mrf.mxu1 }
 0x672   : > { %v5959_v53 = vpop.f32.mrf.mxu3 }
 0x674   : > { %v6726_v37 = vpop.f32.mrf.mxu2  ;;  %v6241_v48 = vpop.f32.mrf.mxu0 }
 0x675   : > { %v6761_v16 = vadd.f32 %v6726_v37, %v6566_v31  ;;  %v6274_v26 = vadd.f32 %v6241_v48, %v5985_v18 }
 0x677   : > { %6788 = vst [vmem:[%s10713_s15 + $0xb8] sm:$0xff] %v6761_v16  ;;  %v6567_v58 = vadd.f32 %v6534_v2, %v6274_v26 }
 0x678   : > { %v6536_v6 = vpop.f32.mrf.mxu1 }
 0x67c   : > { %v6729_v11 = vpop.f32.mrf.mxu2  ;;  %v6243_v34 = vpop.f32.mrf.mxu0 }
 0x67d   : > { %v6762_v24 = vadd.f32 %v6729_v11, %v6567_v58  ;;  %v6275_v0 = vadd.f32 %v6243_v34, %v5986_v45 }
 0x67f   : > { %6789 = vst [vmem:[%s10713_s15 + $0xc0] sm:$0xff] %v6762_v24  ;;  %v6568_v60 = vadd.f32 %v6536_v6, %v6275_v0 }
 0x680   : > { %v6539_v62 = vpop.f32.mrf.mxu1 }
 0x684   : > { %v6731_v23 = vpop.f32.mrf.mxu2  ;;  %v6246_v27 = vpop.f32.mrf.mxu0 }
 0x685   : > { %v6763_v39 = vadd.f32 %v6731_v23, %v6568_v60  ;;  %v6276_v20 = vadd.f32 %v6246_v27, %v5987_v32 }
 0x687   : > { %6790 = vst [vmem:[%s10713_s15 + $0xc8] sm:$0xff] %v6763_v39  ;;  %v6569_v55 = vadd.f32 %v6539_v62, %v6276_v20 }
 0x688   : > { %v6541_v51 = vpop.f32.mrf.mxu1 }
 0x68c   : > { %v6734_v54 = vpop.f32.mrf.mxu2  ;;  %v6248_v47 = vpop.f32.mrf.mxu0 }
 0x68d   : > { %v6764_v38 = vadd.f32 %v6734_v54, %v6569_v55 }
 0x68f   : > { %6791 = vst [vmem:[%s10713_s15 + $0xd0] sm:$0xff] %v6764_v38 }
 0x690   : > { %8464 = shalt.err (!%p8461_p9)
}
 0x691   : > { %s8524_s5 = smov 128   ;;  %s8525_s6 = smov 8  }
 0x692   : > { %8333 = dma.vmem_to_hbm [thread:$0]  (%p8581_p4), %s6808_s24, 3456, %s6810_s25, %s6793_s12, %s8524_s5, %s8524_s5, %s8525_s6  }
 0x694   : > { %v6736_v52 = vpop.f32.mrf.mxu2 }
 0x695 PF: > { %p8345_p10 = scmp.ge.s32.totalorder %s8519_s14, 2  ;;  %s6824_s7 = sand.u32 1, %s8499_s9  }
 0x696   : > { %s6825_s8 = scalar_lea.sflag [#allocation4], %s6824_s7 }
 0x697   : > { %p8340_p11 = pnand %p8345_p10, %p8588_p8 }
 0x699   : > { %p8341_p12 = pneg %p8340_p11 }
 0x69b   : > { %8494 = dma.done.wait (%p8341_p12), %s6825_s8, 3456  }
 0x69c   : > { %8496 = vsyncadd (%p8341_p12), %s6825_s8, 4294963840  ;;  %s16_s14 = sadd.s32 1, %s8519_s14   ;;  %s10901_s9 = smov %s8503_s10 }
 0x69d   : > { %p13_p13 = scmp.ge.s32.totalorder %s16_s14, 4   ;;  %s10902_s10 = smov %s8507_s11 }
 0x69e   : > { %s10903_s11 = smov %s8594_s22  ;;  %s10904_s12 = smov %s8515_s13 }
 0x69f   : > { %s10905_s13 = smov %s10907_s17  ;;  %15 = sbr.rel (!%p13_p13) target bundleno = 5 (0x5), region = 94 }
 0x6a4   :  { %6831 = vsyncpa [#allocation3], 1 }
 0x6a5   :  { %6833 = vsyncpa [#allocation3 + $0x1], 1 }
 0x6a6   :  { %6834 = vsyncpa [#allocation4], 1 }
 0x6a7   :  { %6836 = vsyncpa [#allocation4 + $0x1], 1 }

</bundles_post_ra>
